<compile_context>
chip_gen: v7x
topology: tpu7x:2x2x1
jax: 0.10.0
libtpu: 0.0.40
codegen_flags: <defaults>
</compile_context>

<pallas_src>
import functools

import jax
import jax.numpy as jnp
from jax.experimental import pallas as pl
from jax.experimental.pallas import tpu as pltpu


# -----------------------------------------------------------------------------
# Pallas kernel: full forward (encode -> reparameterize -> decode -> log_softmax)
# -----------------------------------------------------------------------------
def _vae_kernel(alpha, seq, latent,
                x_ref, eps_ref,
                w1_ref, b1_ref, w1h_ref, b1h_ref,
                w2_ref, b2_ref,
                w3_ref, b3_ref, w3h_ref, b3h_ref,
                wout_ref, bout_ref,
                out_ref, mulv_ref):
    f32 = jnp.float32
    bf16 = jnp.bfloat16

    # ---------------- encoder ----------------
    x = x_ref[...].astype(bf16)                                           # (TB, Din)
    h = jnp.dot(x, w1_ref[...], preferred_element_type=f32) + b1_ref[...]
    h = jnp.maximum(h, 0.0)
    h = jnp.dot(h.astype(bf16), w1h_ref[...], preferred_element_type=f32) + b1h_ref[...]
    h = jnp.maximum(h, 0.0)

    # fused mu|logvar projection: one dot into (TB, 2L), stored as one output
    ml = jnp.dot(h.astype(bf16), w2_ref[...], preferred_element_type=f32) + b2_ref[...]
    mulv_ref[...] = ml
    mu = ml[:, :latent]
    logvar = ml[:, latent:]

    # ---------------- reparameterize ----------------
    z = mu + eps_ref[...] * jnp.exp(0.5 * logvar)

    # ---------------- decoder ----------------
    d = jnp.dot(z.astype(bf16), w3_ref[...], preferred_element_type=f32) + b3_ref[...]
    d = jnp.maximum(d, 0.0)
    d = jnp.dot(d.astype(bf16), w3h_ref[...], preferred_element_type=f32) + b3h_ref[...]
    d = jax.nn.sigmoid(d)                                                 # (TB, H2)

    # softplus(lamb) is pre-folded into wout/bout, so decode is a plain linear here.
    pre = jnp.dot(d.astype(bf16), wout_ref[...], preferred_element_type=f32) + bout_ref[...]

    # ---------------- log_softmax over the alphabet axis ----------------
    # flat feature index j = a*seq + s.  With seq a multiple of 128 each alphabet
    # chunk is a whole number of 128-lane vregs, so the slices are lane-aligned and
    # the final store is a single full-width, unmasked (lane-dense) store.
    m = pre[:, 0:seq]
    for a in range(1, alpha):
        m = jnp.maximum(m, pre[:, a * seq:(a + 1) * seq])
    ssum = jnp.exp(pre[:, 0:seq] - m)
    for a in range(1, alpha):
        ssum = ssum + jnp.exp(pre[:, a * seq:(a + 1) * seq] - m)
    lse = m + jnp.log(ssum)                                               # (TB, seq)
    out_ref[...] = pre - jnp.concatenate([lse] * alpha, axis=-1)          # (TB, Din)


# -----------------------------------------------------------------------------
# Parameter construction (deterministic, mirrors the PyTorch __init__ + sampling)
# -----------------------------------------------------------------------------
def make_params(key, *, alphabet_len, seq_len, latent_size, hidden_size,
                div=8, inner=16, h2_div=1, weight_dtype=jnp.bfloat16):
    A, S, L, H = alphabet_len, seq_len, latent_size, hidden_size
    Din = A * S
    H34 = int(H * 3 / 4)
    H16 = H // 16
    H2 = H // h2_div

    ks = iter(jax.random.split(key, 16))

    def xavier(k, out_f, in_f):
        std = (2.0 / (in_f + out_f)) ** 0.5
        return (std * jax.random.normal(k, (out_f, in_f))).astype(jnp.float32)

    def sample_var_weight(k, out_f, in_f):
        # weight_mean ~ N(0, sqrt(2/(in+out))), weight_logvar = -5 ; rsample()
        km, ke = jax.random.split(k)
        std = (2.0 / (in_f + out_f)) ** 0.5
        w_mean = std * jax.random.normal(km, (out_f, in_f))
        w = w_mean + jnp.exp(-5.0 * 0.5) * jax.random.normal(ke, (out_f, in_f))
        return w.astype(jnp.float32)

    def sample_var_bias(k, out_f):
        # bias_mean = 0.1, bias_logvar = -5 ; rsample()
        return (0.1 + jnp.exp(-5.0 * 0.5) * jax.random.normal(k, (out_f,))).astype(jnp.float32)

    # deterministic encoder linears: xavier weights, bias 0.1 (fc22 bias = -5)
    w1 = xavier(next(ks), H34, Din);  b1 = jnp.full((H34,), 0.1, jnp.float32)
    w1h = xavier(next(ks), H34, H34); b1h = jnp.full((H34,), 0.1, jnp.float32)
    w21 = xavier(next(ks), L, H34);   b21 = jnp.full((L,), 0.1, jnp.float32)
    w22 = xavier(next(ks), L, H34);   b22 = jnp.full((L,), -5.0, jnp.float32)

    # variational decoder layers (one fresh sample, as forward() would draw)
    w3 = sample_var_weight(next(ks), H16, L);   b3 = sample_var_bias(next(ks), H16)
    w3h = sample_var_weight(next(ks), H2, H16); b3h = sample_var_bias(next(ks), H2)
    W_w = sample_var_weight(next(ks), H2 * S, inner)   # W.weight  (H2*S, inner)
    C_w = sample_var_weight(next(ks), inner, A)        # C.weight  (inner, A)
    S_w = sample_var_weight(next(ks), H2 // div, S)    # S.weight  (H2//div, S)

    lamb = jnp.full((Din,), 0.1, jnp.float32)          # self.lamb
    W_out_b = jnp.full((Din,), 0.1, jnp.float32)       # self.W_out_b

    # --- glue: data-independent W_out weight construction (mirrors decode()) ---
    M = W_w @ C_w                                       # (H2*S, A)
    Wout3 = M.reshape(H2, A, S)                         # == torch contiguous .view
    S_sig = jax.nn.sigmoid(jnp.tile(S_w, (div, 1)))     # S.repeat(div, 1) -> sigmoid
    Wout = (Wout3 * S_sig[:, None, :]).reshape(H2, Din)

    # Fold the constant (1 + lamb.exp()).log() scale into the output layer (stable
    # softplus instead of log1p(exp)).
    scale = jax.nn.softplus(lamb)                       # (Din,)
    Wout = Wout * scale[None, :]
    bout = W_out_b * scale

    # Fuse the mu / logvar projections into one (H34, 2L) weight + (2L,) bias.
    w2 = jnp.concatenate([w21.T, w22.T], axis=1)
    b2 = jnp.concatenate([b21, b22], axis=0)

    row = lambda v: v.reshape(1, -1).astype(jnp.float32)
    wd = weight_dtype
    return dict(
        w1=w1.T.astype(wd), b1=row(b1),
        w1h=w1h.T.astype(wd), b1h=row(b1h),
        w2=w2.astype(wd), b2=row(b2),
        w3=w3.T.astype(wd), b3=row(b3),
        w3h=w3h.T.astype(wd), b3h=row(b3h),
        wout=Wout.astype(wd), bout=row(bout),
    )


# -----------------------------------------------------------------------------
# Wrapper
# -----------------------------------------------------------------------------
def vae_forward_pallas(x, eps, params, *, alphabet_len, seq_len, latent_size,
                       block_b=128):
    B, A, S = x.shape
    assert (A, S) == (alphabet_len, seq_len), (x.shape, alphabet_len, seq_len)
    Din = alphabet_len * seq_len
    L = latent_size
    p = params

    x_flat = x.reshape(B, Din).astype(jnp.float32)     # row-major, == torch .view
    eps = eps.astype(jnp.float32)

    # Batch tile: >=128 rows when possible so every dot fills the MXU M dimension.
    TB = block_b if B >= block_b else max(8, pl.cdiv(B, 8) * 8)
    Bp = pl.cdiv(B, TB) * TB
    if Bp != B:
        x_flat = jnp.pad(x_flat, ((0, Bp - B), (0, 0)))
        eps = jnp.pad(eps, ((0, Bp - B), (0, 0)))
    grid = (Bp // TB,)

    def tile_spec(n):                       # batch-tiled activations (pipelined)
        return pl.BlockSpec((TB, n), lambda i: (i, 0))

    def resident_spec(arr):                 # weights/biases: constant index_map
        return pl.BlockSpec(arr.shape, lambda i: (0, 0))

    weight_order = ('w1', 'b1', 'w1h', 'b1h', 'w2', 'b2',
                    'w3', 'b3', 'w3h', 'b3h', 'wout', 'bout')
    weight_args = tuple(p[k] for k in weight_order)

    # Explicit scoped-VMEM budget: resident weights + double-buffered batch tiles.
    wbytes = sum(int(a.size) * a.dtype.itemsize for a in weight_args)
    tbytes = 2 * TB * 4 * (Din + L + Din + 2 * L)      # x, eps, out, mulv (f32)
    vmem_limit = int(1.5 * (wbytes + tbytes)) + (8 << 20)
    vmem_limit = max(16 << 20, min(vmem_limit, 64 << 20))

    # TODO(synk): at production scale (hidden=2000, long seq) add a K-tiled grid
    # axis + f32 accumulator for the x @ w1 matmul instead of keeping all of w1
    # resident; unnecessary at these shapes.
    out_flat, mulv = pl.pallas_call(
        functools.partial(_vae_kernel, alphabet_len, seq_len, latent_size),
        grid=grid,
        in_specs=[tile_spec(Din), tile_spec(L)] +
                 [resident_spec(a) for a in weight_args],
        out_specs=(tile_spec(Din), tile_spec(2 * L)),
        out_shape=(jax.ShapeDtypeStruct((Bp, Din), jnp.float32),
                   jax.ShapeDtypeStruct((Bp, 2 * L), jnp.float32)),
        compiler_params=pltpu.CompilerParams(
            dimension_semantics=("parallel",),
            vmem_limit_bytes=vmem_limit),
    )(x_flat, eps, *weight_args)

    out = out_flat[:B].reshape(B, alphabet_len, seq_len)   # row-major, == torch .view
    mu = mulv[:B, :L]
    logvar = mulv[:B, L:]
    return out, mu, logvar


# Pure-JAX reference using identical params / noise / bf16 matmul inputs.
def vae_forward_ref(x, eps, p, *, alphabet_len, seq_len, latent_size):
    bf16 = jnp.bfloat16
    B = x.shape[0]
    xf = x.reshape(B, -1)
    dot = lambda a, w: jnp.dot(a.astype(bf16), w, preferred_element_type=jnp.float32)
    h = jax.nn.relu(dot(xf, p['w1']) + p['b1'])
    h = jax.nn.relu(dot(h, p['w1h']) + p['b1h'])
    ml = dot(h, p['w2']) + p['b2']
    mu, logvar = ml[:, :latent_size], ml[:, latent_size:]
    z = mu + eps * jnp.exp(0.5 * logvar)
    d = jax.nn.relu(dot(z, p['w3']) + p['b3'])
    d = jax.nn.sigmoid(dot(d, p['w3h']) + p['b3h'])
    pre = dot(d, p['wout']) + p['bout']
    out = jax.nn.log_softmax(pre.reshape(B, alphabet_len, seq_len), axis=1)
    return out, mu, logvar


if __name__ == "__main__":
    # Small shapes consistent with the module (hidden_size is 2000 in the original;
    # reduced so the problem stays tiny while keeping every ratio integral:
    # h*3/4, h//16, h//h2_div, h//h2_div//div).  seq_len=128 keeps the alphabet
    # chunks lane-aligned; B=256 gives a 2-step batch grid with full 128-row tiles.
    B = 256
    ALPHA, SEQ = 8, 128         # alphabet_len, seq_len -> input_size = 1024
    LATENT = 32
    HIDDEN = 256
    DIV, INNER, H2_DIV = 8, 16, 1

    key = jax.random.PRNGKey(0)
    kx, keps, kparams = jax.random.split(key, 3)

    x = jax.random.uniform(kx, (B, ALPHA, SEQ), jnp.float32)
    eps = jax.random.normal(keps, (B, LATENT), jnp.float32)   # randn_like(mu)
    params = make_params(kparams, alphabet_len=ALPHA, seq_len=SEQ,
                         latent_size=LATENT, hidden_size=HIDDEN,
                         div=DIV, inner=INNER, h2_div=H2_DIV)

    out, mu, logvar = vae_forward_pallas(x, eps, params,
                                         alphabet_len=ALPHA, seq_len=SEQ,
                                         latent_size=LATENT)
    jax.block_until_ready((out, mu, logvar))

    # sanity 1: log_softmax over the alphabet axis exponentiates-sums to 1
    prob_sums = jnp.exp(out).sum(axis=1)
    assert bool(jnp.allclose(prob_sums, 1.0, atol=1e-3)), prob_sums

    # sanity 2: matches a pure-JAX reference using identical params / noise
    out_r, mu_r, logvar_r = vae_forward_ref(x, eps, params,
                                            alphabet_len=ALPHA, seq_len=SEQ,
                                            latent_size=LATENT)
    assert bool(jnp.allclose(out, out_r, atol=2e-3, rtol=2e-3))
    assert bool(jnp.allclose(mu, mu_r, atol=2e-3, rtol=2e-3))
    assert bool(jnp.allclose(logvar, logvar_r, atol=2e-3, rtol=2e-3))

    print("KERNEL_OK")
</pallas_src>

<mosaic_0001>
module attributes {stable_mosaic.version = 11 : i64} {
  func.func @_vae_kernel(%arg0: i32, %arg1: memref<128x1024xf32, #tpu.memory_space<vmem>>, %arg2: memref<128x32xf32, #tpu.memory_space<vmem>>, %arg3: memref<1024x192xbf16, #tpu.memory_space<vmem>>, %arg4: memref<1x192xf32, #tpu.memory_space<vmem>>, %arg5: memref<192x192xbf16, #tpu.memory_space<vmem>>, %arg6: memref<1x192xf32, #tpu.memory_space<vmem>>, %arg7: memref<192x64xbf16, #tpu.memory_space<vmem>>, %arg8: memref<1x64xf32, #tpu.memory_space<vmem>>, %arg9: memref<32x16xbf16, #tpu.memory_space<vmem>>, %arg10: memref<1x16xf32, #tpu.memory_space<vmem>>, %arg11: memref<16x256xbf16, #tpu.memory_space<vmem>>, %arg12: memref<1x256xf32, #tpu.memory_space<vmem>>, %arg13: memref<256x1024xbf16, #tpu.memory_space<vmem>>, %arg14: memref<1x1024xf32, #tpu.memory_space<vmem>>, %arg15: memref<128x1024xf32, #tpu.memory_space<vmem>>, %arg16: memref<128x64xf32, #tpu.memory_space<vmem>>) attributes {dimension_semantics = [#tpu.dimension_semantics<parallel>], iteration_bounds = array<i64: 2>, scalar_prefetch = 0 : i64, scratch_operands = 0 : i64, tpu.core_type = #tpu.core_type<tc>, window_params = [{transform_indices = @transform_0, window_bounds = array<i64: 128, 1024>}, {transform_indices = @transform_1, window_bounds = array<i64: 128, 32>}, {pipeline_mode = #tpu.pipeline_mode<synchronous>, transform_indices = @transform_2, window_bounds = array<i64: 1024, 192>}, {pipeline_mode = #tpu.pipeline_mode<synchronous>, transform_indices = @transform_3, window_bounds = array<i64: 1, 192>}, {pipeline_mode = #tpu.pipeline_mode<synchronous>, transform_indices = @transform_4, window_bounds = array<i64: 192, 192>}, {pipeline_mode = #tpu.pipeline_mode<synchronous>, transform_indices = @transform_5, window_bounds = array<i64: 1, 192>}, {pipeline_mode = #tpu.pipeline_mode<synchronous>, transform_indices = @transform_6, window_bounds = array<i64: 192, 64>}, {pipeline_mode = #tpu.pipeline_mode<synchronous>, transform_indices = @transform_7, window_bounds = array<i64: 1, 64>}, {pipeline_mode = #tpu.pipeline_mode<synchronous>, transform_indices = @transform_8, window_bounds = array<i64: 32, 16>}, {pipeline_mode = #tpu.pipeline_mode<synchronous>, transform_indices = @transform_9, window_bounds = array<i64: 1, 16>}, {pipeline_mode = #tpu.pipeline_mode<synchronous>, transform_indices = @transform_10, window_bounds = array<i64: 16, 256>}, {pipeline_mode = #tpu.pipeline_mode<synchronous>, transform_indices = @transform_11, window_bounds = array<i64: 1, 256>}, {pipeline_mode = #tpu.pipeline_mode<synchronous>, transform_indices = @transform_12, window_bounds = array<i64: 256, 1024>}, {pipeline_mode = #tpu.pipeline_mode<synchronous>, transform_indices = @transform_13, window_bounds = array<i64: 1, 1024>}, {transform_indices = @transform_14, window_bounds = array<i64: 128, 1024>}, {transform_indices = @transform_15, window_bounds = array<i64: 128, 64>}]} {
    %c0 = arith.constant 0 : index
    %c0_0 = arith.constant 0 : index
    %0 = vector.load %arg1[%c0, %c0_0] : memref<128x1024xf32, #tpu.memory_space<vmem>>, vector<128x1024xf32>
    %1 = arith.truncf %0 : vector<128x1024xf32> to vector<128x1024xbf16>
    %c0_1 = arith.constant 0 : index
    %c0_2 = arith.constant 0 : index
    %2 = vector.load %arg3[%c0_1, %c0_2] : memref<1024x192xbf16, #tpu.memory_space<vmem>>, vector<1024x192xbf16>
    %cst = arith.constant dense<0.000000e+00> : vector<128x192xf32>
    %3 = tpu.matmul %1, %2, %cst {dimension_numbers = #tpu.dot_dimension_numbers<[1], [0], [0], [1], [0, 0, 1, 1], [], []>} : vector<128x1024xbf16>, vector<1024x192xbf16>, vector<128x192xf32> -> vector<128x192xf32>
    %c0_3 = arith.constant 0 : index
    %c0_4 = arith.constant 0 : index
    %4 = vector.load %arg4[%c0_3, %c0_4] : memref<1x192xf32, #tpu.memory_space<vmem>>, vector<1x192xf32>
    %5 = vector.broadcast %4 : vector<1x192xf32> to vector<128x192xf32>
    %6 = arith.addf %3, %5 : vector<128x192xf32>
    %cst_5 = arith.constant 0.000000e+00 : f32
    %7 = vector.broadcast %cst_5 : f32 to vector<128x192xf32>
    %8 = arith.maximumf %6, %7 : vector<128x192xf32>
    %9 = arith.truncf %8 : vector<128x192xf32> to vector<128x192xbf16>
    %c0_6 = arith.constant 0 : index
    %c0_7 = arith.constant 0 : index
    %10 = vector.load %arg5[%c0_6, %c0_7] : memref<192x192xbf16, #tpu.memory_space<vmem>>, vector<192x192xbf16>
    %cst_8 = arith.constant dense<0.000000e+00> : vector<128x192xf32>
    %11 = tpu.matmul %9, %10, %cst_8 {dimension_numbers = #tpu.dot_dimension_numbers<[1], [0], [0], [1], [0, 0, 1, 1], [], []>} : vector<128x192xbf16>, vector<192x192xbf16>, vector<128x192xf32> -> vector<128x192xf32>
    %c0_9 = arith.constant 0 : index
    %c0_10 = arith.constant 0 : index
    %12 = vector.load %arg6[%c0_9, %c0_10] : memref<1x192xf32, #tpu.memory_space<vmem>>, vector<1x192xf32>
    %13 = vector.broadcast %12 : vector<1x192xf32> to vector<128x192xf32>
    %14 = arith.addf %11, %13 : vector<128x192xf32>
    %cst_11 = arith.constant 0.000000e+00 : f32
    %15 = vector.broadcast %cst_11 : f32 to vector<128x192xf32>
    %16 = arith.maximumf %14, %15 : vector<128x192xf32>
    %17 = arith.truncf %16 : vector<128x192xf32> to vector<128x192xbf16>
    %c0_12 = arith.constant 0 : index
    %c0_13 = arith.constant 0 : index
    %18 = vector.load %arg7[%c0_12, %c0_13] : memref<192x64xbf16, #tpu.memory_space<vmem>>, vector<192x64xbf16>
    %cst_14 = arith.constant dense<0.000000e+00> : vector<128x64xf32>
    %19 = tpu.matmul %17, %18, %cst_14 {dimension_numbers = #tpu.dot_dimension_numbers<[1], [0], [0], [1], [0, 0, 1, 1], [], []>} : vector<128x192xbf16>, vector<192x64xbf16>, vector<128x64xf32> -> vector<128x64xf32>
    %c0_15 = arith.constant 0 : index
    %c0_16 = arith.constant 0 : index
    %20 = vector.load %arg8[%c0_15, %c0_16] : memref<1x64xf32, #tpu.memory_space<vmem>>, vector<1x64xf32>
    %21 = vector.broadcast %20 : vector<1x64xf32> to vector<128x64xf32>
    %22 = arith.addf %19, %21 : vector<128x64xf32>
    %c0_17 = arith.constant 0 : index
    %c0_18 = arith.constant 0 : index
    %23 = vector.load %arg16[%c0_17, %c0_18] : memref<128x64xf32, #tpu.memory_space<vmem>>, vector<128x64xf32>
    tpu.vector_store %arg16[%c0_17, %c0_18], %22 {strides = array<i32>} : memref<128x64xf32, #tpu.memory_space<vmem>>, vector<128x64xf32>,
    %24 = vector.extract_strided_slice %22 {offsets = [0, 0], sizes = [128, 32], strides = [1, 1]} : vector<128x64xf32> to vector<128x32xf32>
    %25 = vector.extract_strided_slice %22 {offsets = [0, 32], sizes = [128, 32], strides = [1, 1]} : vector<128x64xf32> to vector<128x32xf32>
    %c0_19 = arith.constant 0 : index
    %c0_20 = arith.constant 0 : index
    %26 = vector.load %arg2[%c0_19, %c0_20] : memref<128x32xf32, #tpu.memory_space<vmem>>, vector<128x32xf32>
    %cst_21 = arith.constant 5.000000e-01 : f32
    %27 = vector.broadcast %cst_21 : f32 to vector<128x32xf32>
    %28 = arith.mulf %27, %25 : vector<128x32xf32>
    %29 = math.exp %28 : vector<128x32xf32>
    %30 = arith.mulf %26, %29 : vector<128x32xf32>
    %31 = arith.addf %24, %30 : vector<128x32xf32>
    %32 = arith.truncf %31 : vector<128x32xf32> to vector<128x32xbf16>
    %c0_22 = arith.constant 0 : index
    %c0_23 = arith.constant 0 : index
    %33 = vector.load %arg9[%c0_22, %c0_23] : memref<32x16xbf16, #tpu.memory_space<vmem>>, vector<32x16xbf16>
    %cst_24 = arith.constant dense<0.000000e+00> : vector<128x16xf32>
    %34 = tpu.matmul %32, %33, %cst_24 {dimension_numbers = #tpu.dot_dimension_numbers<[1], [0], [0], [1], [0, 0, 1, 1], [], []>} : vector<128x32xbf16>, vector<32x16xbf16>, vector<128x16xf32> -> vector<128x16xf32>
    %c0_25 = arith.constant 0 : index
    %c0_26 = arith.constant 0 : index
    %35 = vector.load %arg10[%c0_25, %c0_26] : memref<1x16xf32, #tpu.memory_space<vmem>>, vector<1x16xf32>
    %36 = vector.broadcast %35 : vector<1x16xf32> to vector<128x16xf32>
    %37 = arith.addf %34, %36 : vector<128x16xf32>
    %cst_27 = arith.constant 0.000000e+00 : f32
    %38 = vector.broadcast %cst_27 : f32 to vector<128x16xf32>
    %39 = arith.maximumf %37, %38 : vector<128x16xf32>
    %40 = arith.truncf %39 : vector<128x16xf32> to vector<128x16xbf16>
    %c0_28 = arith.constant 0 : index
    %c0_29 = arith.constant 0 : index
    %41 = vector.load %arg11[%c0_28, %c0_29] : memref<16x256xbf16, #tpu.memory_space<vmem>>, vector<16x256xbf16>
    %cst_30 = arith.constant dense<0.000000e+00> : vector<128x256xf32>
    %42 = tpu.matmul %40, %41, %cst_30 {dimension_numbers = #tpu.dot_dimension_numbers<[1], [0], [0], [1], [0, 0, 1, 1], [], []>} : vector<128x16xbf16>, vector<16x256xbf16>, vector<128x256xf32> -> vector<128x256xf32>
    %c0_31 = arith.constant 0 : index
    %c0_32 = arith.constant 0 : index
    %43 = vector.load %arg12[%c0_31, %c0_32] : memref<1x256xf32, #tpu.memory_space<vmem>>, vector<1x256xf32>
    %44 = vector.broadcast %43 : vector<1x256xf32> to vector<128x256xf32>
    %45 = arith.addf %42, %44 : vector<128x256xf32>
    %46 = arith.negf %45 : vector<128x256xf32>
    %47 = math.exp %46 : vector<128x256xf32>
    %cst_33 = arith.constant 1.000000e+00 : f32
    %48 = vector.broadcast %cst_33 : f32 to vector<128x256xf32>
    %49 = arith.addf %48, %47 : vector<128x256xf32>
    %50 = arith.divf %48, %49 : vector<128x256xf32>
    %51 = arith.truncf %50 : vector<128x256xf32> to vector<128x256xbf16>
    %c0_34 = arith.constant 0 : index
    %c0_35 = arith.constant 0 : index
    %52 = vector.load %arg13[%c0_34, %c0_35] : memref<256x1024xbf16, #tpu.memory_space<vmem>>, vector<256x1024xbf16>
    %cst_36 = arith.constant dense<0.000000e+00> : vector<128x1024xf32>
    %53 = tpu.matmul %51, %52, %cst_36 {dimension_numbers = #tpu.dot_dimension_numbers<[1], [0], [0], [1], [0, 0, 1, 1], [], []>} : vector<128x256xbf16>, vector<256x1024xbf16>, vector<128x1024xf32> -> vector<128x1024xf32>
    %c0_37 = arith.constant 0 : index
    %c0_38 = arith.constant 0 : index
    %54 = vector.load %arg14[%c0_37, %c0_38] : memref<1x1024xf32, #tpu.memory_space<vmem>>, vector<1x1024xf32>
    %55 = vector.broadcast %54 : vector<1x1024xf32> to vector<128x1024xf32>
    %56 = arith.addf %53, %55 : vector<128x1024xf32>
    %57 = vector.extract_strided_slice %56 {offsets = [0, 0], sizes = [128, 128], strides = [1, 1]} : vector<128x1024xf32> to vector<128x128xf32>
    %58 = vector.extract_strided_slice %56 {offsets = [0, 128], sizes = [128, 128], strides = [1, 1]} : vector<128x1024xf32> to vector<128x128xf32>
    %59 = arith.maximumf %57, %58 : vector<128x128xf32>
    %60 = vector.extract_strided_slice %56 {offsets = [0, 256], sizes = [128, 128], strides = [1, 1]} : vector<128x1024xf32> to vector<128x128xf32>
    %61 = arith.maximumf %59, %60 : vector<128x128xf32>
    %62 = vector.extract_strided_slice %56 {offsets = [0, 384], sizes = [128, 128], strides = [1, 1]} : vector<128x1024xf32> to vector<128x128xf32>
    %63 = arith.maximumf %61, %62 : vector<128x128xf32>
    %64 = vector.extract_strided_slice %56 {offsets = [0, 512], sizes = [128, 128], strides = [1, 1]} : vector<128x1024xf32> to vector<128x128xf32>
    %65 = arith.maximumf %63, %64 : vector<128x128xf32>
    %66 = vector.extract_strided_slice %56 {offsets = [0, 640], sizes = [128, 128], strides = [1, 1]} : vector<128x1024xf32> to vector<128x128xf32>
    %67 = arith.maximumf %65, %66 : vector<128x128xf32>
    %68 = vector.extract_strided_slice %56 {offsets = [0, 768], sizes = [128, 128], strides = [1, 1]} : vector<128x1024xf32> to vector<128x128xf32>
    %69 = arith.maximumf %67, %68 : vector<128x128xf32>
    %70 = vector.extract_strided_slice %56 {offsets = [0, 896], sizes = [128, 128], strides = [1, 1]} : vector<128x1024xf32> to vector<128x128xf32>
    %71 = arith.maximumf %69, %70 : vector<128x128xf32>
    %72 = vector.extract_strided_slice %56 {offsets = [0, 0], sizes = [128, 128], strides = [1, 1]} : vector<128x1024xf32> to vector<128x128xf32>
    %73 = arith.subf %72, %71 : vector<128x128xf32>
    %74 = math.exp %73 : vector<128x128xf32>
    %75 = vector.extract_strided_slice %56 {offsets = [0, 128], sizes = [128, 128], strides = [1, 1]} : vector<128x1024xf32> to vector<128x128xf32>
    %76 = arith.subf %75, %71 : vector<128x128xf32>
    %77 = math.exp %76 : vector<128x128xf32>
    %78 = arith.addf %74, %77 : vector<128x128xf32>
    %79 = vector.extract_strided_slice %56 {offsets = [0, 256], sizes = [128, 128], strides = [1, 1]} : vector<128x1024xf32> to vector<128x128xf32>
    %80 = arith.subf %79, %71 : vector<128x128xf32>
    %81 = math.exp %80 : vector<128x128xf32>
    %82 = arith.addf %78, %81 : vector<128x128xf32>
    %83 = vector.extract_strided_slice %56 {offsets = [0, 384], sizes = [128, 128], strides = [1, 1]} : vector<128x1024xf32> to vector<128x128xf32>
    %84 = arith.subf %83, %71 : vector<128x128xf32>
    %85 = math.exp %84 : vector<128x128xf32>
    %86 = arith.addf %82, %85 : vector<128x128xf32>
    %87 = vector.extract_strided_slice %56 {offsets = [0, 512], sizes = [128, 128], strides = [1, 1]} : vector<128x1024xf32> to vector<128x128xf32>
    %88 = arith.subf %87, %71 : vector<128x128xf32>
    %89 = math.exp %88 : vector<128x128xf32>
    %90 = arith.addf %86, %89 : vector<128x128xf32>
    %91 = vector.extract_strided_slice %56 {offsets = [0, 640], sizes = [128, 128], strides = [1, 1]} : vector<128x1024xf32> to vector<128x128xf32>
    %92 = arith.subf %91, %71 : vector<128x128xf32>
    %93 = math.exp %92 : vector<128x128xf32>
    %94 = arith.addf %90, %93 : vector<128x128xf32>
    %95 = vector.extract_strided_slice %56 {offsets = [0, 768], sizes = [128, 128], strides = [1, 1]} : vector<128x1024xf32> to vector<128x128xf32>
    %96 = arith.subf %95, %71 : vector<128x128xf32>
    %97 = math.exp %96 : vector<128x128xf32>
    %98 = arith.addf %94, %97 : vector<128x128xf32>
    %99 = vector.extract_strided_slice %56 {offsets = [0, 896], sizes = [128, 128], strides = [1, 1]} : vector<128x1024xf32> to vector<128x128xf32>
    %100 = arith.subf %99, %71 : vector<128x128xf32>
    %101 = math.exp %100 : vector<128x128xf32>
    %102 = arith.addf %98, %101 : vector<128x128xf32>
    %103 = math.log %102 : vector<128x128xf32>
    %104 = arith.addf %71, %103 : vector<128x128xf32>
    %105 = tpu.concatenate %104, %104, %104, %104, %104, %104, %104, %104 in 1 : vector<128x128xf32>, vector<128x128xf32>, vector<128x128xf32>, vector<128x128xf32>, vector<128x128xf32>, vector<128x128xf32>, vector<128x128xf32>, vector<128x128xf32> -> vector<128x1024xf32>
    %106 = arith.subf %56, %105 : vector<128x1024xf32>
    %c0_39 = arith.constant 0 : index
    %c0_40 = arith.constant 0 : index
    %107 = vector.load %arg15[%c0_39, %c0_40] : memref<128x1024xf32, #tpu.memory_space<vmem>>, vector<128x1024xf32>
    tpu.vector_store %arg15[%c0_39, %c0_40], %106 {strides = array<i32>} : memref<128x1024xf32, #tpu.memory_space<vmem>>, vector<128x1024xf32>,
    return
  }
  func.func @transform_0(%arg0: i32) -> (i32, i32) {
    %c0_i32 = arith.constant 0 : i32
    %c0_i32_0 = arith.constant 0 : i32
    return %arg0, %c0_i32 : i32, i32
  }
  func.func @transform_1(%arg0: i32) -> (i32, i32) {
    %c0_i32 = arith.constant 0 : i32
    %c0_i32_0 = arith.constant 0 : i32
    return %arg0, %c0_i32 : i32, i32
  }
  func.func @transform_2(%arg0: i32) -> (i32, i32) {
    %c0_i32 = arith.constant 0 : i32
    %c0_i32_0 = arith.constant 0 : i32
    %c0_i32_1 = arith.constant 0 : i32
    return %c0_i32, %c0_i32_0 : i32, i32
  }
  func.func @transform_3(%arg0: i32) -> (i32, i32) {
    %c0_i32 = arith.constant 0 : i32
    %c0_i32_0 = arith.constant 0 : i32
    %c0_i32_1 = arith.constant 0 : i32
    return %c0_i32, %c0_i32_0 : i32, i32
  }
  func.func @transform_4(%arg0: i32) -> (i32, i32) {
    %c0_i32 = arith.constant 0 : i32
    %c0_i32_0 = arith.constant 0 : i32
    %c0_i32_1 = arith.constant 0 : i32
    return %c0_i32, %c0_i32_0 : i32, i32
  }
  func.func @transform_5(%arg0: i32) -> (i32, i32) {
    %c0_i32 = arith.constant 0 : i32
    %c0_i32_0 = arith.constant 0 : i32
    %c0_i32_1 = arith.constant 0 : i32
    return %c0_i32, %c0_i32_0 : i32, i32
  }
  func.func @transform_6(%arg0: i32) -> (i32, i32) {
    %c0_i32 = arith.constant 0 : i32
    %c0_i32_0 = arith.constant 0 : i32
    %c0_i32_1 = arith.constant 0 : i32
    return %c0_i32, %c0_i32_0 : i32, i32
  }
  func.func @transform_7(%arg0: i32) -> (i32, i32) {
    %c0_i32 = arith.constant 0 : i32
    %c0_i32_0 = arith.constant 0 : i32
    %c0_i32_1 = arith.constant 0 : i32
    return %c0_i32, %c0_i32_0 : i32, i32
  }
  func.func @transform_8(%arg0: i32) -> (i32, i32) {
    %c0_i32 = arith.constant 0 : i32
    %c0_i32_0 = arith.constant 0 : i32
    %c0_i32_1 = arith.constant 0 : i32
    return %c0_i32, %c0_i32_0 : i32, i32
  }
  func.func @transform_9(%arg0: i32) -> (i32, i32) {
    %c0_i32 = arith.constant 0 : i32
    %c0_i32_0 = arith.constant 0 : i32
    %c0_i32_1 = arith.constant 0 : i32
    return %c0_i32, %c0_i32_0 : i32, i32
  }
  func.func @transform_10(%arg0: i32) -> (i32, i32) {
    %c0_i32 = arith.constant 0 : i32
    %c0_i32_0 = arith.constant 0 : i32
    %c0_i32_1 = arith.constant 0 : i32
    return %c0_i32, %c0_i32_0 : i32, i32
  }
  func.func @transform_11(%arg0: i32) -> (i32, i32) {
    %c0_i32 = arith.constant 0 : i32
    %c0_i32_0 = arith.constant 0 : i32
    %c0_i32_1 = arith.constant 0 : i32
    return %c0_i32, %c0_i32_0 : i32, i32
  }
  func.func @transform_12(%arg0: i32) -> (i32, i32) {
    %c0_i32 = arith.constant 0 : i32
    %c0_i32_0 = arith.constant 0 : i32
    %c0_i32_1 = arith.constant 0 : i32
    return %c0_i32, %c0_i32_0 : i32, i32
  }
  func.func @transform_13(%arg0: i32) -> (i32, i32) {
    %c0_i32 = arith.constant 0 : i32
    %c0_i32_0 = arith.constant 0 : i32
    %c0_i32_1 = arith.constant 0 : i32
    return %c0_i32, %c0_i32_0 : i32, i32
  }
  func.func @transform_14(%arg0: i32) -> (i32, i32) {
    %c0_i32 = arith.constant 0 : i32
    %c0_i32_0 = arith.constant 0 : i32
    return %arg0, %c0_i32 : i32, i32
  }
  func.func @transform_15(%arg0: i32) -> (i32, i32) {
    %c0_i32 = arith.constant 0 : i32
    %c0_i32_0 = arith.constant 0 : i32
    return %arg0, %c0_i32 : i32, i32
  }
}

</mosaic_0001>

<bundles_post_ra>
// kernel: tpu_custom_call.1
= control target key start
LH: loop header
LB: loop body
LE: loop exit
PB: predicated region body
PF: predicated region fallthrough
CT: control target
= control target key end

     0   :  { %s9988_s0 = inlined_call_operand.vmem [shape: f32[256,1024], index: 0, kind: input, shape index: {}]   ;;  %s9989_s1 = inlined_call_operand.vmem [shape: f32[256,32], index: 1, kind: input, shape index: {}]   ;;  %s9990_s2 = inlined_call_operand.vmem [shape: bf16[1024,192], index: 2, kind: input, shape index: {}]   ;;  %s9991_s3 = inlined_call_operand.vmem [shape: f32[1,192], index: 3, kind: input, shape index: {}]   ;;  %s9992_s4 = inlined_call_operand.vmem [shape: bf16[192,192], index: 4, kind: input, shape index: {}]   ;;  %s9993_s5 = inlined_call_operand.vmem [shape: f32[1,192], index: 5, kind: input, shape index: {}]   ;;  %s9994_s6 = inlined_call_operand.vmem [shape: bf16[192,64], index: 6, kind: input, shape index: {}]   ;;  %s9995_s7 = inlined_call_operand.vmem [shape: f32[1,64], index: 7, kind: input, shape index: {}]   ;;  %s9996_s8 = inlined_call_operand.vmem [shape: bf16[32,16], index: 8, kind: input, shape index: {}]   ;;  %s9997_s9 = inlined_call_operand.vmem [shape: f32[1,16], index: 9, kind: input, shape index: {}]   ;;  %s9998_s10 = inlined_call_operand.vmem [shape: bf16[16,256], index: 10, kind: input, shape index: {}]   ;;  %s9999_s11 = inlined_call_operand.vmem [shape: f32[1,256], index: 11, kind: input, shape index: {}]   ;;  %s10000_s12 = inlined_call_operand.hbm [shape: bf16[256,1024], index: 12, kind: input, shape index: {}]   ;;  %s10001_s13 = inlined_call_operand.vmem [shape: f32[1,1024], index: 13, kind: input, shape index: {}]   ;;  %s10002_s14 = inlined_call_operand.hbm [shape: f32[256,1024], index: 14, kind: output, shape index: {0}]   ;;  %s10003_s15 = inlined_call_operand.vmem [shape: f32[256,64], index: 15, kind: output, shape index: {1}]  }
   0x1   :  { %10154 = sst [smem:[#allocation112_spill]] %s9988_s0 }
   0x2   :  { %21 = vsyncpa [#allocation3], 0 }
   0x3   :  { %22 = vsyncpa [#allocation4], 0 }
   0x4   :  { %24 = vsyncpa [#allocation4 + $0x1], 0  ;;  %s7129_s18 = smov 0   ;;  %s7131_s19 = smov 0  }
   0x5   :  { %s7133_s20 = smov 0   ;;  %s7135_s21 = smov 0  }
   0x6 LB: > { %10155 = sst [smem:[#allocation8_spill]] %s7027_s18  ;;  %s7150_s22 = sadd.s32 4294967295, %s7039_s21   ;;  %s7039_s21 = sphi %s7135_s21, %s10473_s21   ;;  %s7035_s20 = sphi %s7133_s20, %s10475_s20   ;;  %s7031_s19 = sphi %s7131_s19, %s10477_s19   ;;  %s7027_s18 = sphi %s7129_s18, %s10476_s18  }
   0x7   : > { %10156 = sst [smem:[#allocation9_spill]] %s7035_s20  ;;  %s5621_s23 = sadd.s32 4294967294, %s7039_s21  }
   0x8   : > { %s7154_s24 = sadd.s32 1, %s7039_s21   ;;  %s341_s25 = sadd.s32 1, %s7035_s20 }
   0x9   : > { %10157 = sst [smem:[#allocation10_spill]] %s7154_s24  ;;  %s338_s26 = ssub.s32 %s7039_s21, %s7154_s24 }
   0xa   : > { %p351_p0 = scmp.ne.s32.totalorder %s7035_s20, %s7031_s19  ;;  %p339_p1 = scmp.eq.s32.totalorder %s338_s26, 0 }
   0xb   : > { %p352_p2 = scmp.eq.s32.totalorder %s7150_s22, 1  ;;  %p357_p3 = scmp.ne.s32.totalorder %s7031_s19, %s7027_s18 }
   0xc   : > { %p358_p4 = scmp.eq.s32.totalorder %s5621_s23, 1  ;;  %p5622_p7 = scmp.ge.s32.totalorder %s7039_s21, 1 }
   0xd   : > { %s7165_s27 = scalar_select %p339_p1, %s7035_s20, %s341_s25  }
   0xe   : > { %p7167_p5 = por %p352_p2, %p351_p0  ;;  %p7171_p6 = por %p358_p4, %p357_p3 }
   0xf   : > { %10158 = sst [smem:[#allocation11_spill]] %s7165_s27  ;;  %p391_p8 = scmp.lt.s32.totalorder %s7039_s21, 3 }
  0x10   : > { %s10159_s28 = scalar_select %p7167_p5, 1, 0 }
  0x11   : > { %s10160_s29 = scalar_select %p7171_p6, 1, 0 }
  0x12   : > { %p10009_p9 = scmp.eq.s32.totalorder %s7150_s22, 0  ;;  %p7178_p10 = pnand %p5622_p7, %p391_p8 }
  0x13   : > { %10161 = sst [smem:[#allocation12_spill]] %s10160_s29  ;;  %s7041_s16 = smov [#allocation2]  }
  0x14   : > { %s10162_s30 = scalar_select %p7178_p10, 1, 0 }
  0x15   : > { %s433_s17 = sshll.u32 %s7041_s16, 4  ;;  %p6202_p11 = pneg %p7178_p10  ;;  %s434_s17 = int_to_ptr.vmem [resolvable:$true] %s433_s17 }
  0x16   : > { %s6945_s27 = scalar_lea.hbm %s10000_s12, 16384 }
  0x17   : > { %p7186_p12 = pnand %p10009_p9, %p6202_p11  ;;  %p6946_p13 = scmp.ne.s32.totalorder %s10000_s12, %s6945_s27 }
  0x18   : > { %p6952_p3 = scmp.lt.u32.totalorder %s6945_s27, %s10000_s12 }
  0x19   : > { %p6947_p0 = pneg %p7186_p12 }
  0x1b   : > { %p6948_p1 = pnand %p6947_p0, %p6946_p13 }
  0x1d   : > { %p6949_p2 = pneg %p6948_p1 }
  0x1f   : > { %p6954_p4 = pnand %p6952_p3, %p6949_p2 }
  0x21   : > { %6957 = shalt.err (!%p6954_p4)
}
  0x22   : > { %s6958_s18 = scalar_lea.vmem %s434_s17, 16384  ;;  %p6966_p9 = scmp.lt.s32.totalorder %s434_s17, %s434_s17 }
  0x23   : > { %p6959_p7 = scmp.ne.s32.totalorder %s434_s17, %s6958_s18  ;;  %p6967_p6 = scmp.lt.s32.totalorder %s6958_s18, %s6958_s18 }
  0x25   : > { %p6961_p8 = pnand %p6959_p7, %p6947_p0  ;;  %p6968_p5 = por %p6967_p6, %p6966_p9 }
  0x27   : > { %p6962_p11 = pneg %p6961_p8 }
  0x29   : > { %p6969_p10 = pnand %p6968_p5, %p6962_p11 }
  0x2b   : > { %6972 = shalt.err (!%p6969_p10)
}
  0x2c   : > { %s7042_s20 = smov 512   ;;  %s7043_s24 = smov 32  }
  0x2d   : > { %6205 = dma.hbm_to_vmem [thread:$0]  (!%p7186_p12), %s10000_s12, 16384, %s434_s17, [#allocation3], %s7042_s20, %s7042_s20, %s7043_s24  }
  0x2e   : > { %p10164_p13 = scmp.ne.s32.totalorder %s10162_s30, 0 }
  0x30   : > { %471 = sbr.rel (%p10164_p13) target bundleno = 2123 (0x84b), region = 76 }
  0x37   : > { %p10165_p1 = scmp.eq.s32.totalorder %s7150_s22, 0 }
  0x39   : > { %7018 = dma.done.wait (%p10165_p1), [#allocation3], 16384   ;;  %p10166_p0 = pmov %p10165_p1 }
  0x3a   : > { %v6252_v0 = vld [vmem:[%s9990_s2 + $0x4] ss:$8 sps:$4 sm:$0xff]   ;;  %v6254_v1 = vld [vmem:[%s9990_s2] ss:$8 sps:$4 sm:$0xff]   ;;  %v6255_v2 = vld [vmem:[%s9990_s2 + $0x14] ss:$8 sps:$4 sm:$0xff]  }
  0x3b   : > { %7020 = vsyncadd (%p10166_p0), [#allocation3], 4294950912  ;;  %1523 = vmatprep.subr.bf16.mxu0 %v6252_v0  ;;  %v6257_v3 = vld [vmem:[%s9990_s2 + $0x10] ss:$8 sps:$4 sm:$0xff]   ;;  %v6258_v4 = vld [vmem:[%s9990_s2 + $0x24] ss:$8 sps:$4 sm:$0xff]  }
  0x3c   : > { %1524 = vmatpush1.bf16.msra.mxu0 %v6254_v1  ;;  %s5628_s26 = sshll.u32 %s7150_s22, 4  ;;  %v6260_v5 = vld [vmem:[%s9990_s2 + $0x20] ss:$8 sps:$4 sm:$0xff]   ;;  %v6261_v6 = vld [vmem:[%s9990_s2 + $0x34] ss:$8 sps:$4 sm:$0xff]   ;;  %s10167_s0 = sld [smem:[#allocation112_spill]] }
  0x3d   : > { %1525 = vmatprep.subr.bf16.mxu0 %v6255_v2  ;;  %p531_p5 = scmp.lt.s32.totalorder %s5628_s26, 31  ;;  %v6263_v7 = vld [vmem:[%s9990_s2 + $0x30] ss:$8 sps:$4 sm:$0xff]   ;;  %v6264_v8 = vld [vmem:[%s9990_s2 + $0x44] ss:$8 sps:$4 sm:$0xff]   ;;  %vm2179_vm0 = vcmask 523264  }
  0x3e   : > { %v6266_v9 = vld [vmem:[%s9990_s2 + $0x40] ss:$8 sps:$4 sm:$0xff]   ;;  %v6267_v10 = vld [vmem:[%s9990_s2 + $0x54] ss:$8 sps:$4 sm:$0xff]   ;;  %v6269_v11 = vld [vmem:[%s9990_s2 + $0x50] ss:$8 sps:$4 sm:$0xff]  }
  0x3f   : > { %s10479_s26 = smov (!%p531_p5, %s5628_s26), 31  ;;  %v6270_v12 = vld [vmem:[%s9990_s2 + $0x64] ss:$8 sps:$4 sm:$0xff]   ;;  %v6272_v16 = vld [vmem:[%s9990_s2 + $0x60] ss:$8 sps:$4 sm:$0xff]   ;;  %vm2796_vm1 = vcmask 261120  }
  0x40   : > { %1526 = vmatpush1.bf16.msra.mxu0 %v6257_v3  ;;  %s6003_s18 = sshll.u32 %s10479_s26, 6  ;;  %v6273_v17 = vld [vmem:[%s9990_s2 + $0x74] ss:$8 sps:$4 sm:$0xff]   ;;  %v6275_v18 = vld [vmem:[%s9990_s2 + $0x70] ss:$8 sps:$4 sm:$0xff]   ;;  %s5632_s20 = sshll.u32 %s10479_s26, 3 }
  0x41   : > { %1527 = vmatprep.subr.bf16.mxu0 %v6258_v4  ;;  %v6276_v19 = vld [vmem:[%s9990_s2 + $0x84] ss:$8 sps:$4 sm:$0xff]   ;;  %v6278_v20 = vld [vmem:[%s9990_s2 + $0x80] ss:$8 sps:$4 sm:$0xff]   ;;  %v6279_v21 = vld [vmem:[%s9990_s2 + $0x94] ss:$8 sps:$4 sm:$0xff]   ;;  %s8114_s24 = scalar_lea.vmem %s9989_s1, %s5632_s20 }
  0x42   : > { %s7252_s16 = scalar_lea.vmem %s10167_s0, %s6003_s18  ;;  %v6281_v22 = vld [vmem:[%s9990_s2 + $0x90] ss:$8 sps:$4 sm:$0xff]   ;;  %v6282_v23 = vld [vmem:[%s9990_s2 + $0xa4] ss:$8 sps:$4 sm:$0xff]   ;;  %v6284_v24 = vld [vmem:[%s9990_s2 + $0xa0] ss:$8 sps:$4 sm:$0xff]   ;;  %s7976_s18 = scalar_lea.vmem %s10003_s15, %s5632_s20 }
  0x43   : > { %v552_v13 = vld [vmem:[%s7252_s16 + $0x8] sm:$0xff]  ;;  %v6285_v25 = vld [vmem:[%s9990_s2 + $0xb4] ss:$8 sps:$4 sm:$0xff]   ;;  %v6287_v26 = vld [vmem:[%s9990_s2 + $0xb0] ss:$8 sps:$4 sm:$0xff]   ;;  %s7045_s0 = smov 96  }
  0x44   : > { %1528 = vmatpush1.bf16.msra.mxu0 %v6260_v5  ;;  %v560_v14 = vld [vmem:[%s7252_s16 + $0x48] sm:$0xff]  ;;  %v6291_v29 = vld [vmem:[%s9990_s2 + $0xd4] ss:$8 sps:$4 sm:$0xff]   ;;  %v6293_v30 = vld [vmem:[%s9990_s2 + $0xd0] ss:$8 sps:$4 sm:$0xff]   ;;  %vm2966_vm2 = vcmask 130048  }
  0x45   : > { %1529 = vmatprep.subr.bf16.mxu0 %v6261_v6  ;;  %v680_v15 = vpack.c.bf16 %v560_v14, %v552_v13  ;;  %v6288_v27 = vld [vmem:[%s9990_s2 + $0xc4] ss:$8 sps:$4 sm:$0xff]   ;;  %v6290_v28 = vld [vmem:[%s9990_s2 + $0xc0] ss:$8 sps:$4 sm:$0xff]   ;;  %v6297_v33 = vld [vmem:[%s9990_s2 + $0xf4] ss:$8 sps:$4 sm:$0xff]  }
  0x46   : > { %v6294_v31 = vld [vmem:[%s9990_s2 + $0xe4] ss:$8 sps:$4 sm:$0xff]   ;;  %v6296_v32 = vld [vmem:[%s9990_s2 + $0xe0] ss:$8 sps:$4 sm:$0xff]   ;;  %v6299_v34 = vld [vmem:[%s9990_s2 + $0xf0] ss:$8 sps:$4 sm:$0xff]  }
  0x47   : > { %1555 = vmatprep.mubr.bf16.mxu0 %v680_v15  ;;  %v551_v35 = vld [vmem:[%s7252_s16] sm:$0xff]  ;;  %v568_v38 = vld [vmem:[%s7252_s16 + $0x88] sm:$0xff]  ;;  %v6305_v43 = vld [vmem:[%s9990_s2 + $0x114] ss:$8 sps:$4 sm:$0xff]   ;;  %s520_s17 = sand.u32 1, %s7031_s19   ;;  %p10469_p9 = scmp.ne.s32.totalorder %s10159_s28, 0 }
  0x48   : > { %1530 = vmatpush1.bf16.msra.mxu0 %v6263_v7  ;;  %v559_v36 = vld [vmem:[%s7252_s16 + $0x40] sm:$0xff]  ;;  %v576_v39 = vld [vmem:[%s7252_s16 + $0xc8] sm:$0xff]  ;;  %v6303_v44 = vld [vmem:[%s9990_s2 + $0x110] ss:$8 sps:$4 sm:$0xff]   ;;  %s9146_s30 = sshll.u32 %s520_s17, 10  ;;  %s9947_s27 = scalar_lea.sflag [#allocation4], %s520_s17 }
  0x49   : > { %1531 = vmatprep.subr.bf16.mxu0 %v6264_v8  ;;  %v6302_v37 = vld [vmem:[%s9990_s2 + $0x104] ss:$8 sps:$4 sm:$0xff]   ;;  %v679_v40 = vpack.c.bf16 %v559_v36, %v551_v35  ;;  %v6300_v41 = vld [vmem:[%s9990_s2 + $0x100] ss:$8 sps:$4 sm:$0xff]   ;;  %v688_v42 = vpack.c.bf16 %v576_v39, %v568_v38  ;;  %v6311_v53 = vld [vmem:[%s9990_s2 + $0x134] ss:$8 sps:$4 sm:$0xff]  }
  0x4a   : > { %v567_v45 = vld [vmem:[%s7252_s16 + $0x80] sm:$0xff]  ;;  %v584_v48 = vld [vmem:[%s7252_s16 + $0x108] sm:$0xff]  ;;  %v6309_v54 = vld [vmem:[%s9990_s2 + $0x130] ss:$8 sps:$4 sm:$0xff]  }
  0x4b   : > { %v575_v46 = vld [vmem:[%s7252_s16 + $0xc0] sm:$0xff]  ;;  %v592_v49 = vld [vmem:[%s7252_s16 + $0x148] sm:$0xff]  ;;  %v6317_v63 = vld [vmem:[%s9990_s2 + $0x154] ss:$8 sps:$4 sm:$0xff]  }
  0x4c   : > { %1532 = vmatpush1.bf16.msra.mxu0 %v6266_v9  ;;  %v6308_v47 = vld [vmem:[%s9990_s2 + $0x124] ss:$8 sps:$4 sm:$0xff]   ;;  %v687_v50 = vpack.c.bf16 %v575_v46, %v567_v45  ;;  %v6306_v51 = vld [vmem:[%s9990_s2 + $0x120] ss:$8 sps:$4 sm:$0xff]   ;;  %v696_v52 = vpack.c.bf16 %v592_v49, %v584_v48  ;;  %v6315_v0 = vld [vmem:[%s9990_s2 + $0x150] ss:$8 sps:$4 sm:$0xff]  }
  0x4d   : > { %1533 = vmatprep.subr.bf16.mxu0 %v6267_v10  ;;  %v583_v55 = vld [vmem:[%s7252_s16 + $0x100] sm:$0xff]  ;;  %v600_v58 = vld [vmem:[%s7252_s16 + $0x188] sm:$0xff]  ;;  %v6323_v9 = vld [vmem:[%s9990_s2 + $0x174] ss:$8 sps:$4 sm:$0xff]  }
  0x4e   : > { %v591_v56 = vld [vmem:[%s7252_s16 + $0x140] sm:$0xff]  ;;  %v608_v59 = vld [vmem:[%s7252_s16 + $0x1c8] sm:$0xff]  ;;  %v6321_v10 = vld [vmem:[%s9990_s2 + $0x170] ss:$8 sps:$4 sm:$0xff]  }
  0x4f   : > { %v6314_v57 = vld [vmem:[%s9990_s2 + $0x144] ss:$8 sps:$4 sm:$0xff]   ;;  %v695_v60 = vpack.c.bf16 %v591_v56, %v583_v55  ;;  %v6312_v61 = vld [vmem:[%s9990_s2 + $0x140] ss:$8 sps:$4 sm:$0xff]   ;;  %v704_v62 = vpack.c.bf16 %v608_v59, %v600_v58  ;;  %v6341_v39 = vld [vmem:[%s9990_s2 + $0x1d4] ss:$8 sps:$4 sm:$0xff]  }
  0x50   : > { %1534 = vmatpush1.bf16.msra.mxu0 %v6269_v11  ;;  %v599_v1 = vld [vmem:[%s7252_s16 + $0x180] sm:$0xff]  ;;  %v616_v4 = vld [vmem:[%s7252_s16 + $0x208] sm:$0xff]  ;;  %v562_v45 = vld [vmem:[%s7252_s16 + $0x58] sm:$0xff] }
  0x51   : > { %1535 = vmatprep.subr.bf16.mxu0 %v6270_v12  ;;  %v607_v2 = vld [vmem:[%s7252_s16 + $0x1c0] sm:$0xff]  ;;  %v624_v5 = vld [vmem:[%s7252_s16 + $0x248] sm:$0xff]  ;;  %v6347_v49 = vld [vmem:[%s9990_s2 + $0x1f4] ss:$8 sps:$4 sm:$0xff]  }
  0x52   : > { %v6320_v3 = vld [vmem:[%s9990_s2 + $0x164] ss:$8 sps:$4 sm:$0xff]   ;;  %v703_v6 = vpack.c.bf16 %v607_v2, %v599_v1  ;;  %v6318_v7 = vld [vmem:[%s9990_s2 + $0x160] ss:$8 sps:$4 sm:$0xff]   ;;  %v712_v8 = vpack.c.bf16 %v624_v5, %v616_v4  ;;  %v578_v55 = vld [vmem:[%s7252_s16 + $0xd8] sm:$0xff] }
  0x53   : > { %v615_v11 = vld [vmem:[%s7252_s16 + $0x200] sm:$0xff]  ;;  %v632_v14 = vld [vmem:[%s7252_s16 + $0x288] sm:$0xff]  ;;  %v6353_v58 = vld [vmem:[%s9990_s2 + $0x214] ss:$8 sps:$4 sm:$0xff]  }
  0x54   : > { %1536 = vmatpush1.bf16.msra.mxu0 %v6272_v16  ;;  %v623_v12 = vld [vmem:[%s7252_s16 + $0x240] sm:$0xff]  ;;  %v640_v15 = vld [vmem:[%s7252_s16 + $0x2c8] sm:$0xff]  ;;  %v594_v1 = vld [vmem:[%s7252_s16 + $0x158] sm:$0xff] }
  0x55   : > { %1537 = vmatprep.subr.bf16.mxu0 %v6273_v17  ;;  %v6326_v13 = vld [vmem:[%s9990_s2 + $0x184] ss:$8 sps:$4 sm:$0xff]   ;;  %v711_v16 = vpack.c.bf16 %v623_v12, %v615_v11  ;;  %v6324_v17 = vld [vmem:[%s9990_s2 + $0x180] ss:$8 sps:$4 sm:$0xff]   ;;  %v6359_v4 = vld [vmem:[%s9990_s2 + $0x234] ss:$8 sps:$4 sm:$0xff]  }
  0x56   : > { %v672_v35 = vld [vmem:[%s7252_s16 + $0x3c8] sm:$0xff]  ;;  %v610_v11 = vld [vmem:[%s7252_s16 + $0x1d8] sm:$0xff] }
  0x57   : > { %v6354_v2 = vld [vmem:[%s9990_s2 + $0x220] ss:$8 sps:$4 sm:$0xff]  }
  0x58   : > { %1538 = vmatpush1.bf16.msra.mxu0 %v6275_v18  ;;  %v720_v18 = vpack.c.bf16 %v640_v15, %v632_v14  ;;  %v6365_v15 = vld [vmem:[%s9990_s2 + $0x254] ss:$8 sps:$4 sm:$0xff]  }
  0x59   : > { %1539 = vmatprep.subr.bf16.mxu0 %v6276_v19  ;;  %v6329_v19 = vld [vmem:[%s9990_s2 + $0x194] ss:$8 sps:$4 sm:$0xff]  }
  0x5c   : > { %1540 = vmatpush1.bf16.msra.mxu0 %v6278_v20  ;;  %v6327_v20 = vld [vmem:[%s9990_s2 + $0x190] ss:$8 sps:$4 sm:$0xff]  }
  0x5d   : > { %1541 = vmatprep.subr.bf16.mxu0 %v6279_v21  ;;  %v631_v21 = vld [vmem:[%s7252_s16 + $0x280] sm:$0xff] }
  0x60   : > { %1542 = vmatpush1.bf16.msra.mxu0 %v6281_v22  ;;  %v639_v22 = vld [vmem:[%s7252_s16 + $0x2c0] sm:$0xff] }
  0x61   : > { %1543 = vmatprep.subr.bf16.mxu0 %v6282_v23  ;;  %v6332_v23 = vld [vmem:[%s9990_s2 + $0x1a4] ss:$8 sps:$4 sm:$0xff]  }
  0x64   : > { %1544 = vmatpush1.bf16.msra.mxu0 %v6284_v24  ;;  %v648_v24 = vld [vmem:[%s7252_s16 + $0x308] sm:$0xff] }
  0x65   : > { %1545 = vmatprep.subr.bf16.mxu0 %v6285_v25  ;;  %v656_v25 = vld [vmem:[%s7252_s16 + $0x348] sm:$0xff] }
  0x68   : > { %1546 = vmatpush1.bf16.msra.mxu0 %v6287_v26  ;;  %v719_v26 = vpack.c.bf16 %v639_v22, %v631_v21  ;;  %v626_v21 = vld [vmem:[%s7252_s16 + $0x258] sm:$0xff] }
  0x69   : > { %1547 = vmatprep.subr.bf16.mxu0 %v6288_v27  ;;  %v6330_v27 = vld [vmem:[%s9990_s2 + $0x1a0] ss:$8 sps:$4 sm:$0xff]  }
  0x6c   : > { %1548 = vmatpush1.bf16.msra.mxu0 %v6290_v28  ;;  %v728_v28 = vpack.c.bf16 %v656_v25, %v648_v24  ;;  %v6371_v25 = vld [vmem:[%s9990_s2 + $0x274] ss:$8 sps:$4 sm:$0xff]  }
  0x6d   : > { %1549 = vmatprep.subr.bf16.mxu0 %v6291_v29  ;;  %v6335_v29 = vld [vmem:[%s9990_s2 + $0x1b4] ss:$8 sps:$4 sm:$0xff]  }
  0x70   : > { %1550 = vmatpush1.bf16.msra.mxu0 %v6293_v30  ;;  %v6333_v30 = vld [vmem:[%s9990_s2 + $0x1b0] ss:$8 sps:$4 sm:$0xff]  }
  0x71   : > { %1551 = vmatprep.subr.bf16.mxu0 %v6294_v31  ;;  %v647_v31 = vld [vmem:[%s7252_s16 + $0x300] sm:$0xff] }
  0x74   : > { %1552 = vmatpush1.bf16.msra.mxu0 %v6296_v32  ;;  %v655_v32 = vld [vmem:[%s7252_s16 + $0x340] sm:$0xff] }
  0x75   : > { %1553 = vmatprep.subr.bf16.mxu0 %v6297_v33  ;;  %v6338_v33 = vld [vmem:[%s9990_s2 + $0x1c4] ss:$8 sps:$4 sm:$0xff]   ;;  %v727_v36 = vpack.c.bf16 %v655_v32, %v647_v31  ;;  %v642_v31 = vld [vmem:[%s7252_s16 + $0x2d8] sm:$0xff] }
  0x78   : > { %1554 = vmatpush1.bf16.msra.mxu0 %v6299_v34  ;;  %v664_v34 = vld [vmem:[%s7252_s16 + $0x388] sm:$0xff] }
  0x79   : > { %1636 = vmatprep.subr.bf16.mxu0 %v6302_v37  ;;  %v6336_v37 = vld [vmem:[%s9990_s2 + $0x1c0] ss:$8 sps:$4 sm:$0xff]   ;;  %v736_v38 = vpack.c.bf16 %v672_v35, %v664_v34  ;;  %v6377_v35 = vld [vmem:[%s9990_s2 + $0x294] ss:$8 sps:$4 sm:$0xff]  }
  0x7b   : > { %1556 = vmatmul.mubr.bf16.vlgmr.msra.gmra.mrb[0].mxu0 %v679_v40  ;;  %v6339_v40 = vld [vmem:[%s9990_s2 + $0x1d0] ss:$8 sps:$4 sm:$0xff]  }
  0x7c   : > { %1637 = vmatpush1.bf16.msra.mxu0 %v6300_v41  ;;  %1565 = vmatprep.mubr.bf16.mxu0 %v688_v42  ;;  %v663_v41 = vld [vmem:[%s7252_s16 + $0x380] sm:$0xff] }
  0x7d   : > { %1638 = vmatprep.subr.bf16.mxu0 %v6305_v43  ;;  %v671_v42 = vld [vmem:[%s7252_s16 + $0x3c0] sm:$0xff] }
  0x7e   : > { %v6344_v43 = vld [vmem:[%s9990_s2 + $0x1e4] ss:$8 sps:$4 sm:$0xff]   ;;  %v735_v46 = vpack.c.bf16 %v671_v42, %v663_v41  ;;  %v658_v41 = vld [vmem:[%s7252_s16 + $0x358] sm:$0xff] }
  0x80   : > { %1639 = vmatpush1.bf16.msra.mxu0 %v6303_v44  ;;  %v554_v44 = vld [vmem:[%s7252_s16 + $0x18] sm:$0xff] }
  0x81   : > { %1640 = vmatprep.subr.bf16.mxu0 %v6308_v47  ;;  %v6342_v47 = vld [vmem:[%s9990_s2 + $0x1e0] ss:$8 sps:$4 sm:$0xff]   ;;  %v682_v48 = vpack.c.bf16 %v562_v45, %v554_v44  ;;  %v6383_v45 = vld [vmem:[%s9990_s2 + $0x2b4] ss:$8 sps:$4 sm:$0xff]  }
  0x83   : > { %1566 = vmatmul.mubr.bf16.gmra.mrb[4].mxu0 %v687_v50  ;;  %v6345_v50 = vld [vmem:[%s9990_s2 + $0x1f0] ss:$8 sps:$4 sm:$0xff]  }
  0x84   : > { %1641 = vmatpush1.bf16.msra.mxu0 %v6306_v51  ;;  %1575 = vmatprep.mubr.bf16.mxu0 %v696_v52  ;;  %v553_v51 = vld [vmem:[%s7252_s16 + $0x10] sm:$0xff] }
  0x85   : > { %1642 = vmatprep.subr.bf16.mxu0 %v6311_v53  ;;  %v561_v52 = vld [vmem:[%s7252_s16 + $0x50] sm:$0xff]  ;;  %v6350_v53 = vld [vmem:[%s9990_s2 + $0x204] ss:$8 sps:$4 sm:$0xff]  }
  0x86   : > { %v681_v56 = vpack.c.bf16 %v561_v52, %v553_v51  ;;  %v674_v51 = vld [vmem:[%s7252_s16 + $0x3d8] sm:$0xff] }
  0x88   : > { %1643 = vmatpush1.bf16.msra.mxu0 %v6309_v54  ;;  %v570_v54 = vld [vmem:[%s7252_s16 + $0x98] sm:$0xff] }
  0x89   : > { %1644 = vmatprep.subr.bf16.mxu0 %v6314_v57  ;;  %v6348_v57 = vld [vmem:[%s9990_s2 + $0x200] ss:$8 sps:$4 sm:$0xff]   ;;  %v690_v59 = vpack.c.bf16 %v578_v55, %v570_v54  ;;  %v6389_v55 = vld [vmem:[%s9990_s2 + $0x2d4] ss:$8 sps:$4 sm:$0xff]  }
  0x8b   : > { %1576 = vmatmul.mubr.bf16.gmra.mrb[8].mxu0 %v695_v60  ;;  %v6351_v60 = vld [vmem:[%s9990_s2 + $0x210] ss:$8 sps:$4 sm:$0xff]  }
  0x8c   : > { %1645 = vmatpush1.bf16.msra.mxu0 %v6312_v61  ;;  %1585 = vmatprep.mubr.bf16.mxu0 %v704_v62  ;;  %v569_v61 = vld [vmem:[%s7252_s16 + $0x90] sm:$0xff] }
  0x8d   : > { %1646 = vmatprep.subr.bf16.mxu0 %v6317_v63  ;;  %v577_v62 = vld [vmem:[%s7252_s16 + $0xd0] sm:$0xff]  ;;  %v6356_v63 = vld [vmem:[%s9990_s2 + $0x224] ss:$8 sps:$4 sm:$0xff]  }
  0x90   : > { %1647 = vmatpush1.bf16.msra.mxu0 %v6315_v0  ;;  %v586_v0 = vld [vmem:[%s7252_s16 + $0x118] sm:$0xff] }
  0x91   : > { %1648 = vmatprep.subr.bf16.mxu0 %v6320_v3  ;;  %v689_v3 = vpack.c.bf16 %v577_v62, %v569_v61  ;;  %v698_v5 = vpack.c.bf16 %v594_v1, %v586_v0  ;;  %v564_v61 = vld [vmem:[%s7252_s16 + $0x68] sm:$0xff]  ;;  %v6395_v1 = vld [vmem:[%s9990_s2 + $0x2f4] ss:$8 sps:$4 sm:$0xff]  }
  0x93   : > { %1586 = vmatmul.mubr.bf16.gmra.mrb[12].mxu0 %v703_v6  ;;  %v6357_v6 = vld [vmem:[%s9990_s2 + $0x230] ss:$8 sps:$4 sm:$0xff]  }
  0x94   : > { %1649 = vmatpush1.bf16.msra.mxu0 %v6318_v7  ;;  %1595 = vmatprep.mubr.bf16.mxu0 %v712_v8  ;;  %v585_v7 = vld [vmem:[%s7252_s16 + $0x110] sm:$0xff] }
  0x95   : > { %1650 = vmatprep.subr.bf16.mxu0 %v6323_v9  ;;  %v593_v8 = vld [vmem:[%s7252_s16 + $0x150] sm:$0xff]  ;;  %v6362_v9 = vld [vmem:[%s9990_s2 + $0x244] ss:$8 sps:$4 sm:$0xff]  }
  0x96   : > { %v697_v12 = vpack.c.bf16 %v593_v8, %v585_v7  ;;  %v563_v7 = vld [vmem:[%s7252_s16 + $0x60] sm:$0xff] }
  0x97   : > { %v6398_v8 = vld [vmem:[%s9990_s2 + $0x304] ss:$8 sps:$4 sm:$0xff]  }
  0x98   : > { %1651 = vmatpush1.bf16.msra.mxu0 %v6321_v10  ;;  %v602_v10 = vld [vmem:[%s7252_s16 + $0x198] sm:$0xff] }
  0x99   : > { %1652 = vmatprep.subr.bf16.mxu0 %v6326_v13  ;;  %v6360_v13 = vld [vmem:[%s9990_s2 + $0x240] ss:$8 sps:$4 sm:$0xff]   ;;  %v706_v14 = vpack.c.bf16 %v610_v11, %v602_v10  ;;  %v6449_v11 = vld [vmem:[%s9992_s4 + $0x10] ss:$8 sps:$4 sm:$0xff]  }
  0x9a   : > { %v580_v10 = vld [vmem:[%s7252_s16 + $0xe8] sm:$0xff] }
  0x9b   : > { %1596 = vmatmul.mubr.bf16.gmra.mrb[16].mxu0 %v711_v16  ;;  %v6363_v16 = vld [vmem:[%s9990_s2 + $0x250] ss:$8 sps:$4 sm:$0xff]  }
  0x9c   : > { %1653 = vmatpush1.bf16.msra.mxu0 %v6324_v17  ;;  %1605 = vmatprep.mubr.bf16.mxu0 %v720_v18  ;;  %v601_v17 = vld [vmem:[%s7252_s16 + $0x190] sm:$0xff] }
  0x9d   : > { %1654 = vmatprep.subr.bf16.mxu0 %v6329_v19  ;;  %v609_v18 = vld [vmem:[%s7252_s16 + $0x1d0] sm:$0xff]  ;;  %v6368_v19 = vld [vmem:[%s9990_s2 + $0x264] ss:$8 sps:$4 sm:$0xff]  }
  0x9e   : > { %v705_v22 = vpack.c.bf16 %v609_v18, %v601_v17  ;;  %v6452_v17 = vld [vmem:[%s9992_s4 + $0x20] ss:$8 sps:$4 sm:$0xff]   ;;  %v6453_v18 = vld [vmem:[%s9992_s4 + $0x34] ss:$8 sps:$4 sm:$0xff]  }
  0xa0   : > { %1655 = vmatpush1.bf16.msra.mxu0 %v6327_v20  ;;  %v618_v20 = vld [vmem:[%s7252_s16 + $0x218] sm:$0xff] }
  0xa1   : > { %1656 = vmatprep.subr.bf16.mxu0 %v6332_v23  ;;  %v6366_v23 = vld [vmem:[%s9990_s2 + $0x260] ss:$8 sps:$4 sm:$0xff]   ;;  %v714_v24 = vpack.c.bf16 %v626_v21, %v618_v20 }
  0xa2   : > { %v571_v20 = vld [vmem:[%s7252_s16 + $0xa0] sm:$0xff] }
  0xa3   : > { %1606 = vmatmul.mubr.bf16.gmra.mrb[20].mxu0 %v719_v26  ;;  %v6369_v26 = vld [vmem:[%s9990_s2 + $0x270] ss:$8 sps:$4 sm:$0xff]   ;;  %v579_v21 = vld [vmem:[%s7252_s16 + $0xe0] sm:$0xff] }
  0xa4   : > { %1657 = vmatpush1.bf16.msra.mxu0 %v6330_v27  ;;  %1615 = vmatprep.mubr.bf16.mxu0 %v728_v28  ;;  %v617_v27 = vld [vmem:[%s7252_s16 + $0x210] sm:$0xff] }
  0xa5   : > { %1658 = vmatprep.subr.bf16.mxu0 %v6335_v29  ;;  %v625_v28 = vld [vmem:[%s7252_s16 + $0x250] sm:$0xff]  ;;  %v6374_v29 = vld [vmem:[%s9990_s2 + $0x284] ss:$8 sps:$4 sm:$0xff]  }
  0xa6   : > { %v713_v32 = vpack.c.bf16 %v625_v28, %v617_v27  ;;  %v6456_v27 = vld [vmem:[%s9992_s4 + $0x44] ss:$8 sps:$4 sm:$0xff]   ;;  %v6402_v28 = vld [vmem:[%s9990_s2 + $0x320] ss:$8 sps:$4 sm:$0xff]  }
  0xa8   : > { %1659 = vmatpush1.bf16.msra.mxu0 %v6333_v30  ;;  %v634_v30 = vld [vmem:[%s7252_s16 + $0x298] sm:$0xff] }
  0xa9   : > { %1660 = vmatprep.subr.bf16.mxu0 %v6338_v33  ;;  %v6372_v33 = vld [vmem:[%s9990_s2 + $0x280] ss:$8 sps:$4 sm:$0xff]   ;;  %v722_v34 = vpack.c.bf16 %v642_v31, %v634_v30  ;;  %v6407_v30 = vld [vmem:[%s9990_s2 + $0x334] ss:$8 sps:$4 sm:$0xff]  }
  0xaa   : > { %v6458_v31 = vld [vmem:[%s9992_s4 + $0x40] ss:$8 sps:$4 sm:$0xff]  }
  0xab   : > { %1616 = vmatmul.mubr.bf16.gmra.mrb[24].mxu0 %v727_v36  ;;  %v6375_v36 = vld [vmem:[%s9990_s2 + $0x290] ss:$8 sps:$4 sm:$0xff]  }
  0xac   : > { %1661 = vmatpush1.bf16.msra.mxu0 %v6336_v37  ;;  %1625 = vmatprep.mubr.bf16.mxu0 %v736_v38  ;;  %v633_v37 = vld [vmem:[%s7252_s16 + $0x290] sm:$0xff] }
  0xad   : > { %1662 = vmatprep.subr.bf16.mxu0 %v6341_v39  ;;  %v641_v38 = vld [vmem:[%s7252_s16 + $0x2d0] sm:$0xff]  ;;  %v6380_v39 = vld [vmem:[%s9990_s2 + $0x2a4] ss:$8 sps:$4 sm:$0xff]  }
  0xae   : > { %v721_v42 = vpack.c.bf16 %v641_v38, %v633_v37  ;;  %v604_v37 = vld [vmem:[%s7252_s16 + $0x1a8] sm:$0xff] }
  0xaf   : > { %v612_v38 = vld [vmem:[%s7252_s16 + $0x1e8] sm:$0xff] }
  0xb0   : > { %1663 = vmatpush1.bf16.msra.mxu0 %v6339_v40  ;;  %v650_v40 = vld [vmem:[%s7252_s16 + $0x318] sm:$0xff] }
  0xb1   : > { %1664 = vmatprep.subr.bf16.mxu0 %v6344_v43  ;;  %v6378_v43 = vld [vmem:[%s9990_s2 + $0x2a0] ss:$8 sps:$4 sm:$0xff]   ;;  %v730_v44 = vpack.c.bf16 %v658_v41, %v650_v40  ;;  %v6462_v41 = vld [vmem:[%s9992_s4 + $0x64] ss:$8 sps:$4 sm:$0xff]  }
  0xb3   : > { %1626 = vmatmul.mubr.bf16.gmra.mrb[28].mxu0 %v735_v46  ;;  %v6381_v46 = vld [vmem:[%s9990_s2 + $0x2b0] ss:$8 sps:$4 sm:$0xff]  }
  0xb4   : > { %1665 = vmatpush1.bf16.msra.mxu0 %v6342_v47  ;;  %1668 = vmatprep.mubr.bf16.mxu0 %v682_v48  ;;  %v649_v47 = vld [vmem:[%s7252_s16 + $0x310] sm:$0xff] }
  0xb5   : > { %1666 = vmatprep.subr.bf16.mxu0 %v6347_v49  ;;  %v657_v48 = vld [vmem:[%s7252_s16 + $0x350] sm:$0xff]  ;;  %v6386_v49 = vld [vmem:[%s9990_s2 + $0x2c4] ss:$8 sps:$4 sm:$0xff]  }
  0xb6   : > { %v729_v52 = vpack.c.bf16 %v657_v48, %v649_v47  ;;  %v6411_v47 = vld [vmem:[%s9990_s2 + $0x350] ss:$8 sps:$4 sm:$0xff]   ;;  %v603_v48 = vld [vmem:[%s7252_s16 + $0x1a0] sm:$0xff] }
  0xb8   : > { %1667 = vmatpush1.bf16.msra.mxu0 %v6345_v50  ;;  %v666_v50 = vld [vmem:[%s7252_s16 + $0x398] sm:$0xff] }
  0xb9   : > { %1749 = vmatprep.subr.bf16.mxu0 %v6350_v53  ;;  %v6384_v53 = vld [vmem:[%s9990_s2 + $0x2c0] ss:$8 sps:$4 sm:$0xff]   ;;  %v738_v54 = vpack.c.bf16 %v674_v51, %v666_v50  ;;  %v6416_v50 = vld [vmem:[%s9990_s2 + $0x364] ss:$8 sps:$4 sm:$0xff]  }
  0xba   : > { %v620_v51 = vld [vmem:[%s7252_s16 + $0x228] sm:$0xff] }
  0xbb   : > { %1669 = vmatmul.mubr.bf16.vlgmr.msra.gmra.mrb[0].mxu0 %v681_v56  ;;  %v6387_v56 = vld [vmem:[%s9990_s2 + $0x2d0] ss:$8 sps:$4 sm:$0xff]  }
  0xbc   : > { %1750 = vmatpush1.bf16.msra.mxu0 %v6348_v57  ;;  %1678 = vmatprep.mubr.bf16.mxu0 %v690_v59  ;;  %v665_v57 = vld [vmem:[%s7252_s16 + $0x390] sm:$0xff]  ;;  %v6392_v59 = vld [vmem:[%s9990_s2 + $0x2e4] ss:$8 sps:$4 sm:$0xff]  }
  0xbd   : > { %1751 = vmatprep.subr.bf16.mxu0 %v6353_v58  ;;  %v673_v58 = vld [vmem:[%s7252_s16 + $0x3d0] sm:$0xff] }
  0xbe   : > { %v737_v62 = vpack.c.bf16 %v673_v58, %v665_v57  ;;  %v6419_v58 = vld [vmem:[%s9990_s2 + $0x374] ss:$8 sps:$4 sm:$0xff]  }
  0xc0   : > { %1752 = vmatpush1.bf16.msra.mxu0 %v6351_v60  ;;  %v556_v60 = vld [vmem:[%s7252_s16 + $0x28] sm:$0xff] }
  0xc1   : > { %1753 = vmatprep.subr.bf16.mxu0 %v6356_v63  ;;  %v6390_v63 = vld [vmem:[%s9990_s2 + $0x2e0] ss:$8 sps:$4 sm:$0xff]   ;;  %v684_v0 = vpack.c.bf16 %v564_v61, %v556_v60  ;;  %v6471_v60 = vld [vmem:[%s9992_s4 + $0x94] ss:$8 sps:$4 sm:$0xff]   ;;  %v6417_v61 = vld [vmem:[%s9990_s2 + $0x370] ss:$8 sps:$4 sm:$0xff]  }
  0xc3   : > { %1679 = vmatmul.mubr.bf16.gmra.mrb[4].mxu0 %v689_v3  ;;  %v6446_v3 = vld [vmem:[%s9992_s4] ss:$8 sps:$4 sm:$0xff]  }
  0xc4   : > { %1754 = vmatpush1.bf16.msra.mxu0 %v6354_v2  ;;  %1688 = vmatprep.mubr.bf16.mxu0 %v698_v5  ;;  %v6444_v2 = vld [vmem:[%s9992_s4 + $0x4] ss:$8 sps:$4 sm:$0xff]   ;;  %v6393_v5 = vld [vmem:[%s9990_s2 + $0x2f0] ss:$8 sps:$4 sm:$0xff]  }
  0xc5   : > { %1755 = vmatprep.subr.bf16.mxu0 %v6359_v4  ;;  %v6447_v4 = vld [vmem:[%s9992_s4 + $0x14] ss:$8 sps:$4 sm:$0xff]   ;;  %2204 = vmatprep.subr.bf16.mxu1 %v6444_v2  ;;  %v644_v2 = vld [vmem:[%s7252_s16 + $0x2e8] sm:$0xff] }
  0xc6   : > { %2205 = vmatpush1.bf16.msra.mxu1 %v6446_v3 }
  0xc7   : > { %2206 = vmatprep.subr.bf16.mxu1 %v6447_v4  ;;  %v6420_v4 = vld [vmem:[%s9990_s2 + $0x380] ss:$8 sps:$4 sm:$0xff]  }
  0xc8   : > { %1756 = vmatpush1.bf16.msra.mxu0 %v6357_v6  ;;  %v555_v6 = vld [vmem:[%s7252_s16 + $0x20] sm:$0xff] }
  0xc9   : > { %1757 = vmatprep.subr.bf16.mxu0 %v6362_v9  ;;  %v572_v9 = vld [vmem:[%s7252_s16 + $0xa8] sm:$0xff] }
  0xca   : > { %2207 = vmatpush1.bf16.msra.mxu1 %v6449_v11  ;;  %v652_v11 = vld [vmem:[%s7252_s16 + $0x328] sm:$0xff] }
  0xcb   : > { %1689 = vmatmul.mubr.bf16.gmra.mrb[8].mxu0 %v697_v12  ;;  %v683_v12 = vpack.c.bf16 %v563_v7, %v555_v6  ;;  %v6425_v6 = vld [vmem:[%s9990_s2 + $0x394] ss:$8 sps:$4 sm:$0xff]   ;;  %v6423_v7 = vld [vmem:[%s9990_s2 + $0x390] ss:$8 sps:$4 sm:$0xff]  }
  0xcc   : > { %1758 = vmatpush1.bf16.msra.mxu0 %v6360_v13  ;;  %1698 = vmatprep.mubr.bf16.mxu0 %v706_v14  ;;  %v6450_v13 = vld [vmem:[%s9992_s4 + $0x24] ss:$8 sps:$4 sm:$0xff]   ;;  %v6396_v14 = vld [vmem:[%s9990_s2 + $0x300] ss:$8 sps:$4 sm:$0xff]  }
  0xcd   : > { %1759 = vmatprep.subr.bf16.mxu0 %v6365_v15  ;;  %v692_v15 = vpack.c.bf16 %v580_v10, %v572_v9  ;;  %2208 = vmatprep.subr.bf16.mxu1 %v6450_v13  ;;  %v643_v9 = vld [vmem:[%s7252_s16 + $0x2e0] sm:$0xff] }
  0xce   : > { %2209 = vmatpush1.bf16.msra.mxu1 %v6452_v17  ;;  %v6428_v10 = vld [vmem:[%s9990_s2 + $0x3a4] ss:$8 sps:$4 sm:$0xff]   ;;  %v6429_v17 = vld [vmem:[%s9990_s2 + $0x3b0] ss:$8 sps:$4 sm:$0xff]  }
  0xcf   : > { %2210 = vmatprep.subr.bf16.mxu1 %v6453_v18  ;;  %v651_v18 = vld [vmem:[%s7252_s16 + $0x320] sm:$0xff] }
  0xd0   : > { %1760 = vmatpush1.bf16.msra.mxu0 %v6363_v16  ;;  %v6401_v16 = vld [vmem:[%s9990_s2 + $0x314] ss:$8 sps:$4 sm:$0xff]  }
  0xd1   : > { %1761 = vmatprep.subr.bf16.mxu0 %v6368_v19  ;;  %v6399_v19 = vld [vmem:[%s9990_s2 + $0x310] ss:$8 sps:$4 sm:$0xff]  }
  0xd3   : > { %1699 = vmatmul.mubr.bf16.gmra.mrb[12].mxu0 %v705_v22  ;;  %v6404_v22 = vld [vmem:[%s9990_s2 + $0x324] ss:$8 sps:$4 sm:$0xff]  }
  0xd4   : > { %1762 = vmatpush1.bf16.msra.mxu0 %v6366_v23  ;;  %1708 = vmatprep.mubr.bf16.mxu0 %v714_v24  ;;  %v588_v23 = vld [vmem:[%s7252_s16 + $0x128] sm:$0xff] }
  0xd5   : > { %1763 = vmatprep.subr.bf16.mxu0 %v6371_v25  ;;  %v596_v24 = vld [vmem:[%s7252_s16 + $0x168] sm:$0xff]  ;;  %v6455_v25 = vld [vmem:[%s9992_s4 + $0x30] ss:$8 sps:$4 sm:$0xff]  }
  0xd6   : > { %2211 = vmatpush1.bf16.msra.mxu1 %v6455_v25 }
  0xd7   : > { %2212 = vmatprep.subr.bf16.mxu1 %v6456_v27  ;;  %v6435_v27 = vld [vmem:[%s9990_s2 + $0x3d0] ss:$8 sps:$4 sm:$0xff]  }
  0xd8   : > { %1764 = vmatpush1.bf16.msra.mxu0 %v6369_v26  ;;  %v691_v26 = vpack.c.bf16 %v579_v21, %v571_v20  ;;  %v6434_v20 = vld [vmem:[%s9990_s2 + $0x3c4] ss:$8 sps:$4 sm:$0xff]  }
  0xd9   : > { %1765 = vmatprep.subr.bf16.mxu0 %v6374_v29  ;;  %v700_v29 = vpack.c.bf16 %v596_v24, %v588_v23  ;;  %v668_v21 = vld [vmem:[%s7252_s16 + $0x3a8] sm:$0xff] }
  0xda   : > { %2213 = vmatpush1.bf16.msra.mxu1 %v6458_v31  ;;  %v6432_v24 = vld [vmem:[%s9990_s2 + $0x3c0] ss:$8 sps:$4 sm:$0xff]   ;;  %v558_v31 = vld [vmem:[%s7252_s16 + $0x38] sm:$0xff] }
  0xdb   : > { %1709 = vmatmul.mubr.bf16.gmra.mrb[16].mxu0 %v713_v32  ;;  %v6459_v32 = vld [vmem:[%s9992_s4 + $0x54] ss:$8 sps:$4 sm:$0xff]  }
  0xdc   : > { %1766 = vmatpush1.bf16.msra.mxu0 %v6372_v33  ;;  %1718 = vmatprep.mubr.bf16.mxu0 %v722_v34  ;;  %v6405_v33 = vld [vmem:[%s9990_s2 + $0x330] ss:$8 sps:$4 sm:$0xff]   ;;  %v587_v34 = vld [vmem:[%s7252_s16 + $0x120] sm:$0xff] }
  0xdd   : > { %1767 = vmatprep.subr.bf16.mxu0 %v6377_v35  ;;  %v595_v35 = vld [vmem:[%s7252_s16 + $0x160] sm:$0xff]  ;;  %2214 = vmatprep.subr.bf16.mxu1 %v6459_v32  ;;  %v566_v32 = vld [vmem:[%s7252_s16 + $0x78] sm:$0xff] }
  0xde   : > { %v699_v40 = vpack.c.bf16 %v595_v35, %v587_v34  ;;  %v6438_v34 = vld [vmem:[%s9990_s2 + $0x3e0] ss:$8 sps:$4 sm:$0xff]   ;;  %v686_v35 = vpack.c.bf16 %v566_v32, %v558_v31 }
  0xe0   : > { %1768 = vmatpush1.bf16.msra.mxu0 %v6375_v36  ;;  %v6410_v36 = vld [vmem:[%s9990_s2 + $0x344] ss:$8 sps:$4 sm:$0xff]  }
  0xe1   : > { %1769 = vmatprep.subr.bf16.mxu0 %v6380_v39  ;;  %v6461_v39 = vld [vmem:[%s9992_s4 + $0x50] ss:$8 sps:$4 sm:$0xff]  }
  0xe2   : > { %2215 = vmatpush1.bf16.msra.mxu1 %v6461_v39  ;;  %v565_v39 = vld [vmem:[%s7252_s16 + $0x70] sm:$0xff] }
  0xe3   : > { %1719 = vmatmul.mubr.bf16.gmra.mrb[20].mxu0 %v721_v42  ;;  %v6408_v42 = vld [vmem:[%s9990_s2 + $0x340] ss:$8 sps:$4 sm:$0xff]   ;;  %2216 = vmatprep.subr.bf16.mxu1 %v6462_v41  ;;  %v582_v41 = vld [vmem:[%s7252_s16 + $0xf8] sm:$0xff] }
  0xe4   : > { %1770 = vmatpush1.bf16.msra.mxu0 %v6378_v43  ;;  %1728 = vmatprep.mubr.bf16.mxu0 %v730_v44  ;;  %v708_v43 = vpack.c.bf16 %v612_v38, %v604_v37  ;;  %v6413_v44 = vld [vmem:[%s9990_s2 + $0x354] ss:$8 sps:$4 sm:$0xff]   ;;  %v6441_v37 = vld [vmem:[%s9990_s2 + $0x3f0] ss:$8 sps:$4 sm:$0xff]  }
  0xe5   : > { %1771 = vmatprep.subr.bf16.mxu0 %v6383_v45  ;;  %v6464_v45 = vld [vmem:[%s9992_s4 + $0x60] ss:$8 sps:$4 sm:$0xff]   ;;  %v557_v38 = vld [vmem:[%s7252_s16 + $0x30] sm:$0xff] }
  0xe6   : > { %2217 = vmatpush1.bf16.msra.mxu1 %v6464_v45  ;;  %v581_v45 = vld [vmem:[%s7252_s16 + $0xf0] sm:$0xff] }
  0xe8   : > { %1772 = vmatpush1.bf16.msra.mxu0 %v6381_v46  ;;  %v6465_v46 = vld [vmem:[%s9992_s4 + $0x74] ss:$8 sps:$4 sm:$0xff]  }
  0xe9   : > { %1773 = vmatprep.subr.bf16.mxu0 %v6386_v49  ;;  %v611_v49 = vld [vmem:[%s7252_s16 + $0x1e0] sm:$0xff]  ;;  %2218 = vmatprep.subr.bf16.mxu1 %v6465_v46  ;;  %v590_v46 = vld [vmem:[%s7252_s16 + $0x138] sm:$0xff] }
  0xeb   : > { %1729 = vmatmul.mubr.bf16.gmra.mrb[24].mxu0 %v729_v52  ;;  %v628_v52 = vld [vmem:[%s7252_s16 + $0x268] sm:$0xff] }
  0xec   : > { %1774 = vmatpush1.bf16.msra.mxu0 %v6384_v53  ;;  %1738 = vmatprep.mubr.bf16.mxu0 %v738_v54  ;;  %v6467_v53 = vld [vmem:[%s9992_s4 + $0x70] ss:$8 sps:$4 sm:$0xff]   ;;  %v707_v54 = vpack.c.bf16 %v611_v49, %v603_v48  ;;  %v716_v57 = vpack.c.bf16 %v628_v52, %v620_v51 }
  0xed   : > { %1775 = vmatprep.subr.bf16.mxu0 %v6389_v55  ;;  %v6468_v55 = vld [vmem:[%s9992_s4 + $0x84] ss:$8 sps:$4 sm:$0xff]   ;;  %2219 = vmatpush1.bf16.msra.mxu1 %v6467_v53  ;;  %v597_v51 = vld [vmem:[%s7252_s16 + $0x170] sm:$0xff]  ;;  %v606_v52 = vld [vmem:[%s7252_s16 + $0x1b8] sm:$0xff] }
  0xee   : > { %2220 = vmatprep.subr.bf16.mxu1 %v6468_v55  ;;  %v614_v53 = vld [vmem:[%s7252_s16 + $0x1f8] sm:$0xff] }
  0xef   : > { %v710_v55 = vpack.c.bf16 %v614_v53, %v606_v52 }
  0xf0   : > { %1776 = vmatpush1.bf16.msra.mxu0 %v6387_v56  ;;  %v6414_v56 = vld [vmem:[%s9990_s2 + $0x360] ss:$8 sps:$4 sm:$0xff]  }
  0xf1   : > { %1777 = vmatprep.subr.bf16.mxu0 %v6392_v59  ;;  %v6470_v59 = vld [vmem:[%s9992_s4 + $0x80] ss:$8 sps:$4 sm:$0xff]  }
  0xf2   : > { %2221 = vmatpush1.bf16.msra.mxu1 %v6470_v59  ;;  %v630_v59 = vld [vmem:[%s7252_s16 + $0x278] sm:$0xff] }
  0xf3   : > { %1739 = vmatmul.mubr.bf16.gmra.mrb[28].mxu0 %v737_v62  ;;  %v619_v62 = vld [vmem:[%s7252_s16 + $0x220] sm:$0xff]  ;;  %2222 = vmatprep.subr.bf16.mxu1 %v6471_v60 }
  0xf4   : > { %1778 = vmatpush1.bf16.msra.mxu0 %v6390_v63  ;;  %1781 = vmatprep.mubr.bf16.mxu0 %v684_v0  ;;  %v627_v63 = vld [vmem:[%s7252_s16 + $0x260] sm:$0xff] }
  0xf5   : > { %1779 = vmatprep.subr.bf16.mxu0 %v6395_v1  ;;  %v6422_v0 = vld [vmem:[%s9990_s2 + $0x384] ss:$8 sps:$4 sm:$0xff]   ;;  %v715_v3 = vpack.c.bf16 %v627_v63, %v619_v62  ;;  %v621_v62 = vld [vmem:[%s7252_s16 + $0x230] sm:$0xff] }
  0xf6   : > { %v636_v1 = vld [vmem:[%s7252_s16 + $0x2a8] sm:$0xff]  ;;  %v629_v63 = vld [vmem:[%s7252_s16 + $0x270] sm:$0xff] }
  0xf8   : > { %1780 = vmatpush1.bf16.msra.mxu0 %v6393_v5  ;;  %v724_v5 = vpack.c.bf16 %v644_v2, %v636_v1  ;;  %v646_v1 = vld [vmem:[%s7252_s16 + $0x2f8] sm:$0xff]  ;;  %v717_v2 = vpack.c.bf16 %v629_v63, %v621_v62  ;;  %v6482_v63 = vld [vmem:[%s9994_s6 + $0x10] sm:$0xff]  }
  0xf9   : > { %1862 = vmatprep.subr.bf16.mxu0 %v6398_v8  ;;  %v635_v8 = vld [vmem:[%s7252_s16 + $0x2a0] sm:$0xff] }
  0xfa   : > { %v723_v13 = vpack.c.bf16 %v643_v9, %v635_v8 }
  0xfb   : > { %1782 = vmatmul.mubr.bf16.vlgmr.msra.gmra.mrb[0].mxu0 %v683_v12  ;;  %v660_v12 = vld [vmem:[%s7252_s16 + $0x368] sm:$0xff] }
  0xfc   : > { %1863 = vmatpush1.bf16.msra.mxu0 %v6396_v14  ;;  %1791 = vmatprep.mubr.bf16.mxu0 %v692_v15  ;;  %v6426_v14 = vld [vmem:[%s9990_s2 + $0x3a0] ss:$8 sps:$4 sm:$0xff]   ;;  %v732_v15 = vpack.c.bf16 %v660_v12, %v652_v11  ;;  %v661_v11 = vld [vmem:[%s7252_s16 + $0x370] sm:$0xff]  ;;  %v670_v12 = vld [vmem:[%s7252_s16 + $0x3b8] sm:$0xff] }
  0xfd   : > { %1864 = vmatprep.subr.bf16.mxu0 %v6401_v16  ;;  %v6431_v16 = vld [vmem:[%s9990_s2 + $0x3b4] ss:$8 sps:$4 sm:$0xff]  }
 0x100   : > { %1865 = vmatpush1.bf16.msra.mxu0 %v6399_v19  ;;  %v659_v19 = vld [vmem:[%s7252_s16 + $0x360] sm:$0xff] }
 0x101   : > { %1866 = vmatprep.subr.bf16.mxu0 %v6404_v22  ;;  %v676_v22 = vld [vmem:[%s7252_s16 + $0x3e8] sm:$0xff]  ;;  %v731_v23 = vpack.c.bf16 %v659_v19, %v651_v18  ;;  %v6473_v19 = vld [vmem:[%s9992_s4 + $0x90] ss:$8 sps:$4 sm:$0xff]  }
 0x102   : > { %v740_v25 = vpack.c.bf16 %v676_v22, %v668_v21  ;;  %2223 = vmatpush1.bf16.msra.mxu1 %v6473_v19  ;;  %v6476_v21 = vld [vmem:[%s9992_s4 + $0xa0] ss:$8 sps:$4 sm:$0xff]   ;;  %v6477_v22 = vld [vmem:[%s9992_s4 + $0xb4] ss:$8 sps:$4 sm:$0xff]  }
 0x103   : > { %1792 = vmatmul.mubr.bf16.gmra.mrb[4].mxu0 %v691_v26  ;;  %v6437_v26 = vld [vmem:[%s9990_s2 + $0x3d4] ss:$8 sps:$4 sm:$0xff]  }
 0x104   : > { %1867 = vmatpush1.bf16.msra.mxu0 %v6402_v28  ;;  %1801 = vmatprep.mubr.bf16.mxu0 %v700_v29  ;;  %v667_v28 = vld [vmem:[%s7252_s16 + $0x3a0] sm:$0xff] }
 0x105   : > { %1868 = vmatprep.subr.bf16.mxu0 %v6407_v30  ;;  %v675_v29 = vld [vmem:[%s7252_s16 + $0x3e0] sm:$0xff] }
 0x106   : > { %v6440_v30 = vld [vmem:[%s9990_s2 + $0x3e4] ss:$8 sps:$4 sm:$0xff]  }
 0x108   : > { %1869 = vmatpush1.bf16.msra.mxu0 %v6405_v33  ;;  %v739_v33 = vpack.c.bf16 %v675_v29, %v667_v28  ;;  %v871_v28 = vld [vmem:[%s9991_s3] sm:$0x3] }
 0x109   : > { %1870 = vmatprep.subr.bf16.mxu0 %v6410_v36  ;;  %v6443_v36 = vld [vmem:[%s9990_s2 + $0x3f4] ss:$8 sps:$4 sm:$0xff]  }
 0x10b   : > { %1802 = vmatmul.mubr.bf16.gmra.mrb[8].mxu0 %v699_v40  ;;  %v574_v40 = vld [vmem:[%s7252_s16 + $0xb8] sm:$0xff] }
 0x10c   : > { %1871 = vmatpush1.bf16.msra.mxu0 %v6408_v42  ;;  %1811 = vmatprep.mubr.bf16.mxu0 %v708_v43  ;;  %v685_v42 = vpack.c.bf16 %v565_v39, %v557_v38  ;;  %v694_v43 = vpack.c.bf16 %v582_v41, %v574_v40 }
 0x10d   : > { %1872 = vmatprep.subr.bf16.mxu0 %v6413_v44  ;;  %v573_v44 = vld [vmem:[%s7252_s16 + $0xb0] sm:$0xff] }
 0x10e   : > { %v693_v48 = vpack.c.bf16 %v581_v45, %v573_v44 }
 0x110   : > { %1873 = vmatpush1.bf16.msra.mxu0 %v6411_v47  ;;  %v598_v47 = vld [vmem:[%s7252_s16 + $0x178] sm:$0xff] }
 0x111   : > { %1874 = vmatprep.subr.bf16.mxu0 %v6416_v50  ;;  %v702_v49 = vpack.c.bf16 %v598_v47, %v590_v46  ;;  %v589_v50 = vld [vmem:[%s7252_s16 + $0x130] sm:$0xff]  ;;  %v6480_v47 = vld [vmem:[%s9994_s6] sm:$0xff]  }
 0x113   : > { %1812 = vmatmul.mubr.bf16.gmra.mrb[12].mxu0 %v707_v54  ;;  %v701_v54 = vpack.c.bf16 %v597_v51, %v589_v50 }
 0x114   : > { %1875 = vmatpush1.bf16.msra.mxu0 %v6414_v56  ;;  %1821 = vmatprep.mubr.bf16.mxu0 %v716_v57  ;;  %v605_v56 = vld [vmem:[%s7252_s16 + $0x1b0] sm:$0xff] }
 0x115   : > { %1876 = vmatprep.subr.bf16.mxu0 %v6419_v58  ;;  %v613_v57 = vld [vmem:[%s7252_s16 + $0x1f0] sm:$0xff]  ;;  %v622_v58 = vld [vmem:[%s7252_s16 + $0x238] sm:$0xff] }
 0x116   : > { %v709_v60 = vpack.c.bf16 %v613_v57, %v605_v56 }
 0x118   : > { %1877 = vmatpush1.bf16.msra.mxu0 %v6417_v61  ;;  %v718_v61 = vpack.c.bf16 %v630_v59, %v622_v58 }
 0x119   : > { %1878 = vmatprep.subr.bf16.mxu0 %v6422_v0  ;;  %v638_v0 = vld [vmem:[%s7252_s16 + $0x2b8] sm:$0xff] }
 0x11b   : > { %1822 = vmatmul.mubr.bf16.gmra.mrb[16].mxu0 %v715_v3  ;;  %v726_v3 = vpack.c.bf16 %v646_v1, %v638_v0 }
 0x11c   : > { %1879 = vmatpush1.bf16.msra.mxu0 %v6420_v4  ;;  %1831 = vmatprep.mubr.bf16.mxu0 %v724_v5  ;;  %v637_v4 = vld [vmem:[%s7252_s16 + $0x2b0] sm:$0xff] }
 0x11d   : > { %1880 = vmatprep.subr.bf16.mxu0 %v6425_v6  ;;  %v645_v5 = vld [vmem:[%s7252_s16 + $0x2f0] sm:$0xff]  ;;  %v654_v6 = vld [vmem:[%s7252_s16 + $0x338] sm:$0xff] }
 0x11e   : > { %v725_v8 = vpack.c.bf16 %v645_v5, %v637_v4 }
 0x120   : > { %1881 = vmatpush1.bf16.msra.mxu0 %v6423_v7  ;;  %v662_v7 = vld [vmem:[%s7252_s16 + $0x378] sm:$0xff] }
 0x121   : > { %1882 = vmatprep.subr.bf16.mxu0 %v6428_v10  ;;  %v734_v9 = vpack.c.bf16 %v662_v7, %v654_v6  ;;  %v653_v10 = vld [vmem:[%s7252_s16 + $0x330] sm:$0xff]  ;;  %v6483_v7 = vld [vmem:[%s9994_s6 + $0x18] sm:$0xff]  }
 0x123   : > { %1832 = vmatmul.mubr.bf16.gmra.mrb[20].mxu0 %v723_v13  ;;  %v678_v13 = vld [vmem:[%s7252_s16 + $0x3f8] sm:$0xff] }
 0x124   : > { %1883 = vmatpush1.bf16.msra.mxu0 %v6426_v14  ;;  %1841 = vmatprep.mubr.bf16.mxu0 %v732_v15  ;;  %v733_v14 = vpack.c.bf16 %v661_v11, %v653_v10  ;;  %v742_v15 = vpack.c.bf16 %v678_v13, %v670_v12 }
 0x125   : > { %1884 = vmatprep.subr.bf16.mxu0 %v6431_v16  ;;  %v669_v16 = vld [vmem:[%s7252_s16 + $0x3b0] sm:$0xff] }
 0x128   : > { %1885 = vmatpush1.bf16.msra.mxu0 %v6429_v17  ;;  %v677_v17 = vld [vmem:[%s7252_s16 + $0x3f0] sm:$0xff]  ;;  %s9182_s16 = scalar_lea.vmem [#allocation5], %s9146_s30 }
 0x129   : > { %1886 = vmatprep.subr.bf16.mxu0 %v6434_v20  ;;  %v741_v18 = vpack.c.bf16 %v677_v17, %v669_v16  ;;  %v6474_v20 = vld [vmem:[%s9992_s4 + $0xa4] ss:$8 sps:$4 sm:$0xff]   ;;  %s5506_s26 = sshll.u32 %s9182_s16, 4  ;;  %s9931_s26 = int_to_ptr.vmem [resolvable:$true] %s5506_s26 }
 0x12a   : > { %2224 = vmatprep.subr.bf16.mxu1 %v6474_v20  ;;  %s6973_s29 = scalar_lea.vmem %s9931_s26, 16384 }
 0x12b   : > { %1842 = vmatmul.mubr.bf16.gmra.mrb[24].mxu0 %v731_v23  ;;  %2225 = vmatpush1.bf16.msra.mxu1 %v6476_v21  ;;  %v6479_v23 = vld [vmem:[%s9992_s4 + $0xb0] ss:$8 sps:$4 sm:$0xff]   ;;  %p6974_p6 = scmp.ne.s32.totalorder %s9931_s26, %s6973_s29 }
 0x12c   : > { %1887 = vmatpush1.bf16.msra.mxu0 %v6432_v24  ;;  %1851 = vmatprep.mubr.bf16.mxu0 %v740_v25  ;;  %v7044_v24 = vmov 0   ;;  %v873_v25 = vlaneseq }
 0x12d   : > { %1888 = vmatprep.subr.bf16.mxu0 %v6437_v26  ;;  %2226 = vmatprep.subr.bf16.mxu1 %v6477_v22  ;;  %p6975_p10 = pnand %p6974_p6, %p10469_p9 }
 0x12e   : > { %v7806_v26 = vshrl.u32 %v873_v25, 7 }
 0x12f   : > { %2227 = vmatpush1.bf16.msra.mxu1 %v6479_v23  ;;  %v6485_v23 = vld [vmem:[%s9994_s6 + $0x28] sm:$0xff]   ;;  %p6976_p12 = pneg %p6975_p10 }
 0x130   : > { %1889 = vmatpush1.bf16.msra.mxu0 %v6435_v27  ;;  %2492 = vmatprep.subr.bf16.mxu1 %v7044_v24  ;;  %v7809_v27 = vsub.s32 0, %v7806_v26  ;;  %v7815_v29 = vsub.s32 1, %v7806_v26 }
 0x131   : > { %1890 = vmatprep.subr.bf16.mxu0 %v6440_v30 }
 0x132   : > { %10168 = vst [vmem:[#allocation13_spill] sm:$0xff] %v7809_v27  ;;  %10169 = vst [vmem:[#allocation14_spill] sm:$0xff] %v7815_v29  ;;  %v7818_v30 = vrot.slane %v871_v28, %v7809_v27  ;;  %v7821_v31 = vrot.slane %v871_v28, %v7815_v29 }
 0x133   : > { %1852 = vmatmul.mubr.bf16.gmra.mrb[28].mxu0 %v739_v33 }
 0x134   : > { %1891 = vmatpush1.bf16.msra.mxu0 %v6438_v34  ;;  %1894 = vmatprep.mubr.bf16.mxu0 %v686_v35 }
 0x135   : > { %1892 = vmatprep.subr.bf16.mxu0 %v6443_v36 }
 0x138   : > { %1893 = vmatpush1.bf16.msra.mxu0 %v6441_v37 }
 0x13b   : > { %1895 = vmatmul.mubr.bf16.vlgmr.msra.gmra.mrb[0].mxu0 %v685_v42 }
 0x13c   : > { %1904 = vmatprep.mubr.bf16.mxu0 %v694_v43 }
 0x143   : > { %1905 = vmatmul.mubr.bf16.gmra.mrb[4].mxu0 %v693_v48 }
 0x144   : > { %1914 = vmatprep.mubr.bf16.mxu0 %v702_v49 }
 0x14b   : > { %1915 = vmatmul.mubr.bf16.gmra.mrb[8].mxu0 %v701_v54 }
 0x14c   : > { %1924 = vmatprep.mubr.bf16.mxu0 %v710_v55  ;;  %v6481_v55 = vld [vmem:[%s9994_s6 + $0x8] sm:$0xff]  }
 0x153   : > { %1925 = vmatmul.mubr.bf16.gmra.mrb[12].mxu0 %v709_v60 }
 0x154   : > { %1934 = vmatprep.mubr.bf16.mxu0 %v718_v61 }
 0x15b   : > { %1935 = vmatmul.mubr.bf16.gmra.mrb[16].mxu0 %v717_v2 }
 0x15c   : > { %1944 = vmatprep.mubr.bf16.mxu0 %v726_v3 }
 0x163   : > { %1945 = vmatmul.mubr.bf16.gmra.mrb[20].mxu0 %v725_v8 }
 0x164   : > { %1954 = vmatprep.mubr.bf16.mxu0 %v734_v9 }
 0x16b   : > { %1955 = vmatmul.mubr.bf16.gmra.mrb[24].mxu0 %v733_v14 }
 0x16c   : > { %1964 = vmatprep.mubr.bf16.mxu0 %v742_v15  ;;  %v6484_v15 = vld [vmem:[%s9994_s6 + $0x20] sm:$0xff]  }
 0x173   : > { %1965 = vmatmul.mubr.bf16.gmra.mrb[28].mxu0 %v741_v18 }
 0x20e   : > { %v1896_v32 = vpop.f32.mrb[0].mxu0 }
 0x20f   : > { %v6068_v33 = vadd.f32 %v1896_v32, %v7818_v30  ;;  %v1898_v34 = vpop.f32.mrb[1].mxu0 }
 0x210   : > { %v6069_v35 = vadd.f32 %v1898_v34, %v7821_v31  ;;  %v1900_v36 = vpop.f32.mrb[2].mxu0 }
 0x211   : > { %v6070_v37 = vadd.f32 %v1900_v36, %v7818_v30  ;;  %v1902_v38 = vpop.f32.mrb[3].mxu0  ;;  %v1975_v40 = vmax.f32 %v6068_v33, 0.0 }
 0x212   : > { %v6071_v39 = vadd.f32 %v1902_v38, %v7821_v31  ;;  %v1976_v42 = vmax.f32 %v6069_v35, 0.0 }
 0x213   : > { %v1977_v41 = vmax.f32 %v6070_v37, 0.0  ;;  %v6486_v37 = vld [vmem:[%s9994_s6 + $0x30] sm:$0xff]  }
 0x214   : > { %v1978_v43 = vmax.f32 %v6071_v39, 0.0 }
 0x215   : > { %v2007_v44 = vpack.c.bf16 %v1977_v41, %v1975_v40 }
 0x216   : > { %v1906_v45 = vpop.f32.mrb[4].mxu0  ;;  %v2008_v46 = vpack.c.bf16 %v1978_v43, %v1976_v42 }
 0x217   : > { %v6072_v48 = vadd.f32 %v1906_v45, %v7818_v30  ;;  %v1908_v49 = vpop.f32.mrb[5].mxu0  ;;  %v6487_v45 = vld [vmem:[%s9994_s6 + $0x38] sm:$0xff]  }
 0x218   : > { %v6073_v50 = vadd.f32 %v1908_v49, %v7821_v31  ;;  %v1910_v51 = vpop.f32.mrb[6].mxu0  ;;  %5787 = vmatprep.mubr.msk.bf16.mxu1 %vm2179_vm0, %v2008_v46 }
 0x219   : > { %v6074_v52 = vadd.f32 %v1910_v51, %v7818_v30  ;;  %v1912_v53 = vpop.f32.mrb[7].mxu0  ;;  %2237 = vmatmul.mubr.bf16.vlgmr.msra.gmra.mrb[0].mxu1 %v2007_v44  ;;  %v1979_v56 = vmax.f32 %v6072_v48, 0.0 }
 0x21a   : > { %v6075_v54 = vadd.f32 %v1912_v53, %v7821_v31  ;;  %2493 = vmatpush1.bf16.msra.mxu1 %v6480_v47  ;;  %v1980_v58 = vmax.f32 %v6073_v50, 0.0  ;;  %v6488_v53 = vld [vmem:[%s9994_s6 + $0x40] sm:$0xff]  }
 0x21b   : > { %v1981_v57 = vmax.f32 %v6074_v52, 0.0  ;;  %2494 = vmatprep.subr.bf16.mxu1 %v7044_v24 }
 0x21c   : > { %v1982_v59 = vmax.f32 %v6075_v54, 0.0 }
 0x21d   : > { %v2009_v60 = vpack.c.bf16 %v1981_v57, %v1979_v56 }
 0x21e   : > { %v2010_v61 = vpack.c.bf16 %v1982_v59, %v1980_v58  ;;  %v1916_v62 = vpop.f32.mrb[8].mxu0  ;;  %2495 = vmatpush1.bf16.msra.mxu1 %v6481_v55 }
 0x21f   : > { %v6076_v0 = vadd.f32 %v1916_v62, %v7818_v30  ;;  %v1918_v1 = vpop.f32.mrb[9].mxu0  ;;  %2496 = vmatprep.subr.bf16.mxu1 %v7044_v24 }
 0x220   : > { %v6077_v2 = vadd.f32 %v1918_v1, %v7821_v31  ;;  %v1920_v3 = vpop.f32.mrb[10].mxu0  ;;  %5788 = vmatprep.mubr.msk.bf16.mxu1 %vm2179_vm0, %v2010_v61  ;;  %v6489_v61 = vld [vmem:[%s9994_s6 + $0x48] sm:$0xff]  }
 0x221   : > { %v6078_v4 = vadd.f32 %v1920_v3, %v7818_v30  ;;  %v1922_v5 = vpop.f32.mrb[11].mxu0  ;;  %2247 = vmatmul.mubr.bf16.gmra.mrb[4].mxu1 %v2009_v60  ;;  %v1983_v8 = vmax.f32 %v6076_v0, 0.0 }
 0x222   : > { %v6079_v6 = vadd.f32 %v1922_v5, %v7821_v31  ;;  %2497 = vmatpush1.bf16.msra.mxu1 %v6482_v63  ;;  %v1984_v10 = vmax.f32 %v6077_v2, 0.0 }
 0x223   : > { %v1985_v9 = vmax.f32 %v6078_v4, 0.0  ;;  %2498 = vmatprep.subr.bf16.mxu1 %v7044_v24 }
 0x224   : > { %v1986_v11 = vmax.f32 %v6079_v6, 0.0 }
 0x225   : > { %v2011_v12 = vpack.c.bf16 %v1985_v9, %v1983_v8 }
 0x226   : > { %v2012_v13 = vpack.c.bf16 %v1986_v11, %v1984_v10  ;;  %v1926_v14 = vpop.f32.mrb[12].mxu0  ;;  %2499 = vmatpush1.bf16.msra.mxu1 %v6483_v7 }
 0x227   : > { %v6080_v16 = vadd.f32 %v1926_v14, %v7818_v30  ;;  %v1928_v17 = vpop.f32.mrb[13].mxu0  ;;  %2500 = vmatprep.subr.bf16.mxu1 %v7044_v24 }
 0x228   : > { %v6081_v18 = vadd.f32 %v1928_v17, %v7821_v31  ;;  %v1930_v19 = vpop.f32.mrb[14].mxu0  ;;  %5789 = vmatprep.mubr.msk.bf16.mxu1 %vm2179_vm0, %v2012_v13 }
 0x229   : > { %v6082_v20 = vadd.f32 %v1930_v19, %v7818_v30  ;;  %v1932_v21 = vpop.f32.mrb[15].mxu0  ;;  %2257 = vmatmul.mubr.bf16.gmra.mrb[8].mxu1 %v2011_v12  ;;  %v1987_v25 = vmax.f32 %v6080_v16, 0.0 }
 0x22a   : > { %v6083_v22 = vadd.f32 %v1932_v21, %v7821_v31  ;;  %2501 = vmatpush1.bf16.msra.mxu1 %v6484_v15  ;;  %v1988_v32 = vmax.f32 %v6081_v18, 0.0 }
 0x22b   : > { %v1989_v28 = vmax.f32 %v6082_v20, 0.0  ;;  %2502 = vmatprep.subr.bf16.mxu1 %v7044_v24 }
 0x22c   : > { %v1990_v33 = vmax.f32 %v6083_v22, 0.0 }
 0x22d   : > { %v2013_v34 = vpack.c.bf16 %v1989_v28, %v1987_v25 }
 0x22e   : > { %v2014_v35 = vpack.c.bf16 %v1990_v33, %v1988_v32  ;;  %v1936_v36 = vpop.f32.mrb[16].mxu0  ;;  %2503 = vmatpush1.bf16.msra.mxu1 %v6485_v23 }
 0x22f   : > { %v6084_v38 = vadd.f32 %v1936_v36, %v7818_v30  ;;  %v1938_v39 = vpop.f32.mrb[17].mxu0  ;;  %2504 = vmatprep.subr.bf16.mxu1 %v7044_v24 }
 0x230   : > { %v6085_v40 = vadd.f32 %v1938_v39, %v7821_v31  ;;  %v1940_v41 = vpop.f32.mrb[18].mxu0  ;;  %5790 = vmatprep.mubr.msk.bf16.mxu1 %vm2179_vm0, %v2014_v35 }
 0x231   : > { %v6086_v42 = vadd.f32 %v1940_v41, %v7818_v30  ;;  %v1942_v43 = vpop.f32.mrb[19].mxu0  ;;  %2267 = vmatmul.mubr.bf16.gmra.mrb[12].mxu1 %v2013_v34  ;;  %v1991_v46 = vmax.f32 %v6084_v38, 0.0  ;;  %v6490_v38 = vld [vmem:[%s9994_s6 + $0x50] sm:$0xff]  }
 0x232   : > { %v6087_v44 = vadd.f32 %v1942_v43, %v7821_v31  ;;  %2505 = vmatpush1.bf16.msra.mxu1 %v6486_v37  ;;  %v1992_v48 = vmax.f32 %v6085_v40, 0.0 }
 0x233   : > { %v1993_v47 = vmax.f32 %v6086_v42, 0.0  ;;  %2506 = vmatprep.subr.bf16.mxu1 %v7044_v24 }
 0x234   : > { %v1994_v49 = vmax.f32 %v6087_v44, 0.0 }
 0x235   : > { %v2015_v50 = vpack.c.bf16 %v1993_v47, %v1991_v46 }
 0x236   : > { %v2016_v51 = vpack.c.bf16 %v1994_v49, %v1992_v48  ;;  %v1946_v52 = vpop.f32.mrb[20].mxu0  ;;  %2507 = vmatpush1.bf16.msra.mxu1 %v6487_v45 }
 0x237   : > { %v6088_v54 = vadd.f32 %v1946_v52, %v7818_v30  ;;  %v1948_v55 = vpop.f32.mrb[21].mxu0  ;;  %2508 = vmatprep.subr.bf16.mxu1 %v7044_v24 }
 0x238   : > { %v6089_v56 = vadd.f32 %v1948_v55, %v7821_v31  ;;  %v1950_v57 = vpop.f32.mrb[22].mxu0  ;;  %5791 = vmatprep.mubr.msk.bf16.mxu1 %vm2179_vm0, %v2016_v51 }
 0x239   : > { %v6090_v58 = vadd.f32 %v1950_v57, %v7818_v30  ;;  %v1952_v59 = vpop.f32.mrb[23].mxu0  ;;  %2277 = vmatmul.mubr.bf16.gmra.mrb[16].mxu1 %v2015_v50  ;;  %v1995_v62 = vmax.f32 %v6088_v54, 0.0 }
 0x23a   : > { %v6091_v60 = vadd.f32 %v1952_v59, %v7821_v31  ;;  %2509 = vmatpush1.bf16.msra.mxu1 %v6488_v53  ;;  %v1996_v0 = vmax.f32 %v6089_v56, 0.0 }
 0x23b   : > { %v1997_v63 = vmax.f32 %v6090_v58, 0.0  ;;  %2510 = vmatprep.subr.bf16.mxu1 %v7044_v24 }
 0x23c   : > { %v1998_v1 = vmax.f32 %v6091_v60, 0.0 }
 0x23d   : > { %v2017_v2 = vpack.c.bf16 %v1997_v63, %v1995_v62 }
 0x23e   : > { %v2018_v3 = vpack.c.bf16 %v1998_v1, %v1996_v0  ;;  %v1956_v4 = vpop.f32.mrb[24].mxu0  ;;  %2511 = vmatpush1.bf16.msra.mxu1 %v6489_v61 }
 0x23f   : > { %v6092_v5 = vadd.f32 %v1956_v4, %v7818_v30  ;;  %v1958_v6 = vpop.f32.mrb[25].mxu0  ;;  %2512 = vmatprep.subr.bf16.mxu1 %v7044_v24 }
 0x240   : > { %v6093_v7 = vadd.f32 %v1958_v6, %v7821_v31  ;;  %v1960_v8 = vpop.f32.mrb[26].mxu0  ;;  %5792 = vmatprep.mubr.msk.bf16.mxu1 %vm2179_vm0, %v2018_v3 }
 0x241   : > { %v6094_v9 = vadd.f32 %v1960_v8, %v7818_v30  ;;  %v1962_v10 = vpop.f32.mrb[27].mxu0  ;;  %2287 = vmatmul.mubr.bf16.gmra.mrb[20].mxu1 %v2017_v2  ;;  %v1999_v12 = vmax.f32 %v6092_v5, 0.0 }
 0x242   : > { %v6095_v11 = vadd.f32 %v1962_v10, %v7821_v31  ;;  %v2000_v14 = vmax.f32 %v6093_v7, 0.0  ;;  %2513 = vmatpush1.bf16.msra.mxu1 %v6490_v38 }
 0x243   : > { %v2001_v13 = vmax.f32 %v6094_v9, 0.0  ;;  %2514 = vmatprep.subr.bf16.mxu1 %v7044_v24 }
 0x244   : > { %v2002_v15 = vmax.f32 %v6095_v11, 0.0 }
 0x245   : > { %v2019_v16 = vpack.c.bf16 %v2001_v13, %v1999_v12 }
 0x246   : > { %v2020_v17 = vpack.c.bf16 %v2002_v15, %v2000_v14  ;;  %v1966_v18 = vpop.f32.mrb[28].mxu0 }
 0x247   : > { %v6096_v19 = vadd.f32 %v1966_v18, %v7818_v30  ;;  %v1968_v20 = vpop.f32.mrb[29].mxu0 }
 0x248   : > { %v6097_v21 = vadd.f32 %v1968_v20, %v7821_v31  ;;  %v1970_v22 = vpop.f32.mrb[30].mxu0  ;;  %5793 = vmatprep.mubr.msk.bf16.mxu1 %vm2179_vm0, %v2020_v17 }
 0x249   : > { %v6098_v23 = vadd.f32 %v1970_v22, %v7818_v30  ;;  %v1972_v25 = vpop.f32.mrb[31].mxu0  ;;  %2297 = vmatmul.mubr.bf16.gmra.mrb[24].mxu1 %v2019_v16  ;;  %v2003_v32 = vmax.f32 %v6096_v19, 0.0  ;;  %v6491_v30 = vld [vmem:[%s9994_s6 + $0x58] sm:$0xff]  }
 0x24a   : > { %v6099_v28 = vadd.f32 %v1972_v25, %v7821_v31  ;;  %v2004_v34 = vmax.f32 %v6097_v21, 0.0  ;;  %2515 = vmatpush1.bf16.msra.mxu1 %v6491_v30  ;;  %v2047_v31 = vld [vmem:[%s9993_s5] sm:$0x3] }
 0x24b   : > { %v2005_v33 = vmax.f32 %v6098_v23, 0.0  ;;  %v7914_v39 = vrot.slane %v2047_v31, %v7809_v27  ;;  %v7917_v40 = vrot.slane %v2047_v31, %v7815_v29 }
 0x24c   : > { %v2006_v35 = vmax.f32 %v6099_v28, 0.0 }
 0x24d   : > { %v2021_v36 = vpack.c.bf16 %v2005_v33, %v2003_v32 }
 0x24e   : > { %v2022_v37 = vpack.c.bf16 %v2006_v35, %v2004_v34 }
 0x250   : > { %5794 = vmatprep.mubr.msk.bf16.mxu1 %vm2179_vm0, %v2022_v37 }
 0x251   : > { %2307 = vmatmul.mubr.bf16.gmra.mrb[28].mxu1 %v2021_v36 }
 0x2ec   : > { %v2238_v41 = vpop.f32.mrb[0].mxu1 }
 0x2ed   : > { %v2239_v42 = vadd.f32 %v2238_v41, %v7914_v39  ;;  %v2240_v43 = vpop.f32.mrb[1].mxu1 }
 0x2ee   : > { %v2241_v44 = vadd.f32 %v2240_v43, %v7917_v40  ;;  %v2242_v45 = vpop.f32.mrb[2].mxu1 }
 0x2ef   : > { %v2243_v46 = vadd.f32 %v2242_v45, %v7914_v39  ;;  %v2244_v47 = vpop.f32.mrb[3].mxu1  ;;  %v2317_v49 = vmax.f32 %v2239_v42, 0.0 }
 0x2f0   : > { %v2245_v48 = vadd.f32 %v2244_v47, %v7917_v40  ;;  %v2318_v51 = vmax.f32 %v2241_v44, 0.0 }
 0x2f1   : > { %v2319_v50 = vmax.f32 %v2243_v46, 0.0 }
 0x2f2   : > { %v2320_v52 = vmax.f32 %v2245_v48, 0.0 }
 0x2f3   : > { %v2349_v53 = vpack.c.bf16 %v2319_v50, %v2317_v49 }
 0x2f4   : > { %v2350_v54 = vpack.c.bf16 %v2320_v52, %v2318_v51  ;;  %v2248_v55 = vpop.f32.mrb[4].mxu1 }
 0x2f5   : > { %v2249_v56 = vadd.f32 %v2248_v55, %v7914_v39  ;;  %v2250_v57 = vpop.f32.mrb[5].mxu1 }
 0x2f6   : > { %v2251_v58 = vadd.f32 %v2250_v57, %v7917_v40  ;;  %v2252_v59 = vpop.f32.mrb[6].mxu1  ;;  %5808 = vmatprep.mubr.msk.bf16.mxu1 %vm2179_vm0, %v2350_v54 }
 0x2f7   : > { %v2253_v60 = vadd.f32 %v2252_v59, %v7914_v39  ;;  %v2254_v61 = vpop.f32.mrb[7].mxu1  ;;  %2525 = vmatmul.mubr.bf16.vlgmr.msra.gmra.mrb[32].mxu1 %v2349_v53  ;;  %v2321_v63 = vmax.f32 %v2249_v56, 0.0 }
 0x2f8   : > { %v2255_v62 = vadd.f32 %v2254_v61, %v7917_v40  ;;  %v2322_v1 = vmax.f32 %v2251_v58, 0.0 }
 0x2f9   : > { %v2323_v0 = vmax.f32 %v2253_v60, 0.0 }
 0x2fa   : > { %v2324_v2 = vmax.f32 %v2255_v62, 0.0 }
 0x2fb   : > { %v2351_v3 = vpack.c.bf16 %v2323_v0, %v2321_v63 }
 0x2fc   : > { %v2352_v4 = vpack.c.bf16 %v2324_v2, %v2322_v1  ;;  %v2258_v5 = vpop.f32.mrb[8].mxu1 }
 0x2fd   : > { %v2259_v6 = vadd.f32 %v2258_v5, %v7914_v39  ;;  %v2260_v7 = vpop.f32.mrb[9].mxu1 }
 0x2fe   : > { %v2261_v8 = vadd.f32 %v2260_v7, %v7917_v40  ;;  %v2262_v9 = vpop.f32.mrb[10].mxu1  ;;  %5809 = vmatprep.mubr.msk.bf16.mxu1 %vm2179_vm0, %v2352_v4 }
 0x2ff   : > { %v2263_v10 = vadd.f32 %v2262_v9, %v7914_v39  ;;  %v2264_v11 = vpop.f32.mrb[11].mxu1  ;;  %2533 = vmatmul.mubr.bf16.gmra.mrb[36].mxu1 %v2351_v3  ;;  %v2325_v13 = vmax.f32 %v2259_v6, 0.0 }
 0x300   : > { %v2265_v12 = vadd.f32 %v2264_v11, %v7917_v40  ;;  %v2326_v15 = vmax.f32 %v2261_v8, 0.0 }
 0x301   : > { %v2327_v14 = vmax.f32 %v2263_v10, 0.0 }
 0x302   : > { %v2328_v16 = vmax.f32 %v2265_v12, 0.0 }
 0x303   : > { %v2353_v17 = vpack.c.bf16 %v2327_v14, %v2325_v13 }
 0x304   : > { %v2354_v18 = vpack.c.bf16 %v2328_v16, %v2326_v15  ;;  %v2268_v19 = vpop.f32.mrb[12].mxu1 }
 0x305   : > { %v2269_v20 = vadd.f32 %v2268_v19, %v7914_v39  ;;  %v2270_v21 = vpop.f32.mrb[13].mxu1 }
 0x306   : > { %v2271_v22 = vadd.f32 %v2270_v21, %v7917_v40  ;;  %v2272_v23 = vpop.f32.mrb[14].mxu1  ;;  %5810 = vmatprep.mubr.msk.bf16.mxu1 %vm2179_vm0, %v2354_v18 }
 0x307   : > { %v2273_v25 = vadd.f32 %v2272_v23, %v7914_v39  ;;  %v2274_v28 = vpop.f32.mrb[15].mxu1  ;;  %2541 = vmatmul.mubr.bf16.gmra.mrb[40].mxu1 %v2353_v17  ;;  %v2329_v33 = vmax.f32 %v2269_v20, 0.0 }
 0x308   : > { %v2275_v32 = vadd.f32 %v2274_v28, %v7917_v40  ;;  %v2330_v35 = vmax.f32 %v2271_v22, 0.0 }
 0x309   : > { %v2331_v34 = vmax.f32 %v2273_v25, 0.0 }
 0x30a   : > { %v2332_v36 = vmax.f32 %v2275_v32, 0.0 }
 0x30b   : > { %v2355_v37 = vpack.c.bf16 %v2331_v34, %v2329_v33 }
 0x30c   : > { %v2356_v38 = vpack.c.bf16 %v2332_v36, %v2330_v35  ;;  %v2278_v30 = vpop.f32.mrb[16].mxu1 }
 0x30d   : > { %v2279_v31 = vadd.f32 %v2278_v30, %v7914_v39  ;;  %v2280_v41 = vpop.f32.mrb[17].mxu1 }
 0x30e   : > { %v2281_v42 = vadd.f32 %v2280_v41, %v7917_v40  ;;  %v2282_v43 = vpop.f32.mrb[18].mxu1  ;;  %5811 = vmatprep.mubr.msk.bf16.mxu1 %vm2179_vm0, %v2356_v38 }
 0x30f   : > { %v2283_v44 = vadd.f32 %v2282_v43, %v7914_v39  ;;  %v2284_v45 = vpop.f32.mrb[19].mxu1  ;;  %2549 = vmatmul.mubr.bf16.gmra.mrb[44].mxu1 %v2355_v37  ;;  %v2333_v47 = vmax.f32 %v2279_v31, 0.0  ;;  %v6492_v37 = vld [vmem:[%s9996_s8] sm:$0xff]  }
 0x310   : > { %v2285_v46 = vadd.f32 %v2284_v45, %v7917_v40  ;;  %v2334_v49 = vmax.f32 %v2281_v42, 0.0  ;;  %6016 = vmatprep.subr.bf16.mxu1 %v6492_v37 }
 0x311   : > { %v2335_v48 = vmax.f32 %v2283_v44, 0.0  ;;  %6017 = vmatpush3.bf16.msra.mxu1 %v6492_v37 }
 0x312   : > { %v2336_v50 = vmax.f32 %v2285_v46, 0.0 }
 0x313   : > { %v2357_v51 = vpack.c.bf16 %v2335_v48, %v2333_v47 }
 0x314   : > { %v2358_v52 = vpack.c.bf16 %v2336_v50, %v2334_v49  ;;  %v2288_v53 = vpop.f32.mrb[20].mxu1 }
 0x315   : > { %v2289_v54 = vadd.f32 %v2288_v53, %v7914_v39  ;;  %v2290_v55 = vpop.f32.mrb[21].mxu1 }
 0x316   : > { %v2291_v56 = vadd.f32 %v2290_v55, %v7917_v40  ;;  %v2292_v57 = vpop.f32.mrb[22].mxu1  ;;  %5812 = vmatprep.mubr.msk.bf16.mxu1 %vm2179_vm0, %v2358_v52 }
 0x317   : > { %v2293_v58 = vadd.f32 %v2292_v57, %v7914_v39  ;;  %v2294_v59 = vpop.f32.mrb[23].mxu1  ;;  %2557 = vmatmul.mubr.bf16.gmra.mrb[48].mxu1 %v2357_v51  ;;  %v2337_v61 = vmax.f32 %v2289_v54, 0.0 }
 0x318   : > { %v2295_v60 = vadd.f32 %v2294_v59, %v7917_v40  ;;  %v2338_v63 = vmax.f32 %v2291_v56, 0.0 }
 0x319   : > { %v2339_v62 = vmax.f32 %v2293_v58, 0.0 }
 0x31a   : > { %v2340_v0 = vmax.f32 %v2295_v60, 0.0 }
 0x31b   : > { %v2359_v1 = vpack.c.bf16 %v2339_v62, %v2337_v61 }
 0x31c   : > { %v2360_v2 = vpack.c.bf16 %v2340_v0, %v2338_v63  ;;  %v2298_v3 = vpop.f32.mrb[24].mxu1 }
 0x31d   : > { %v2299_v4 = vadd.f32 %v2298_v3, %v7914_v39  ;;  %v2300_v5 = vpop.f32.mrb[25].mxu1 }
 0x31e   : > { %v2301_v6 = vadd.f32 %v2300_v5, %v7917_v40  ;;  %v2302_v7 = vpop.f32.mrb[26].mxu1  ;;  %5813 = vmatprep.mubr.msk.bf16.mxu1 %vm2179_vm0, %v2360_v2 }
 0x31f   : > { %v2303_v8 = vadd.f32 %v2302_v7, %v7914_v39  ;;  %v2304_v9 = vpop.f32.mrb[27].mxu1  ;;  %2565 = vmatmul.mubr.bf16.gmra.mrb[52].mxu1 %v2359_v1  ;;  %v2341_v11 = vmax.f32 %v2299_v4, 0.0 }
 0x320   : > { %v2305_v10 = vadd.f32 %v2304_v9, %v7917_v40  ;;  %v2342_v13 = vmax.f32 %v2301_v6, 0.0 }
 0x321   : > { %v2343_v12 = vmax.f32 %v2303_v8, 0.0 }
 0x322   : > { %v2344_v14 = vmax.f32 %v2305_v10, 0.0 }
 0x323   : > { %v2361_v15 = vpack.c.bf16 %v2343_v12, %v2341_v11 }
 0x324   : > { %v2362_v16 = vpack.c.bf16 %v2344_v14, %v2342_v13  ;;  %v2308_v17 = vpop.f32.mrb[28].mxu1 }
 0x325   : > { %v2309_v18 = vadd.f32 %v2308_v17, %v7914_v39  ;;  %v2310_v19 = vpop.f32.mrb[29].mxu1 }
 0x326   : > { %v2311_v20 = vadd.f32 %v2310_v19, %v7917_v40  ;;  %v2312_v21 = vpop.f32.mrb[30].mxu1  ;;  %5814 = vmatprep.mubr.msk.bf16.mxu1 %vm2179_vm0, %v2362_v16 }
 0x327   : > { %v2313_v22 = vadd.f32 %v2312_v21, %v7914_v39  ;;  %v2314_v23 = vpop.f32.mrb[31].mxu1  ;;  %2573 = vmatmul.mubr.bf16.gmra.mrb[56].mxu1 %v2361_v15  ;;  %v2345_v28 = vmax.f32 %v2309_v18, 0.0  ;;  %v6493_v39 = vld [vmem:[%s9996_s8 + $0x8] sm:$0xff]  }
 0x328   : > { %v2315_v25 = vadd.f32 %v2314_v23, %v7917_v40  ;;  %v2346_v33 = vmax.f32 %v2311_v20, 0.0  ;;  %6018 = vmatprep.subr.bf16.mxu1 %v6493_v39  ;;  %v7969_v40 = vld [vmem:[%s9995_s7] ss:$0 sm:$0xff] }
 0x329   : > { %v2347_v32 = vmax.f32 %v2313_v22, 0.0  ;;  %6019 = vmatpush3.bf16.msra.mxu1 %v6493_v39 }
 0x32a   : > { %v2348_v34 = vmax.f32 %v2315_v25, 0.0 }
 0x32b   : > { %v2363_v35 = vpack.c.bf16 %v2347_v32, %v2345_v28 }
 0x32c   : > { %v2364_v36 = vpack.c.bf16 %v2348_v34, %v2346_v33 }
 0x32e   : > { %5815 = vmatprep.mubr.msk.bf16.mxu1 %vm2179_vm0, %v2364_v36 }
 0x32f   : > { %2581 = vmatmul.mubr.bf16.gmra.mrb[60].mxu1 %v2363_v35 }
 0x3ca   : > { %v2526_v38 = vpop.f32.mrb[32].mxu1 }
 0x3cb   : > { %v7979_v30 = vadd.f32 %v7969_v40, %v2526_v38  ;;  %v2528_v31 = vpop.f32.mrb[33].mxu1 }
 0x3cc   : > { %v2529_v41 = vpop.f32.mrb[34].mxu1 }
 0x3cd   : > { %2589 = vst.msk [vmem:[%s7976_s18] sm:$0xff] %vm2179_vm0, %v7979_v30  ;;  %v2621_v42 = vmul.f32 0.5, %v7979_v30  ;;  %v7986_v43 = vadd.f32 %v7969_v40, %v2529_v41  ;;  %v2531_v44 = vpop.f32.mrb[35].mxu1 }
 0x3cf   : > { %v2637_v45 = vmul.f32 1.442695, %v2621_v42  ;;  %2590 = vst.msk [vmem:[%s7976_s18 + $0x8] sm:$0xff] %vm2179_vm0, %v7986_v43  ;;  %v2622_v46 = vmul.f32 0.5, %v7986_v43 }
 0x3d1   : > { %6497 = vpow2.f32 %v2637_v45  ;;  %v2639_v47 = vmul.f32 1.442695, %v2622_v46 }
 0x3d2   : > { %v2534_v48 = vpop.f32.mrb[36].mxu1 }
 0x3d3   : > { %v7993_v49 = vadd.f32 %v7969_v40, %v2534_v48  ;;  %v2536_v50 = vpop.f32.mrb[37].mxu1  ;;  %6499 = vpow2.f32 %v2639_v47 }
 0x3d4   : > { %v2537_v51 = vpop.f32.mrb[38].mxu1 }
 0x3d5   : > { %2591 = vst.msk [vmem:[%s7976_s18 + $0x10] sm:$0xff] %vm2179_vm0, %v7993_v49  ;;  %v2623_v52 = vmul.f32 0.5, %v7993_v49  ;;  %v8000_v53 = vadd.f32 %v7969_v40, %v2537_v51  ;;  %v2539_v54 = vpop.f32.mrb[39].mxu1 }
 0x3d7   : > { %v2641_v55 = vmul.f32 1.442695, %v2623_v52  ;;  %2592 = vst.msk [vmem:[%s7976_s18 + $0x18] sm:$0xff] %vm2179_vm0, %v8000_v53  ;;  %v2624_v56 = vmul.f32 0.5, %v8000_v53 }
 0x3d9   : > { %6501 = vpow2.f32 %v2641_v55  ;;  %v2643_v57 = vmul.f32 1.442695, %v2624_v56 }
 0x3da   : > { %v2542_v58 = vpop.f32.mrb[40].mxu1 }
 0x3db   : > { %v6498_v59 = vpop.eup %6497  ;;  %v8007_v60 = vadd.f32 %v7969_v40, %v2542_v58  ;;  %v2544_v61 = vpop.f32.mrb[41].mxu1  ;;  %6503 = vpow2.f32 %v2643_v57 }
 0x3dc   : > { %v2545_v62 = vpop.f32.mrb[42].mxu1  ;;  %2685 = vrot.lane.b32.xlu0 %v6498_v59, %s7045_s0 }
 0x3dd   : > { %2593 = vst.msk [vmem:[%s7976_s18 + $0x20] sm:$0xff] %vm2179_vm0, %v8007_v60  ;;  %v2625_v63 = vmul.f32 0.5, %v8007_v60  ;;  %v8015_v0 = vadd.f32 %v7969_v40, %v2545_v62  ;;  %v2547_v1 = vpop.f32.mrb[43].mxu1  ;;  %v6500_v2 = vpop.eup %6499 }
 0x3df   : > { %v2645_v3 = vmul.f32 1.442695, %v2625_v63  ;;  %2594 = vst.msk [vmem:[%s7976_s18 + $0x28] sm:$0xff] %vm2179_vm0, %v8015_v0  ;;  %v2626_v4 = vmul.f32 0.5, %v8015_v0 }
 0x3e0   : > { %2687 = vrot.lane.b32.xlu0 %v6500_v2, %s7045_s0 }
 0x3e1   : > { %6505 = vpow2.f32 %v2645_v3  ;;  %v2647_v5 = vmul.f32 1.442695, %v2626_v4 }
 0x3e2   : > { %v2550_v6 = vpop.f32.mrb[44].mxu1 }
 0x3e3   : > { %v6502_v7 = vpop.eup %6501  ;;  %6507 = vpow2.f32 %v2647_v5  ;;  %v8023_v8 = vadd.f32 %v7969_v40, %v2550_v6  ;;  %v2552_v9 = vpop.f32.mrb[45].mxu1 }
 0x3e4   : > { %v2553_v10 = vpop.f32.mrb[46].mxu1  ;;  %2689 = vrot.lane.b32.xlu1 %v6502_v7, %s7045_s0 }
 0x3e5   : > { %2595 = vst.msk [vmem:[%s7976_s18 + $0x30] sm:$0xff] %vm2179_vm0, %v8023_v8  ;;  %v2627_v11 = vmul.f32 0.5, %v8023_v8  ;;  %v8031_v12 = vadd.f32 %v7969_v40, %v2553_v10  ;;  %v2555_v13 = vpop.f32.mrb[47].mxu1  ;;  %v6504_v14 = vpop.eup %6503 }
 0x3e7   : > { %v2649_v15 = vmul.f32 1.442695, %v2627_v11  ;;  %2596 = vst.msk [vmem:[%s7976_s18 + $0x38] sm:$0xff] %vm2179_vm0, %v8031_v12  ;;  %v2628_v16 = vmul.f32 0.5, %v8031_v12 }
 0x3e8   : > { %2691 = vrot.lane.b32.xlu1 %v6504_v14, %s7045_s0 }
 0x3e9   : > { %6509 = vpow2.f32 %v2649_v15  ;;  %v2651_v17 = vmul.f32 1.442695, %v2628_v16 }
 0x3ea   : > { %v2558_v18 = vpop.f32.mrb[48].mxu1 }
 0x3eb   : > { %v6506_v19 = vpop.eup %6505  ;;  %6511 = vpow2.f32 %v2651_v17  ;;  %v8039_v20 = vadd.f32 %v7969_v40, %v2558_v18  ;;  %v2560_v21 = vpop.f32.mrb[49].mxu1 }
 0x3ec   : > { %v2561_v22 = vpop.f32.mrb[50].mxu1  ;;  %2693 = vrot.lane.b32.xlu0 %v6506_v19, %s7045_s0  ;;  %v2605_v19 = vld [vmem:[%s8114_s24] sm:$0xff] }
 0x3ed   : > { %v6508_v23 = vpop.eup %6507  ;;  %2597 = vst.msk [vmem:[%s7976_s18 + $0x40] sm:$0xff] %vm2179_vm0, %v8039_v20  ;;  %v2629_v25 = vmul.f32 0.5, %v8039_v20  ;;  %v8047_v28 = vadd.f32 %v7969_v40, %v2561_v22  ;;  %v2563_v32 = vpop.f32.mrb[51].mxu1  ;;  %v2606_v22 = vld [vmem:[%s8114_s24 + $0x8] sm:$0xff] }
 0x3ee   : > { %2695 = vrot.lane.b32.xlu1 %v6508_v23, %s7045_s0 }
 0x3ef   : > { %v2653_v33 = vmul.f32 1.442695, %v2629_v25  ;;  %2598 = vst.msk [vmem:[%s7976_s18 + $0x48] sm:$0xff] %vm2179_vm0, %v8047_v28  ;;  %v2630_v34 = vmul.f32 0.5, %v8047_v28 }
 0x3f1   : > { %6513 = vpow2.f32 %v2653_v33  ;;  %v2655_v35 = vmul.f32 1.442695, %v2630_v34 }
 0x3f2   : > { %v2566_v36 = vpop.f32.mrb[52].mxu1 }
 0x3f3   : > { %v6510_v37 = vpop.eup %6509  ;;  %6515 = vpow2.f32 %v2655_v35  ;;  %v8055_v39 = vadd.f32 %v7969_v40, %v2566_v36  ;;  %v2568_v38 = vpop.f32.mrb[53].mxu1  ;;  %v2607_v35 = vld [vmem:[%s8114_s24 + $0x10] sm:$0xff] }
 0x3f4   : > { %v2569_v31 = vpop.f32.mrb[54].mxu1  ;;  %2697 = vrot.lane.b32.xlu0 %v6510_v37, %s7045_s0  ;;  %v2608_v38 = vld [vmem:[%s8114_s24 + $0x18] sm:$0xff] }
 0x3f5   : > { %v6512_v41 = vpop.eup %6511  ;;  %2599 = vst.msk [vmem:[%s7976_s18 + $0x50] sm:$0xff] %vm2179_vm0, %v8055_v39  ;;  %v2631_v42 = vmul.f32 0.5, %v8055_v39  ;;  %v8063_v44 = vadd.f32 %v7969_v40, %v2569_v31  ;;  %v2571_v45 = vpop.f32.mrb[55].mxu1 }
 0x3f6   : > { %2699 = vrot.lane.b32.xlu1 %v6512_v41, %s7045_s0  ;;  %v2609_v45 = vld [vmem:[%s8114_s24 + $0x20] sm:$0xff] }
 0x3f7   : > { %v2657_v46 = vmul.f32 1.442695, %v2631_v42  ;;  %2600 = vst.msk [vmem:[%s7976_s18 + $0x58] sm:$0xff] %vm2179_vm0, %v8063_v44  ;;  %v2632_v47 = vmul.f32 0.5, %v8063_v44 }
 0x3f9   : > { %6517 = vpow2.f32 %v2657_v46  ;;  %v2659_v48 = vmul.f32 1.442695, %v2632_v47 }
 0x3fa   : > { %v2574_v50 = vpop.f32.mrb[56].mxu1 }
 0x3fb   : > { %v6514_v51 = vpop.eup %6513  ;;  %6519 = vpow2.f32 %v2659_v48  ;;  %v8071_v52 = vadd.f32 %v7969_v40, %v2574_v50  ;;  %v2576_v54 = vpop.f32.mrb[57].mxu1  ;;  %v2610_v48 = vld [vmem:[%s8114_s24 + $0x28] sm:$0xff] }
 0x3fc   : > { %v2577_v55 = vpop.f32.mrb[58].mxu1  ;;  %2701 = vrot.lane.b32.xlu0 %v6514_v51, %s7045_s0 }
 0x3fd   : > { %v6516_v56 = vpop.eup %6515  ;;  %2601 = vst.msk [vmem:[%s7976_s18 + $0x60] sm:$0xff] %vm2179_vm0, %v8071_v52  ;;  %v2633_v57 = vmul.f32 0.5, %v8071_v52  ;;  %v8079_v58 = vadd.f32 %v7969_v40, %v2577_v55  ;;  %v2579_v59 = vpop.f32.mrb[59].mxu1 }
 0x3fe   : > { %2703 = vrot.lane.b32.xlu1 %v6516_v56, %s7045_s0 }
 0x3ff   : > { %v2661_v61 = vmul.f32 1.442695, %v2633_v57  ;;  %2602 = vst.msk [vmem:[%s7976_s18 + $0x68] sm:$0xff] %vm2179_vm0, %v8079_v58  ;;  %v2634_v62 = vmul.f32 0.5, %v8079_v58 }
 0x401   : > { %6521 = vpow2.f32 %v2661_v61  ;;  %v2663_v63 = vmul.f32 1.442695, %v2634_v62  ;;  %v2612_v61 = vld [vmem:[%s8114_s24 + $0x38] sm:$0xff] }
 0x402   : > { %v2582_v1 = vpop.f32.mrb[60].mxu1 }
 0x403   : > { %v6518_v2 = vpop.eup %6517  ;;  %6523 = vpow2.f32 %v2663_v63  ;;  %v8087_v3 = vadd.f32 %v7969_v40, %v2582_v1  ;;  %v2584_v4 = vpop.f32.mrb[61].mxu1 }
 0x404   : > { %v2585_v5 = vpop.f32.mrb[62].mxu1  ;;  %2705 = vrot.lane.b32.xlu0 %v6518_v2, %s7045_s0 }
 0x405   : > { %v6520_v6 = vpop.eup %6519  ;;  %2603 = vst.msk [vmem:[%s7976_s18 + $0x70] sm:$0xff] %vm2179_vm0, %v8087_v3  ;;  %v2635_v7 = vmul.f32 0.5, %v8087_v3  ;;  %v8095_v9 = vadd.f32 %v7969_v40, %v2585_v5  ;;  %v2587_v10 = vpop.f32.mrb[63].mxu1  ;;  %v6496_v40 = vld [vmem:[%s9998_s10 + $0x4] ss:$8 sps:$4 sm:$0xff]  }
 0x406   : > { %2707 = vrot.lane.b32.xlu1 %v6520_v6, %s7045_s0  ;;  %2991 = vmatprep.subr.bf16.mxu1 %v6496_v40  ;;  %v2613_v5 = vld [vmem:[%s8114_s24 + $0x40] sm:$0xff]  ;;  %v2616_v40 = vld [vmem:[%s8114_s24 + $0x58] sm:$0xff] }
 0x407   : > { %v2665_v11 = vmul.f32 1.442695, %v2635_v7  ;;  %2604 = vst.msk [vmem:[%s7976_s18 + $0x78] sm:$0xff] %vm2179_vm0, %v8095_v9  ;;  %v2636_v13 = vmul.f32 0.5, %v8095_v9  ;;  %v2614_v7 = vld [vmem:[%s8114_s24 + $0x48] sm:$0xff]  ;;  %s7046_s18 = smov [#allocation5]  }
 0x409   : > { %6525 = vpow2.f32 %v2665_v11  ;;  %v2667_v14 = vmul.f32 1.442695, %v2636_v13 }
 0x40b   : > { %v6522_v15 = vpop.eup %6521  ;;  %6527 = vpow2.f32 %v2667_v14 }
 0x40c   : > { %2709 = vrot.lane.b32.xlu0 %v6522_v15, %s7045_s0  ;;  %v2615_v15 = vld [vmem:[%s8114_s24 + $0x50] sm:$0xff] }
 0x40d   : > { %v6524_v16 = vpop.eup %6523 }
 0x40e   : > { %2711 = vrot.lane.b32.xlu1 %v6524_v16, %s7045_s0 }
 0x413   : > { %v6526_v17 = vpop.eup %6525 }
 0x414   : > { %2713 = vrot.lane.b32.xlu0 %v6526_v17, %s7045_s0 }
 0x415   : > { %v6528_v18 = vpop.eup %6527 }
 0x416   : > { %2715 = vrot.lane.b32.xlu1 %v6528_v18, %s7045_s0  ;;  %s6977_s0 = sshll.u32 %s7046_s18, 4  ;;  %s6978_s0 = int_to_ptr.vmem [resolvable:$false] %s6977_s0 }
 0x417   : > { %s6979_s23 = scalar_lea.vmem %s6978_s0, 32768  ;;  %p6980_p2 = scmp.lt.s32.totalorder %s9931_s26, %s6978_s0 }
 0x418   : > { %p6981_p3 = scmp.lt.s32.totalorder %s6979_s23, %s6973_s29 }
 0x41a   : > { %p6982_p4 = por %p6981_p3, %p6980_p2 }
 0x41c   : > { %p6983_p7 = pnand %p6982_p4, %p6976_p12 }
 0x44e   : > { %v2686_v21 = vpop.permute.xlu0 %2685 }
 0x44f   : > { %v2733_v23 = vmul.f32 %v2686_v21, %v2605_v19 }
 0x451   : > { %v2749_v33 = vadd.f32 %v2733_v23, %v7979_v30 }
 0x452   : > { %v2688_v25 = vpop.permute.xlu0 %2687 }
 0x453   : > { %v2734_v32 = vmul.f32 %v2688_v25, %v2606_v22  ;;  %v2617_v22 = vld [vmem:[%s8114_s24 + $0x60] sm:$0xff]  ;;  %v2618_v25 = vld [vmem:[%s8114_s24 + $0x68] sm:$0xff] }
 0x455   : > { %v2750_v34 = vadd.f32 %v2734_v32, %v7986_v43  ;;  %v6494_v43 = vld [vmem:[%s9998_s10] ss:$8 sps:$4 sm:$0xff]  }
 0x456   : > { %v2690_v36 = vpop.permute.xlu1 %2689 }
 0x457   : > { %v2765_v37 = vpack.c.bf16 %v2750_v34, %v2749_v33  ;;  %v2735_v31 = vmul.f32 %v2690_v36, %v2607_v35  ;;  %v2619_v36 = vld [vmem:[%s8114_s24 + $0x70] sm:$0xff] }
 0x459   : > { %6020 = vmatprep.mubr.msk.bf16.mxu1 %vm2796_vm1, %v2765_v37  ;;  %v2751_v46 = vadd.f32 %v2735_v31, %v7993_v49  ;;  %v2620_v31 = vld [vmem:[%s8114_s24 + $0x78] sm:$0xff] }
 0x45a   : > { %v2692_v41 = vpop.permute.xlu1 %2691 }
 0x45b   : > { %v2736_v42 = vmul.f32 %v2692_v41, %v2608_v38 }
 0x45d   : > { %v2752_v47 = vadd.f32 %v2736_v42, %v8000_v53  ;;  %v2611_v53 = vld [vmem:[%s8114_s24 + $0x30] sm:$0xff]  ;;  %s6005_s24 = sshll.u32 %s7150_s22, 14 }
 0x45e   : > { %v2694_v30 = vpop.permute.xlu0 %2693  ;;  %s9929_s22 = scalar_lea.hbm %s10002_s14, %s6005_s24 }
 0x45f   : > { %v2766_v50 = vpack.c.bf16 %v2752_v47, %v2751_v46  ;;  %v2737_v51 = vmul.f32 %v2694_v30, %v2609_v45  ;;  %v3313_v47 = vld [vmem:[#allocation2 + $0x8] sm:$0xff] }
 0x460   : > { %v2696_v54 = vpop.permute.xlu1 %2695 }
 0x461   : > { %v2738_v55 = vmul.f32 %v2696_v54, %v2610_v48  ;;  %6021 = vmatmul.mubr.msk.bf16.vlgmr.msra.gmra.mrb[64].mxu1 %vm2796_vm1, %v2766_v50  ;;  %v2753_v49 = vadd.f32 %v2737_v51, %v8007_v60  ;;  %v3325_v51 = vld [vmem:[#allocation2 + $0x68] sm:$0xff] }
 0x462   : > { %2992 = vmatpush1.bf16.msra.mxu1 %v6494_v43  ;;  %v3317_v43 = vld [vmem:[#allocation2 + $0x28] sm:$0xff] }
 0x463   : > { %v2754_v56 = vadd.f32 %v2738_v55, %v8015_v0  ;;  %v5872_v50 = vcombine.high %v3313_v47, %v3317_v43  ;;  %v3329_v55 = vld [vmem:[#allocation2 + $0x88] sm:$0xff] }
 0x465   : > { %v2767_v57 = vpack.c.bf16 %v2754_v56, %v2753_v49  ;;  %v3333_v49 = vld [vmem:[#allocation2 + $0xa8] sm:$0xff]  ;;  %4235 = vmatprep.subr.bf16.mxu0 %v5872_v50 }
 0x466   : > { %v2698_v59 = vpop.permute.xlu0 %2697 }
 0x467   : > { %v2739_v62 = vmul.f32 %v2698_v59, %v2611_v53  ;;  %6024 = vmatprep.mubr.msk.bf16.mxu1 %vm2796_vm1, %v2767_v57  ;;  %v5888_v53 = vcombine.high %v3329_v55, %v3333_v49  ;;  %v3337_v57 = vld [vmem:[#allocation2 + $0xc8] sm:$0xff] }
 0x468   : > { %v2700_v63 = vpop.permute.xlu1 %2699  ;;  %v3341_v59 = vld [vmem:[#allocation2 + $0xe8] sm:$0xff] }
 0x469   : > { %v2740_v1 = vmul.f32 %v2700_v63, %v2612_v61  ;;  %v2755_v2 = vadd.f32 %v2739_v62, %v8023_v8  ;;  %v5887_v61 = vcombine.low %v3329_v55, %v3333_v49  ;;  %v5896_v62 = vcombine.high %v3337_v57, %v3341_v59  ;;  %v3345_v63 = vld [vmem:[#allocation2 + $0x108] sm:$0xff] }
 0x46b   : > { %v2756_v4 = vadd.f32 %v2740_v1, %v8031_v12  ;;  %v3349_v1 = vld [vmem:[#allocation2 + $0x128] sm:$0xff] }
 0x46d   : > { %v2768_v6 = vpack.c.bf16 %v2756_v4, %v2755_v2  ;;  %v5895_v2 = vcombine.low %v3337_v57, %v3341_v59  ;;  %v5904_v4 = vcombine.high %v3345_v63, %v3349_v1 }
 0x46e   : > { %v2702_v60 = vpop.permute.xlu0 %2701 }
 0x46f   : > { %v2741_v0 = vmul.f32 %v2702_v60, %v2613_v5  ;;  %6025 = vmatmul.mubr.msk.bf16.gmra.mrb[68].mxu1 %vm2796_vm1, %v2768_v6  ;;  %v3353_v5 = vld [vmem:[#allocation2 + $0x148] sm:$0xff]  ;;  %v5903_v60 = vcombine.low %v3345_v63, %v3349_v1  ;;  %v3352_v63 = vld [vmem:[#allocation2 + $0x140] sm:$0xff] }
 0x470   : > { %v2704_v10 = vpop.permute.xlu1 %2703  ;;  %v3357_v6 = vld [vmem:[#allocation2 + $0x168] sm:$0xff]  ;;  %v3356_v1 = vld [vmem:[#allocation2 + $0x160] sm:$0xff] }
 0x471   : > { %v2742_v11 = vmul.f32 %v2704_v10, %v2614_v7  ;;  %v2757_v13 = vadd.f32 %v2741_v0, %v8039_v20  ;;  %v5912_v7 = vcombine.high %v3353_v5, %v3357_v6  ;;  %v3361_v0 = vld [vmem:[#allocation2 + $0x188] sm:$0xff] }
 0x472   : > { %v3365_v10 = vld [vmem:[#allocation2 + $0x1a8] sm:$0xff] }
 0x473   : > { %v2758_v14 = vadd.f32 %v2742_v11, %v8047_v28  ;;  %v5911_v11 = vcombine.low %v3353_v5, %v3357_v6  ;;  %v5910_v5 = vcombine.high %v3352_v63, %v3356_v1  ;;  %v3360_v6 = vld [vmem:[#allocation2 + $0x180] sm:$0xff] }
 0x475   : > { %v2769_v16 = vpack.c.bf16 %v2758_v14, %v2757_v13  ;;  %v5920_v13 = vcombine.high %v3361_v0, %v3365_v10  ;;  %v3369_v14 = vld [vmem:[#allocation2 + $0x1c8] sm:$0xff] }
 0x476   : > { %v2706_v8 = vpop.permute.xlu0 %2705 }
 0x477   : > { %v2743_v12 = vmul.f32 %v2706_v8, %v2615_v15  ;;  %6028 = vmatprep.mubr.msk.bf16.mxu1 %vm2796_vm1, %v2769_v16  ;;  %v3373_v15 = vld [vmem:[#allocation2 + $0x1e8] sm:$0xff]  ;;  %v5919_v16 = vcombine.low %v3361_v0, %v3365_v10  ;;  %v3368_v10 = vld [vmem:[#allocation2 + $0x1c0] sm:$0xff] }
 0x478   : > { %v2708_v17 = vpop.permute.xlu1 %2707  ;;  %v5928_v8 = vcombine.high %v3369_v14, %v3373_v15 }
 0x479   : > { %v2744_v18 = vmul.f32 %v2708_v17, %v2616_v40  ;;  %v2759_v19 = vadd.f32 %v2743_v12, %v8055_v39  ;;  %v5927_v40 = vcombine.low %v3369_v14, %v3373_v15  ;;  %v8171_v12 = vld [vmem:[%s9997_s9] ss:$0 sm:$0xff] }
 0x47b   : > { %v2760_v21 = vadd.f32 %v2744_v18, %v8063_v44 }
 0x47d   : > { %v2770_v23 = vpack.c.bf16 %v2760_v21, %v2759_v19 }
 0x47e   : > { %v2710_v20 = vpop.permute.xlu0 %2709 }
 0x47f   : > { %v2745_v28 = vmul.f32 %v2710_v20, %v2617_v22  ;;  %6029 = vmatmul.mubr.msk.bf16.gmra.mrb[72].mxu1 %vm2796_vm1, %v2770_v23 }
 0x480   : > { %v2712_v32 = vpop.permute.xlu1 %2711 }
 0x481   : > { %v2746_v33 = vmul.f32 %v2712_v32, %v2618_v25  ;;  %v2761_v34 = vadd.f32 %v2745_v28, %v8071_v52  ;;  %v8160_v52 = vld [vmem:[#allocation2] sm:$0xff] }
 0x483   : > { %v2762_v35 = vadd.f32 %v2746_v33, %v8079_v58  ;;  %v8162_v58 = vld [vmem:[#allocation2 + $0x20] sm:$0xff] }
 0x484   : > { %v5869_v30 = vcombine.low %v8160_v52, %v8162_v58  ;;  %v5870_v48 = vcombine.high %v8160_v52, %v8162_v58  ;;  %v3320_v33 = vld [vmem:[#allocation2 + $0x40] sm:$0xff] }
 0x485   : > { %v2771_v37 = vpack.c.bf16 %v2762_v35, %v2761_v34  ;;  %v3324_v34 = vld [vmem:[#allocation2 + $0x60] sm:$0xff] }
 0x486   : > { %v2714_v38 = vpop.permute.xlu0 %2713  ;;  %4122 = vmatprep.subr.bf16.mxu1 %v5870_v48  ;;  %v3344_v58 = vld [vmem:[#allocation2 + $0x100] sm:$0xff] }
 0x487   : > { %v2747_v39 = vmul.f32 %v2714_v38, %v2619_v36  ;;  %6032 = vmatprep.mubr.msk.bf16.mxu1 %vm2796_vm1, %v2771_v37 }
 0x488   : > { %v2716_v44 = vpop.permute.xlu1 %2715 }
 0x489   : > { %v2748_v41 = vmul.f32 %v2716_v44, %v2620_v31  ;;  %v2763_v42 = vadd.f32 %v2747_v39, %v8087_v3  ;;  %v5871_v3 = vcombine.low %v3313_v47, %v3317_v43  ;;  %v5878_v31 = vcombine.high %v3320_v33, %v3324_v34  ;;  %v3328_v39 = vld [vmem:[#allocation2 + $0x80] sm:$0xff] }
 0x48a   : > { %v3332_v44 = vld [vmem:[#allocation2 + $0xa0] sm:$0xff] }
 0x48b   : > { %v2764_v45 = vadd.f32 %v2748_v41, %v8095_v9  ;;  %v3321_v9 = vld [vmem:[#allocation2 + $0x48] sm:$0xff]  ;;  %4236 = vmatpush1.bf16.msra.mxu0 %v5871_v3  ;;  %v5877_v41 = vcombine.low %v3320_v33, %v3324_v34  ;;  %v5885_v3 = vcombine.low %v3328_v39, %v3332_v44 }
 0x48c   : > { %v5880_v54 = vcombine.high %v3321_v9, %v3325_v51  ;;  %v5879_v56 = vcombine.low %v3321_v9, %v3325_v51 }
 0x48d   : > { %v2772_v46 = vpack.c.bf16 %v2764_v45, %v2763_v42  ;;  %v5886_v42 = vcombine.high %v3328_v39, %v3332_v44  ;;  %v3336_v45 = vld [vmem:[#allocation2 + $0xc0] sm:$0xff] }
 0x48e   : > { %4237 = vmatprep.subr.bf16.mxu0 %v5880_v54 }
 0x48f   : > { %6033 = vmatmul.mubr.msk.bf16.gmra.mrb[76].mxu1 %vm2796_vm1, %v2772_v46  ;;  %4238 = vmatpush1.bf16.msra.mxu0 %v5879_v56  ;;  %v3340_v46 = vld [vmem:[#allocation2 + $0xe0] sm:$0xff] }
 0x490   : > { %3023 = vmatprep.mubr.bf16.mxu1 %v7044_v24  ;;  %4239 = vmatprep.subr.bf16.mxu0 %v5888_v53  ;;  %v5894_v51 = vcombine.high %v3336_v45, %v3340_v46  ;;  %v5893_v53 = vcombine.low %v3336_v45, %v3340_v46 }
 0x493   : > { %4240 = vmatpush1.bf16.msra.mxu0 %v5887_v61 }
 0x494   : > { %4241 = vmatprep.subr.bf16.mxu0 %v5896_v62 }
 0x497   : > { %4242 = vmatpush1.bf16.msra.mxu0 %v5895_v2 }
 0x498   : > { %4243 = vmatprep.subr.bf16.mxu0 %v5904_v4 }
 0x49b   : > { %4244 = vmatpush1.bf16.msra.mxu0 %v5903_v60  ;;  %v3364_v60 = vld [vmem:[#allocation2 + $0x1a0] sm:$0xff] }
 0x49c   : > { %4245 = vmatprep.subr.bf16.mxu0 %v5912_v7  ;;  %v5909_v7 = vcombine.low %v3352_v63, %v3356_v1  ;;  %v5918_v0 = vcombine.high %v3360_v6, %v3364_v60  ;;  %v3397_v1 = vld [vmem:[#allocation2 + $0x2a8] sm:$0xff] }
 0x49f   : > { %4246 = vmatpush1.bf16.msra.mxu0 %v5911_v11  ;;  %v3372_v11 = vld [vmem:[#allocation2 + $0x1e0] sm:$0xff] }
 0x4a0   : > { %4247 = vmatprep.subr.bf16.mxu0 %v5920_v13 }
 0x4a3   : > { %4248 = vmatpush1.bf16.msra.mxu0 %v5919_v16  ;;  %v5917_v16 = vcombine.low %v3360_v6, %v3364_v60  ;;  %v3400_v6 = vld [vmem:[#allocation2 + $0x2c0] sm:$0xff] }
 0x4a4   : > { %4249 = vmatprep.subr.bf16.mxu0 %v5928_v8  ;;  %v3404_v60 = vld [vmem:[#allocation2 + $0x2e0] sm:$0xff] }
 0x4a7   : > { %4250 = vmatpush1.bf16.msra.mxu0 %v5927_v40 }
 0x534   : > { %v6022_v17 = vpop.f32.mrb[64].mxu1 }
 0x535   : > { %v2864_v18 = vadd.f32 %v6022_v17, %v8171_v12  ;;  %v2855_v19 = vpop.f32.mrb[65].mxu1  ;;  %v5926_v17 = vcombine.high %v3368_v10, %v3372_v11 }
 0x536   : > { %v2856_v21 = vadd.f32 %v8171_v12, %v2855_v19  ;;  %v6023_v22 = vpop.f32.mrb[66].mxu1 }
 0x537   : > { %v2867_v23 = vadd.f32 %v6023_v22, %v8171_v12  ;;  %v2858_v20 = vpop.f32.mrb[67].mxu1  ;;  %v2920_v28 = vmax.f32 %v2864_v18, 0.0 }
 0x538   : > { %v2859_v25 = vadd.f32 %v8171_v12, %v2858_v20  ;;  %v2918_v35 = vmax.f32 %v2856_v21, 0.0  ;;  %v5925_v20 = vcombine.low %v3368_v10, %v3372_v11  ;;  %v3405_v10 = vld [vmem:[#allocation2 + $0x2e8] sm:$0xff]  ;;  %v5957_v11 = vcombine.low %v3400_v6, %v3404_v60 }
 0x539   : > { %v2921_v32 = vmax.f32 %v2867_v23, 0.0 }
 0x53a   : > { %v2919_v36 = vmax.f32 %v2859_v25, 0.0 }
 0x53b   : > { %v2935_v37 = vpack.c.bf16 %v2921_v32, %v2920_v28 }
 0x53c   : > { %v2934_v38 = vpack.c.bf16 %v2919_v36, %v2918_v35 }
 0x53e   : > { %5829 = vmatmul.mubr.msk.bf16.vlgmr.msra.gmra.mrb[80].mxu1 %vm2966_vm2, %v2934_v38 }
 0x53f   : > { %3033 = vmatprep.mubr.bf16.mxu1 %v7044_v24  ;;  %4123 = vmatpush1.bf16.msra.mxu1 %v5869_v30  ;;  %v3348_v30 = vld [vmem:[#allocation2 + $0x120] sm:$0xff] }
 0x540   : > { %4124 = vmatprep.subr.bf16.mxu1 %v5878_v31  ;;  %v5902_v61 = vcombine.high %v3344_v58, %v3348_v30  ;;  %v5901_v4 = vcombine.low %v3344_v58, %v3348_v30  ;;  %v3384_v58 = vld [vmem:[#allocation2 + $0x240] sm:$0xff] }
 0x541   : > { %v3388_v30 = vld [vmem:[#allocation2 + $0x260] sm:$0xff] }
 0x542   : > { %v6026_v47 = vpop.f32.mrb[68].mxu1 }
 0x543   : > { %v2880_v48 = vadd.f32 %v6026_v47, %v8171_v12  ;;  %v2871_v43 = vpop.f32.mrb[69].mxu1  ;;  %4125 = vmatpush1.bf16.msra.mxu1 %v5877_v41 }
 0x544   : > { %v2872_v50 = vadd.f32 %v8171_v12, %v2871_v43  ;;  %v6027_v9 = vpop.f32.mrb[70].mxu1  ;;  %4126 = vmatprep.subr.bf16.mxu1 %v5886_v42  ;;  %v3376_v43 = vld [vmem:[#allocation2 + $0x200] sm:$0xff] }
 0x545   : > { %v2883_v54 = vadd.f32 %v6027_v9, %v8171_v12  ;;  %v2874_v52 = vpop.f32.mrb[71].mxu1  ;;  %v2924_v49 = vmax.f32 %v2880_v48, 0.0  ;;  %v3381_v9 = vld [vmem:[#allocation2 + $0x228] sm:$0xff] }
 0x546   : > { %v2875_v55 = vadd.f32 %v8171_v12, %v2874_v52  ;;  %5830 = vmatmul.mubr.msk.bf16.gmra.mrb[84].mxu1 %vm2966_vm2, %v2935_v37  ;;  %v2922_v57 = vmax.f32 %v2872_v50, 0.0  ;;  %v3377_v50 = vld [vmem:[#allocation2 + $0x208] sm:$0xff] }
 0x547   : > { %v2925_v56 = vmax.f32 %v2883_v54, 0.0  ;;  %3043 = vmatprep.mubr.bf16.mxu1 %v7044_v24  ;;  %4127 = vmatpush1.bf16.msra.mxu1 %v5885_v3  ;;  %v3380_v3 = vld [vmem:[#allocation2 + $0x220] sm:$0xff]  ;;  %v5935_v54 = vcombine.low %v3377_v50, %v3381_v9  ;;  %v5936_v52 = vcombine.high %v3377_v50, %v3381_v9  ;;  %v8209_v9 = vld [vmem:[#allocation2 + $0x30] sm:$0xff] }
 0x548   : > { %v2923_v59 = vmax.f32 %v2875_v55, 0.0  ;;  %4128 = vmatprep.subr.bf16.mxu1 %v5894_v51  ;;  %v5933_v51 = vcombine.low %v3376_v43, %v3380_v3  ;;  %v3385_v55 = vld [vmem:[#allocation2 + $0x248] sm:$0xff] }
 0x549   : > { %v2937_v62 = vpack.c.bf16 %v2925_v56, %v2924_v49  ;;  %4251 = vmatprep.subr.bf16.mxu0 %v5936_v52  ;;  %v5942_v49 = vcombine.high %v3384_v58, %v3388_v30  ;;  %v3389_v56 = vld [vmem:[#allocation2 + $0x268] sm:$0xff]  ;;  %v3319_v52 = vld [vmem:[#allocation2 + $0x38] sm:$0xff] }
 0x54a   : > { %v2936_v2 = vpack.c.bf16 %v2923_v59, %v2922_v57  ;;  %4252 = vmatpush1.bf16.msra.mxu0 %v5935_v54  ;;  %v5944_v57 = vcombine.high %v3385_v55, %v3389_v56  ;;  %v3392_v59 = vld [vmem:[#allocation2 + $0x280] sm:$0xff] }
 0x54b   : > { %4129 = vmatpush1.bf16.msra.mxu1 %v5893_v53  ;;  %v5943_v53 = vcombine.low %v3385_v55, %v3389_v56 }
 0x54c   : > { %4130 = vmatprep.subr.bf16.mxu1 %v5902_v61  ;;  %4253 = vmatprep.subr.bf16.mxu0 %v5944_v57  ;;  %v3396_v61 = vld [vmem:[#allocation2 + $0x2a0] sm:$0xff] }
 0x54d   : > { %v5950_v63 = vcombine.high %v3392_v59, %v3396_v61 }
 0x54e   : > { %5831 = vmatmul.mubr.msk.bf16.gmra.mrb[88].mxu1 %vm2966_vm2, %v2936_v2  ;;  %4254 = vmatpush1.bf16.msra.mxu0 %v5943_v53  ;;  %v5949_v2 = vcombine.low %v3392_v59, %v3396_v61 }
 0x54f   : > { %3053 = vmatprep.mubr.bf16.mxu1 %v7044_v24  ;;  %4131 = vmatpush1.bf16.msra.mxu1 %v5901_v4 }
 0x550   : > { %4132 = vmatprep.subr.bf16.mxu1 %v5910_v5 }
 0x552   : > { %v6030_v13 = vpop.f32.mrb[72].mxu1 }
 0x553   : > { %v2896_v14 = vadd.f32 %v6030_v13, %v8171_v12  ;;  %v2887_v15 = vpop.f32.mrb[73].mxu1  ;;  %4133 = vmatpush1.bf16.msra.mxu1 %v5909_v7  ;;  %v3401_v7 = vld [vmem:[#allocation2 + $0x2c8] sm:$0xff] }
 0x554   : > { %v2888_v8 = vadd.f32 %v8171_v12, %v2887_v15  ;;  %v6031_v40 = vpop.f32.mrb[74].mxu1  ;;  %4134 = vmatprep.subr.bf16.mxu1 %v5918_v0  ;;  %v5958_v0 = vcombine.high %v3400_v6, %v3404_v60  ;;  %v5959_v13 = vcombine.low %v3401_v7, %v3405_v10  ;;  %v3408_v15 = vld [vmem:[#allocation2 + $0x300] sm:$0xff] }
 0x555   : > { %v2899_v18 = vadd.f32 %v6031_v40, %v8171_v12  ;;  %v2890_v19 = vpop.f32.mrb[75].mxu1  ;;  %v2928_v22 = vmax.f32 %v2896_v14, 0.0  ;;  %v5960_v14 = vcombine.high %v3401_v7, %v3405_v10 }
 0x556   : > { %v2891_v21 = vadd.f32 %v8171_v12, %v2890_v19  ;;  %5832 = vmatmul.mubr.msk.bf16.gmra.mrb[92].mxu1 %vm2966_vm2, %v2937_v62  ;;  %v2926_v25 = vmax.f32 %v2888_v8, 0.0  ;;  %v3393_v62 = vld [vmem:[#allocation2 + $0x288] sm:$0xff] }
 0x557   : > { %v2929_v23 = vmax.f32 %v2899_v18, 0.0  ;;  %3063 = vmatprep.mubr.bf16.mxu1 %v7044_v24  ;;  %4135 = vmatpush1.bf16.msra.mxu1 %v5917_v16  ;;  %v5951_v4 = vcombine.low %v3393_v62, %v3397_v1  ;;  %v5952_v5 = vcombine.high %v3393_v62, %v3397_v1  ;;  %v3412_v16 = vld [vmem:[#allocation2 + $0x320] sm:$0xff]  ;;  %v3409_v8 = vld [vmem:[#allocation2 + $0x308] sm:$0xff] }
 0x558   : > { %v2927_v28 = vmax.f32 %v2891_v21, 0.0  ;;  %4136 = vmatprep.subr.bf16.mxu1 %v5926_v17  ;;  %v5966_v40 = vcombine.high %v3408_v15, %v3412_v16  ;;  %v3413_v17 = vld [vmem:[#allocation2 + $0x328] sm:$0xff]  ;;  %v5965_v18 = vcombine.low %v3408_v15, %v3412_v16 }
 0x559   : > { %v2939_v32 = vpack.c.bf16 %v2929_v23, %v2928_v22  ;;  %4255 = vmatprep.subr.bf16.mxu0 %v5952_v5  ;;  %v5967_v19 = vcombine.low %v3409_v8, %v3413_v17  ;;  %v5968_v21 = vcombine.high %v3409_v8, %v3413_v17  ;;  %v3416_v22 = vld [vmem:[#allocation2 + $0x340] sm:$0xff] }
 0x55a   : > { %v2938_v33 = vpack.c.bf16 %v2927_v28, %v2926_v25  ;;  %4256 = vmatpush1.bf16.msra.mxu0 %v5951_v4  ;;  %v3420_v23 = vld [vmem:[#allocation2 + $0x360] sm:$0xff]  ;;  %v3421_v28 = vld [vmem:[#allocation2 + $0x368] sm:$0xff] }
 0x55b   : > { %4137 = vmatpush1.bf16.msra.mxu1 %v5925_v20  ;;  %4257 = vmatprep.subr.bf16.mxu0 %v5960_v14  ;;  %v3417_v20 = vld [vmem:[#allocation2 + $0x348] sm:$0xff]  ;;  %v5974_v25 = vcombine.high %v3416_v22, %v3420_v23 }
 0x55e   : > { %5833 = vmatmul.mubr.msk.bf16.gmra.mrb[96].mxu1 %vm2966_vm2, %v2938_v33  ;;  %4258 = vmatpush1.bf16.msra.mxu0 %v5959_v13  ;;  %v5975_v33 = vcombine.low %v3417_v20, %v3421_v28 }
 0x55f   : > { %3073 = vmatprep.mubr.bf16.mxu1 %v7044_v24  ;;  %4259 = vmatprep.subr.bf16.mxu0 %v5968_v21 }
 0x562   : > { %v6034_v34 = vpop.f32.mrb[76].mxu1  ;;  %4260 = vmatpush1.bf16.msra.mxu0 %v5967_v19 }
 0x563   : > { %v2912_v35 = vadd.f32 %v6034_v34, %v8171_v12  ;;  %v2903_v36 = vpop.f32.mrb[77].mxu1  ;;  %v5976_v34 = vcombine.high %v3417_v20, %v3421_v28 }
 0x564   : > { %v2904_v37 = vadd.f32 %v8171_v12, %v2903_v36  ;;  %v6035_v38 = vpop.f32.mrb[78].mxu1  ;;  %v3428_v36 = vld [vmem:[#allocation2 + $0x3a0] sm:$0xff] }
 0x565   : > { %v2915_v31 = vadd.f32 %v6035_v38, %v8171_v12  ;;  %v2906_v39 = vpop.f32.mrb[79].mxu1  ;;  %v2932_v41 = vmax.f32 %v2912_v35, 0.0  ;;  %4261 = vmatprep.subr.bf16.mxu0 %v5976_v34  ;;  %v3424_v35 = vld [vmem:[#allocation2 + $0x380] sm:$0xff] }
 0x566   : > { %v2907_v44 = vadd.f32 %v8171_v12, %v2906_v39  ;;  %5834 = vmatmul.mubr.msk.bf16.gmra.mrb[100].mxu1 %vm2966_vm2, %v2939_v32  ;;  %v2930_v45 = vmax.f32 %v2904_v37, 0.0  ;;  %v5934_v12 = vcombine.high %v3376_v43, %v3380_v3  ;;  %v5973_v32 = vcombine.low %v3416_v22, %v3420_v23  ;;  %v3425_v37 = vld [vmem:[#allocation2 + $0x388] sm:$0xff]  ;;  %4262 = vmatpush1.bf16.msra.mxu0 %v5975_v33 }
 0x567   : > { %v2933_v42 = vmax.f32 %v2915_v31, 0.0  ;;  %3083 = vmatprep.mubr.bf16.mxu1 %v7044_v24  ;;  %v5982_v38 = vcombine.high %v3424_v35, %v3428_v36  ;;  %v3429_v31 = vld [vmem:[#allocation2 + $0x3a8] sm:$0xff]  ;;  %v5981_v39 = vcombine.low %v3424_v35, %v3428_v36 }
 0x568   : > { %v2931_v46 = vmax.f32 %v2907_v44, 0.0  ;;  %4138 = vmatprep.subr.bf16.mxu1 %v5934_v12  ;;  %v5983_v44 = vcombine.low %v3425_v37, %v3429_v31  ;;  %v8207_v12 = vld [vmem:[#allocation2 + $0x10] sm:$0xff] }
 0x569   : > { %v2941_v47 = vpack.c.bf16 %v2933_v42, %v2932_v41  ;;  %4139 = vmatpush1.bf16.msra.mxu1 %v5933_v51  ;;  %v5984_v41 = vcombine.high %v3425_v37, %v3429_v31  ;;  %v3432_v42 = vld [vmem:[#allocation2 + $0x3c0] sm:$0xff]  ;;  %v3315_v51 = vld [vmem:[#allocation2 + $0x18] sm:$0xff]  ;;  %v5874_v54 = vcombine.high %v8207_v12, %v8209_v9 }
 0x56a   : > { %v2940_v48 = vpack.c.bf16 %v2931_v46, %v2930_v45  ;;  %4140 = vmatprep.subr.bf16.mxu1 %v5942_v49  ;;  %v3436_v45 = vld [vmem:[#allocation2 + $0x3e0] sm:$0xff]  ;;  %v3433_v46 = vld [vmem:[#allocation2 + $0x3c8] sm:$0xff]  ;;  %v8217_v55 = vcombine.high %v3315_v51, %v3319_v52 }
 0x56b   : > { %4263 = vmatprep.subr.bf16.mxu0 %v5984_v41  ;;  %v5989_v43 = vcombine.low %v3432_v42, %v3436_v45  ;;  %v2944_v49 = vld [vmem:[%s9999_s11] sm:$0x3] }
 0x56c   : > { %4264 = vmatpush1.bf16.msra.mxu0 %v5983_v44  ;;  %v8224_v56 = vrot.slane %v2944_v49, %v7809_v27  ;;  %v3435_v27 = vld [vmem:[#allocation2 + $0x3d8] sm:$0xff] }
 0x56e   : > { %5835 = vmatmul.mubr.msk.bf16.gmra.mrb[104].mxu1 %vm2966_vm2, %v2940_v48  ;;  %v3437_v48 = vld [vmem:[#allocation2 + $0x3e8] sm:$0xff] }
 0x56f   : > { %3093 = vmatprep.mubr.bf16.mxu1 %v7044_v24  ;;  %v5941_v24 = vcombine.low %v3384_v58, %v3388_v30  ;;  %v5991_v3 = vcombine.low %v3433_v46, %v3437_v48  ;;  %v5992_v50 = vcombine.high %v3433_v46, %v3437_v48  ;;  %v5873_v58 = vcombine.low %v8207_v12, %v8209_v9  ;;  %v3339_v9 = vld [vmem:[#allocation2 + $0xd8] sm:$0xff] }
 0x570   : > { %v8215_v30 = vcombine.low %v3315_v51, %v3319_v52 }
 0x571   : > { %4141 = vmatpush1.bf16.msra.mxu1 %v5941_v24  ;;  %4265 = vmatprep.subr.bf16.mxu0 %v5992_v50  ;;  %v8227_v24 = vrot.slane %v2944_v49, %v7815_v29  ;;  %v3438_v29 = vld [vmem:[#allocation2 + $0x3f0] sm:$0xff] }
 0x572   : > { %4142 = vmatprep.subr.bf16.mxu1 %v5950_v63  ;;  %4266 = vmatpush1.bf16.msra.mxu0 %v5991_v3 }
 0x573   : > { %4461 = vmatprep.subr.bf16.mxu0 %v8217_v55 }
 0x575   : > { %4143 = vmatpush1.bf16.msra.mxu1 %v5949_v2 }
 0x576   : > { %5836 = vmatmul.mubr.msk.bf16.gmra.mrb[108].mxu1 %vm2966_vm2, %v2941_v47  ;;  %4144 = vmatprep.subr.bf16.mxu1 %v5958_v0  ;;  %v5990_v47 = vcombine.high %v3432_v42, %v3436_v45 }
 0x579   : > { %4145 = vmatpush1.bf16.msra.mxu1 %v5957_v11 }
 0x57a   : > { %4146 = vmatprep.subr.bf16.mxu1 %v5966_v40 }
 0x57d   : > { %4147 = vmatpush1.bf16.msra.mxu1 %v5965_v18 }
 0x57e   : > { %4148 = vmatprep.subr.bf16.mxu1 %v5974_v25 }
 0x581   : > { %4149 = vmatpush1.bf16.msra.mxu1 %v5973_v32 }
 0x582   : > { %4150 = vmatprep.subr.bf16.mxu1 %v5982_v38 }
 0x585   : > { %4151 = vmatpush1.bf16.msra.mxu1 %v5981_v39 }
 0x586   : > { %4152 = vmatprep.subr.bf16.mxu1 %v5990_v47 }
 0x589   : > { %4153 = vmatpush1.bf16.msra.mxu1 %v5989_v43 }
 0x58a   : > { %4348 = vmatprep.subr.bf16.mxu1 %v5874_v54 }
 0x611   : > { %v3025_v53 = vpop.f32.mrb[80].mxu1 }
 0x612   : > { %v3026_v57 = vadd.f32 %v3025_v53, %v8224_v56  ;;  %v3027_v59 = vpop.f32.mrb[81].mxu1 }
 0x613   : > { %v3028_v61 = vadd.f32 %v3027_v59, %v8227_v24  ;;  %v3029_v62 = vpop.f32.mrb[82].mxu1 }
 0x614   : > { %v5837_v63 = vmul.f32 -1.442695, %v3026_v57  ;;  %v3030_v1 = vadd.f32 %v3029_v62, %v8224_v56  ;;  %v3031_v2 = vpop.f32.mrb[83].mxu1 }
 0x615   : > { %v5838_v4 = vmul.f32 -1.442695, %v3028_v61  ;;  %v3032_v5 = vadd.f32 %v3031_v2, %v8227_v24 }
 0x616   : > { %6529 = vpow2.f32 %v5837_v63  ;;  %v5839_v6 = vmul.f32 -1.442695, %v3030_v1 }
 0x617   : > { %6531 = vpow2.f32 %v5838_v4  ;;  %v5840_v60 = vmul.f32 -1.442695, %v3032_v5 }
 0x618   : > { %6533 = vpow2.f32 %v5839_v6 }
 0x619   : > { %6535 = vpow2.f32 %v5840_v60  ;;  %v3035_v7 = vpop.f32.mrb[84].mxu1  ;;  %v8245_v60 = vld [vmem:[#allocation2 + $0x50] sm:$0xff] }
 0x61a   : > { %v3036_v0 = vadd.f32 %v3035_v7, %v8224_v56  ;;  %v3037_v10 = vpop.f32.mrb[85].mxu1  ;;  %v8247_v7 = vld [vmem:[#allocation2 + $0x70] sm:$0xff] }
 0x61b   : > { %v3038_v11 = vadd.f32 %v3037_v10, %v8227_v24  ;;  %v3039_v13 = vpop.f32.mrb[86].mxu1 }
 0x61c   : > { %v5841_v14 = vmul.f32 -1.442695, %v3036_v0  ;;  %v3040_v15 = vadd.f32 %v3039_v13, %v8224_v56  ;;  %v3041_v16 = vpop.f32.mrb[87].mxu1  ;;  %v3327_v13 = vld [vmem:[#allocation2 + $0x78] sm:$0xff] }
 0x61d   : > { %v5842_v8 = vmul.f32 -1.442695, %v3038_v11  ;;  %v3042_v40 = vadd.f32 %v3041_v16, %v8227_v24  ;;  %v3323_v11 = vld [vmem:[#allocation2 + $0x58] sm:$0xff] }
 0x61e   : > { %6537 = vpow2.f32 %v5841_v14  ;;  %v5843_v17 = vmul.f32 -1.442695, %v3040_v15 }
 0x61f   : > { %6539 = vpow2.f32 %v5842_v8  ;;  %v5844_v18 = vmul.f32 -1.442695, %v3042_v40 }
 0x620   : > { %v6530_v19 = vpop.eup %6529  ;;  %6541 = vpow2.f32 %v5843_v17  ;;  %v5882_v17 = vcombine.high %v8245_v60, %v8247_v7 }
 0x621   : > { %v6532_v21 = vpop.eup %6531  ;;  %v3200_v22 = vadd.f32 1.0, %v6530_v19  ;;  %6543 = vpow2.f32 %v5844_v18  ;;  %v3045_v23 = vpop.f32.mrb[88].mxu1 }
 0x622   : > { %v6534_v20 = vpop.eup %6533  ;;  %v3201_v25 = vadd.f32 1.0, %v6532_v21  ;;  %v3046_v28 = vadd.f32 %v3045_v23, %v8224_v56  ;;  %v3047_v32 = vpop.f32.mrb[89].mxu1  ;;  %v8256_v23 = vcombine.high %v3323_v11, %v3327_v13 }
 0x623   : > { %v6536_v33 = vpop.eup %6535  ;;  %6545 = vrcp.f32 %v3200_v22  ;;  %v3202_v34 = vadd.f32 1.0, %v6534_v20  ;;  %v3048_v35 = vadd.f32 %v3047_v32, %v8227_v24  ;;  %v3049_v36 = vpop.f32.mrb[90].mxu1  ;;  %v8258_v20 = vld [vmem:[#allocation2 + $0x90] sm:$0xff] }
 0x624   : > { %6547 = vrcp.f32 %v3201_v25  ;;  %v3203_v37 = vadd.f32 1.0, %v6536_v33  ;;  %v5845_v38 = vmul.f32 -1.442695, %v3046_v28  ;;  %v3050_v31 = vadd.f32 %v3049_v36, %v8224_v56  ;;  %v3051_v39 = vpop.f32.mrb[91].mxu1  ;;  %v8267_v36 = vld [vmem:[#allocation2 + $0xb0] sm:$0xff] }
 0x625   : > { %6549 = vrcp.f32 %v3202_v34  ;;  %v5846_v44 = vmul.f32 -1.442695, %v3048_v35  ;;  %v3052_v41 = vadd.f32 %v3051_v39, %v8227_v24  ;;  %v5881_v34 = vcombine.low %v8245_v60, %v8247_v7 }
 0x626   : > { %6551 = vrcp.f32 %v3203_v37  ;;  %v5847_v42 = vmul.f32 -1.442695, %v3050_v31  ;;  %v8265_v35 = vcombine.low %v3323_v11, %v3327_v13  ;;  %v3331_v37 = vld [vmem:[#allocation2 + $0x98] sm:$0xff] }
 0x627   : > { %6553 = vpow2.f32 %v5845_v38  ;;  %v5848_v45 = vmul.f32 -1.442695, %v3052_v41  ;;  %v3335_v38 = vld [vmem:[#allocation2 + $0xb8] sm:$0xff] }
 0x628   : > { %v6538_v46 = vpop.eup %6537  ;;  %6555 = vpow2.f32 %v5846_v44 }
 0x629   : > { %v6540_v47 = vpop.eup %6539  ;;  %v3204_v48 = vadd.f32 1.0, %v6538_v46  ;;  %6557 = vpow2.f32 %v5847_v42  ;;  %v3055_v43 = vpop.f32.mrb[92].mxu1 }
 0x62a   : > { %v6542_v3 = vpop.eup %6541  ;;  %v3205_v50 = vadd.f32 1.0, %v6540_v47  ;;  %6559 = vpow2.f32 %v5848_v45  ;;  %v3056_v51 = vadd.f32 %v3055_v43, %v8224_v56  ;;  %v3057_v54 = vpop.f32.mrb[93].mxu1 }
 0x62b   : > { %v6544_v52 = vpop.eup %6543  ;;  %6561 = vrcp.f32 %v3204_v48  ;;  %v3206_v49 = vadd.f32 1.0, %v6542_v3  ;;  %v3058_v53 = vadd.f32 %v3057_v54, %v8227_v24  ;;  %v3059_v57 = vpop.f32.mrb[94].mxu1  ;;  %v8282_v54 = vld [vmem:[#allocation2 + $0xd0] sm:$0xff] }
 0x62c   : > { %6563 = vrcp.f32 %v3205_v50  ;;  %v3207_v59 = vadd.f32 1.0, %v6544_v52  ;;  %v5849_v61 = vmul.f32 -1.442695, %v3056_v51  ;;  %v3060_v62 = vadd.f32 %v3059_v57, %v8224_v56  ;;  %v3061_v63 = vpop.f32.mrb[95].mxu1  ;;  %v8284_v52 = vld [vmem:[#allocation2 + $0xf0] sm:$0xff] }
 0x62d   : > { %v6546_v1 = vpop.eup %6545  ;;  %6565 = vrcp.f32 %v3206_v49  ;;  %v5850_v2 = vmul.f32 -1.442695, %v3058_v53  ;;  %v3062_v4 = vadd.f32 %v3061_v63, %v8227_v24  ;;  %v5890_v50 = vcombine.high %v8258_v20, %v8267_v36 }
 0x62e   : > { %v6548_v5 = vpop.eup %6547  ;;  %6567 = vrcp.f32 %v3207_v59  ;;  %v5851_v6 = vmul.f32 -1.442695, %v3060_v62  ;;  %v8280_v51 = vcombine.high %v3331_v37, %v3335_v38  ;;  %v5889_v59 = vcombine.low %v8258_v20, %v8267_v36 }
 0x62f   : > { %v6550_v0 = vpop.eup %6549  ;;  %6569 = vpow2.f32 %v5849_v61  ;;  %v5852_v10 = vmul.f32 -1.442695, %v3062_v4  ;;  %v8290_v61 = vcombine.low %v3331_v37, %v3335_v38  ;;  %v5898_v4 = vcombine.high %v8282_v54, %v8284_v52 }
 0x630   : > { %v6552_v14 = vpop.eup %6551  ;;  %6571 = vpow2.f32 %v5850_v2  ;;  %v8249_v15 = vpack.c.bf16 %v6550_v0, %v6546_v1  ;;  %v5897_v2 = vcombine.low %v8282_v54, %v8284_v52 }
 0x631   : > { %v6554_v16 = vpop.eup %6553  ;;  %6573 = vpow2.f32 %v5851_v6  ;;  %v3065_v8 = vpop.f32.mrb[96].mxu1  ;;  %v8251_v40 = vpack.c.bf16 %v6552_v14, %v6548_v5 }
 0x632   : > { %v6556_v18 = vpop.eup %6555  ;;  %v3208_v19 = vadd.f32 1.0, %v6554_v16  ;;  %6575 = vpow2.f32 %v5852_v10  ;;  %v3066_v21 = vadd.f32 %v3065_v8, %v8224_v56  ;;  %v3067_v22 = vpop.f32.mrb[97].mxu1  ;;  %v8303_v10 = vld [vmem:[#allocation2 + $0x110] sm:$0xff] }
 0x633   : > { %v6558_v25 = vpop.eup %6557  ;;  %v3209_v28 = vadd.f32 1.0, %v6556_v18  ;;  %v3068_v32 = vadd.f32 %v3067_v22, %v8227_v24  ;;  %v3069_v33 = vpop.f32.mrb[98].mxu1  ;;  %4154 = vmatprep.mubr.bf16.mxu1 %v8251_v40  ;;  %4267 = vmatprep.mubr.bf16.mxu0 %v8251_v40  ;;  %v3347_v18 = vld [vmem:[#allocation2 + $0x118] sm:$0xff] }
 0x634   : > { %v6560_v31 = vpop.eup %6559  ;;  %6577 = vrcp.f32 %v3208_v19  ;;  %v3210_v39 = vadd.f32 1.0, %v6558_v25  ;;  %v5853_v44 = vmul.f32 -1.442695, %v3066_v21  ;;  %v3070_v41 = vadd.f32 %v3069_v33, %v8224_v56  ;;  %v3071_v42 = vpop.f32.mrb[99].mxu1  ;;  %4155 = vmatmul.mubr.bf16.vlgmr.msra.gmra.mrb[112].mxu1 %v8249_v15  ;;  %4268 = vmatmul.mubr.bf16.vlgmr.msra.gmra.mrb[32].mxu0 %v8249_v15  ;;  %v3351_v19 = vld [vmem:[#allocation2 + $0x138] sm:$0xff] }
 0x635   : > { %v6562_v45 = vpop.eup %6561  ;;  %6579 = vrcp.f32 %v3209_v28  ;;  %v3211_v46 = vadd.f32 1.0, %v6560_v31  ;;  %v5854_v47 = vmul.f32 -1.442695, %v3068_v32  ;;  %v3072_v48 = vadd.f32 %v3071_v42, %v8227_v24  ;;  %4349 = vmatpush1.bf16.msra.mxu1 %v5873_v58  ;;  %4462 = vmatpush1.bf16.msra.mxu0 %v8215_v30  ;;  %v3343_v58 = vld [vmem:[#allocation2 + $0xf8] sm:$0xff]  ;;  %v8324_v42 = vld [vmem:[#allocation2 + $0x170] sm:$0xff] }
 0x636   : > { %v6564_v43 = vpop.eup %6563  ;;  %6581 = vrcp.f32 %v3210_v39  ;;  %v5855_v3 = vmul.f32 -1.442695, %v3070_v41  ;;  %4350 = vmatprep.subr.bf16.mxu1 %v5882_v17  ;;  %4463 = vmatprep.subr.bf16.mxu0 %v8256_v23  ;;  %v8301_v0 = vcombine.high %v3339_v9, %v3343_v58  ;;  %v8308_v8 = vcombine.low %v3339_v9, %v3343_v58  ;;  %v8310_v17 = vld [vmem:[#allocation2 + $0x130] sm:$0xff] }
 0x637   : > { %v6566_v49 = vpop.eup %6565  ;;  %6583 = vrcp.f32 %v3211_v46  ;;  %v5856_v12 = vmul.f32 -1.442695, %v3072_v48  ;;  %v5906_v38 = vcombine.high %v8303_v10, %v8310_v17  ;;  %v8320_v31 = vcombine.high %v3347_v18, %v3351_v19  ;;  %v8322_v41 = vld [vmem:[#allocation2 + $0x150] sm:$0xff]  ;;  %v3355_v46 = vld [vmem:[#allocation2 + $0x158] sm:$0xff] }
 0x638   : > { %v6568_v53 = vpop.eup %6567  ;;  %6585 = vpow2.f32 %v5853_v44  ;;  %v8286_v57 = vpack.c.bf16 %v6566_v49, %v6562_v45  ;;  %v8331_v54 = vcombine.low %v3347_v18, %v3351_v19  ;;  %v5914_v58 = vcombine.high %v8322_v41, %v8324_v42 }
 0x639   : > { %v6570_v62 = vpop.eup %6569  ;;  %6587 = vpow2.f32 %v5854_v47  ;;  %v3075_v63 = vpop.f32.mrb[100].mxu1  ;;  %4351 = vmatpush1.bf16.msra.mxu1 %v5881_v34  ;;  %4464 = vmatpush1.bf16.msra.mxu0 %v8265_v35  ;;  %v8293_v1 = vpack.c.bf16 %v6568_v53, %v6564_v43  ;;  %v3359_v47 = vld [vmem:[#allocation2 + $0x178] sm:$0xff] }
 0x63a   : > { %v6572_v5 = vpop.eup %6571  ;;  %v3212_v6 = vadd.f32 1.0, %v6570_v62  ;;  %6589 = vpow2.f32 %v5855_v3  ;;  %v3076_v60 = vadd.f32 %v3075_v63, %v8224_v56  ;;  %v3077_v7 = vpop.f32.mrb[101].mxu1  ;;  %4352 = vmatprep.subr.bf16.mxu1 %v5890_v50  ;;  %4465 = vmatprep.subr.bf16.mxu0 %v8280_v51  ;;  %v5905_v50 = vcombine.low %v8303_v10, %v8310_v17 }
 0x63b   : > { %v6574_v11 = vpop.eup %6573  ;;  %v3213_v13 = vadd.f32 1.0, %v6572_v5  ;;  %6591 = vpow2.f32 %v5856_v12  ;;  %v3078_v14 = vadd.f32 %v3077_v7, %v8227_v24  ;;  %v3079_v16 = vpop.f32.mrb[102].mxu1  ;;  %4164 = vmatprep.mubr.bf16.mxu1 %v8293_v1  ;;  %4277 = vmatprep.mubr.bf16.mxu0 %v8293_v1  ;;  %v5913_v10 = vcombine.low %v8322_v41, %v8324_v42  ;;  %v3375_v41 = vld [vmem:[#allocation2 + $0x1f8] sm:$0xff] }
 0x63c   : > { %v6576_v21 = vpop.eup %6575  ;;  %6593 = vrcp.f32 %v3212_v6  ;;  %v3214_v22 = vadd.f32 1.0, %v6574_v11  ;;  %v5857_v20 = vmul.f32 -1.442695, %v3076_v60  ;;  %v3080_v25 = vadd.f32 %v3079_v16, %v8224_v56  ;;  %v3081_v28 = vpop.f32.mrb[103].mxu1  ;;  %4165 = vmatmul.mubr.bf16.gmra.mrb[116].mxu1 %v8286_v57  ;;  %4278 = vmatmul.mubr.bf16.gmra.mrb[36].mxu0 %v8286_v57  ;;  %v8349_v11 = vld [vmem:[#allocation2 + $0x1b0] sm:$0xff] }
 0x63d   : > { %6595 = vrcp.f32 %v3213_v13  ;;  %v3215_v32 = vadd.f32 1.0, %v6576_v21  ;;  %v5858_v33 = vmul.f32 -1.442695, %v3078_v14  ;;  %v3082_v34 = vadd.f32 %v3081_v28, %v8227_v24  ;;  %4353 = vmatpush1.bf16.msra.mxu1 %v5889_v59  ;;  %4466 = vmatpush1.bf16.msra.mxu0 %v8290_v61  ;;  %v3363_v13 = vld [vmem:[#allocation2 + $0x198] sm:$0xff] }
 0x63e   : > { %v6578_v36 = vpop.eup %6577  ;;  %6597 = vrcp.f32 %v3214_v22  ;;  %v5859_v37 = vmul.f32 -1.442695, %v3080_v25  ;;  %4354 = vmatprep.subr.bf16.mxu1 %v5898_v4  ;;  %4467 = vmatprep.subr.bf16.mxu0 %v8301_v0  ;;  %v8342_v4 = vld [vmem:[#allocation2 + $0x190] sm:$0xff]  ;;  %v3367_v14 = vld [vmem:[#allocation2 + $0x1b8] sm:$0xff]  ;;  %v8355_v25 = vcombine.low %v3355_v46, %v3359_v47 }
 0x63f   : > { %v6580_v39 = vpop.eup %6579  ;;  %6599 = vrcp.f32 %v3215_v32  ;;  %v5860_v44 = vmul.f32 -1.442695, %v3082_v34  ;;  %v8360_v34 = vcombine.high %v3363_v13, %v3367_v14 }
 0x640   : > { %v6582_v45 = vpop.eup %6581  ;;  %6601 = vpow2.f32 %v5857_v20 }
 0x641   : > { %v6584_v48 = vpop.eup %6583  ;;  %6603 = vpow2.f32 %v5858_v33  ;;  %v3085_v43 = vpop.f32.mrb[104].mxu1  ;;  %4355 = vmatpush1.bf16.msra.mxu1 %v5897_v2  ;;  %4468 = vmatpush1.bf16.msra.mxu0 %v8308_v8  ;;  %v8327_v3 = vpack.c.bf16 %v6582_v45, %v6578_v36  ;;  %v8340_v2 = vcombine.high %v3355_v46, %v3359_v47  ;;  %v5922_v33 = vcombine.high %v8342_v4, %v8349_v11  ;;  %v8362_v36 = vld [vmem:[#allocation2 + $0x1d0] sm:$0xff] }
 0x642   : > { %v6586_v52 = vpop.eup %6585  ;;  %6605 = vpow2.f32 %v5859_v37  ;;  %v3086_v49 = vadd.f32 %v3085_v43, %v8224_v56  ;;  %v3087_v12 = vpop.f32.mrb[105].mxu1  ;;  %v8334_v9 = vpack.c.bf16 %v6584_v48, %v6580_v39  ;;  %4356 = vmatprep.subr.bf16.mxu1 %v5906_v38  ;;  %4469 = vmatprep.subr.bf16.mxu0 %v8320_v31  ;;  %v8364_v37 = vld [vmem:[#allocation2 + $0x1f0] sm:$0xff]  ;;  %v5921_v47 = vcombine.low %v8342_v4, %v8349_v11 }
 0x643   : > { %v6588_v53 = vpop.eup %6587  ;;  %v3216_v59 = vadd.f32 1.0, %v6586_v52  ;;  %6607 = vpow2.f32 %v5860_v44  ;;  %v3088_v62 = vadd.f32 %v3087_v12, %v8227_v24  ;;  %v3089_v63 = vpop.f32.mrb[106].mxu1  ;;  %v3371_v44 = vld [vmem:[#allocation2 + $0x1d8] sm:$0xff]  ;;  %v8370_v48 = vcombine.low %v3363_v13, %v3367_v14  ;;  %v8382_v4 = vld [vmem:[#allocation2 + $0x210] sm:$0xff] }
 0x644   : > { %v6590_v5 = vpop.eup %6589  ;;  %v3217_v6 = vadd.f32 1.0, %v6588_v53  ;;  %v3090_v60 = vadd.f32 %v3089_v63, %v8224_v56  ;;  %4174 = vmatprep.mubr.bf16.mxu1 %v8334_v9  ;;  %4287 = vmatprep.mubr.bf16.mxu0 %v8334_v9  ;;  %v3091_v7 = vpop.f32.mrb[107].mxu1  ;;  %v5861_v18 = vmul.f32 -1.442695, %v3086_v49  ;;  %v5930_v12 = vcombine.high %v8362_v36, %v8364_v37  ;;  %v8389_v11 = vld [vmem:[#allocation2 + $0x230] sm:$0xff]  ;;  %v3379_v13 = vld [vmem:[#allocation2 + $0x218] sm:$0xff] }
 0x645   : > { %v6592_v16 = vpop.eup %6591  ;;  %6609 = vrcp.f32 %v3216_v59  ;;  %v3218_v17 = vadd.f32 1.0, %v6590_v5  ;;  %v3092_v19 = vadd.f32 %v3091_v7, %v8227_v24  ;;  %4175 = vmatmul.mubr.bf16.gmra.mrb[120].mxu1 %v8327_v3  ;;  %4288 = vmatmul.mubr.bf16.gmra.mrb[40].mxu0 %v8327_v3  ;;  %v5862_v20 = vmul.f32 -1.442695, %v3088_v62  ;;  %v3383_v14 = vld [vmem:[#allocation2 + $0x238] sm:$0xff] }
 0x646   : > { %v6594_v21 = vpop.eup %6593  ;;  %6611 = vrcp.f32 %v3217_v6  ;;  %v3219_v22 = vadd.f32 1.0, %v6592_v16  ;;  %4357 = vmatpush1.bf16.msra.mxu1 %v5905_v50  ;;  %4470 = vmatpush1.bf16.msra.mxu0 %v8331_v54  ;;  %v5863_v32 = vmul.f32 -1.442695, %v3090_v60  ;;  %v8380_v63 = vcombine.high %v3371_v44, %v3375_v41 }
 0x647   : > { %v6596_v28 = vpop.eup %6595  ;;  %6613 = vrcp.f32 %v3218_v17  ;;  %4358 = vmatprep.subr.bf16.mxu1 %v5914_v58  ;;  %4471 = vmatprep.subr.bf16.mxu0 %v8340_v2  ;;  %v5864_v39 = vmul.f32 -1.442695, %v3092_v19 }
 0x648   : > { %v6598_v38 = vpop.eup %6597  ;;  %6615 = vrcp.f32 %v3219_v22  ;;  %v8395_v22 = vcombine.low %v3371_v44, %v3375_v41  ;;  %v3387_v44 = vld [vmem:[#allocation2 + $0x258] sm:$0xff] }
 0x649   : > { %v6600_v42 = vpop.eup %6599  ;;  %6617 = vpow2.f32 %v5861_v18  ;;  %v3095_v45 = vpop.f32.mrb[108].mxu1  ;;  %v8366_v46 = vpack.c.bf16 %v6598_v38, %v6594_v21  ;;  %v3391_v41 = vld [vmem:[#allocation2 + $0x278] sm:$0xff] }
 0x64a   : > { %v6602_v43 = vpop.eup %6601  ;;  %6619 = vpow2.f32 %v5862_v20  ;;  %v3096_v50 = vadd.f32 %v3095_v45, %v8224_v56  ;;  %4359 = vmatpush1.bf16.msra.mxu1 %v5913_v10  ;;  %4472 = vmatpush1.bf16.msra.mxu0 %v8355_v25  ;;  %v3097_v52 = vpop.f32.mrb[109].mxu1  ;;  %v8374_v49 = vpack.c.bf16 %v6600_v42, %v6596_v28  ;;  %v5929_v10 = vcombine.low %v8362_v36, %v8364_v37  ;;  %v3386_v37 = vld [vmem:[#allocation2 + $0x250] sm:$0xff] }
 0x64b   : > { %v6604_v58 = vpop.eup %6603  ;;  %v3220_v53 = vadd.f32 1.0, %v6602_v43  ;;  %6621 = vpow2.f32 %v5863_v32  ;;  %v3098_v59 = vadd.f32 %v3097_v52, %v8227_v24  ;;  %v3099_v62 = vpop.f32.mrb[110].mxu1  ;;  %4360 = vmatprep.subr.bf16.mxu1 %v5922_v33  ;;  %4473 = vmatprep.subr.bf16.mxu0 %v8360_v34  ;;  %v8400_v32 = vcombine.high %v3379_v13, %v3383_v14 }
 0x64c   : > { %v6606_v5 = vpop.eup %6605  ;;  %v3221_v6 = vadd.f32 1.0, %v6604_v58  ;;  %6623 = vpow2.f32 %v5864_v39  ;;  %v3100_v60 = vadd.f32 %v3099_v62, %v8224_v56  ;;  %4184 = vmatprep.mubr.bf16.mxu1 %v8374_v49  ;;  %4297 = vmatprep.mubr.bf16.mxu0 %v8374_v49  ;;  %v3101_v7 = vpop.f32.mrb[111].mxu1  ;;  %v5865_v18 = vmul.f32 -1.442695, %v3096_v50  ;;  %v3390_v39 = vld [vmem:[#allocation2 + $0x270] sm:$0xff] }
 0x64d   : > { %v6608_v16 = vpop.eup %6607  ;;  %6625 = vrcp.f32 %v3220_v53  ;;  %v3222_v17 = vadd.f32 1.0, %v6606_v5  ;;  %v3102_v19 = vadd.f32 %v3101_v7, %v8227_v24  ;;  %4185 = vmatmul.mubr.bf16.gmra.mrb[124].mxu1 %v8366_v46  ;;  %4298 = vmatmul.mubr.bf16.gmra.mrb[44].mxu0 %v8366_v46  ;;  %v5866_v21 = vmul.f32 -1.442695, %v3098_v59  ;;  %v3394_v62 = vld [vmem:[#allocation2 + $0x290] sm:$0xff]  ;;  %v3399_v7 = vld [vmem:[#allocation2 + $0x2b8] sm:$0xff] }
 0x64e   : > { %6627 = vrcp.f32 %v3221_v6  ;;  %v3223_v56 = vadd.f32 1.0, %v6608_v16  ;;  %4361 = vmatpush1.bf16.msra.mxu1 %v5921_v47  ;;  %4474 = vmatpush1.bf16.msra.mxu0 %v8370_v48  ;;  %v5867_v28 = vmul.f32 -1.442695, %v3100_v60  ;;  %v5938_v24 = vcombine.high %v8382_v4, %v8389_v11  ;;  %v3398_v60 = vld [vmem:[#allocation2 + $0x2b0] sm:$0xff] }
 0x64f   : > { %v6610_v20 = vpop.eup %6609  ;;  %6629 = vrcp.f32 %v3222_v17  ;;  %4362 = vmatprep.subr.bf16.mxu1 %v5930_v12  ;;  %4475 = vmatprep.subr.bf16.mxu0 %v8380_v63  ;;  %v5868_v36 = vmul.f32 -1.442695, %v3102_v19  ;;  %v5937_v50 = vcombine.low %v8382_v4, %v8389_v11  ;;  %v8409_v52 = vcombine.low %v3379_v13, %v3383_v14  ;;  %v3395_v4 = vld [vmem:[#allocation2 + $0x298] sm:$0xff] }
 0x650   : > { %v6612_v33 = vpop.eup %6611  ;;  %6631 = vrcp.f32 %v3223_v56  ;;  %v5946_v53 = vcombine.high %v3386_v37, %v3390_v39  ;;  %v8412_v59 = vcombine.high %v3387_v44, %v3391_v41  ;;  %v5945_v16 = vcombine.low %v3386_v37, %v3390_v39 }
 0x651   : > { %v6614_v38 = vpop.eup %6613  ;;  %6633 = vpow2.f32 %v5865_v18  ;;  %v8419_v17 = vcombine.low %v3387_v44, %v3391_v41  ;;  %v5954_v19 = vcombine.high %v3394_v62, %v3398_v60  ;;  %v8422_v56 = vcombine.high %v3395_v4, %v3399_v7 }
 0x652   : > { %v6616_v42 = vpop.eup %6615  ;;  %6635 = vpow2.f32 %v5866_v21  ;;  %4363 = vmatpush1.bf16.msra.mxu1 %v5929_v10  ;;  %4476 = vmatpush1.bf16.msra.mxu0 %v8395_v22  ;;  %v8403_v45 = vpack.c.bf16 %v6614_v38, %v6610_v20  ;;  %v3402_v21 = vld [vmem:[#allocation2 + $0x2d0] sm:$0xff]  ;;  %v5953_v44 = vcombine.low %v3394_v62, %v3398_v60  ;;  %v8429_v41 = vcombine.low %v3395_v4, %v3399_v7  ;;  %v3415_v62 = vld [vmem:[#allocation2 + $0x338] sm:$0xff] }
 0x653   : > { %v6618_v47 = vpop.eup %6617  ;;  %6637 = vpow2.f32 %v5867_v28  ;;  %v8405_v43 = vpack.c.bf16 %v6616_v42, %v6612_v33  ;;  %4364 = vmatprep.subr.bf16.mxu1 %v5938_v24  ;;  %4477 = vmatprep.subr.bf16.mxu0 %v8400_v32  ;;  %v3406_v28 = vld [vmem:[#allocation2 + $0x2f0] sm:$0xff]  ;;  %v3403_v24 = vld [vmem:[#allocation2 + $0x2d8] sm:$0xff] }
 0x654   : > { %v6620_v12 = vpop.eup %6619  ;;  %v3224_v58 = vadd.f32 1.0, %v6618_v47  ;;  %6639 = vpow2.f32 %v5868_v36  ;;  %v3407_v33 = vld [vmem:[#allocation2 + $0x2f8] sm:$0xff] }
 0x655   : > { %v6622_v5 = vpop.eup %6621  ;;  %v3225_v6 = vadd.f32 1.0, %v6620_v12  ;;  %4194 = vmatprep.mubr.bf16.mxu1 %v8405_v43  ;;  %4307 = vmatprep.mubr.bf16.mxu0 %v8405_v43  ;;  %v8432_v12 = vcombine.high %v3403_v24, %v3407_v33 }
 0x656   : > { %v6624_v10 = vpop.eup %6623  ;;  %6641 = vrcp.f32 %v3224_v58  ;;  %v3226_v11 = vadd.f32 1.0, %v6622_v5  ;;  %4195 = vmatmul.mubr.bf16.gmra.mrb[128].mxu1 %v8403_v45  ;;  %4308 = vmatmul.mubr.bf16.gmra.mrb[48].mxu0 %v8403_v45  ;;  %v3410_v58 = vld [vmem:[#allocation2 + $0x310] sm:$0xff] }
 0x657   : > { %v6626_v13 = vpop.eup %6625  ;;  %6643 = vrcp.f32 %v3225_v6  ;;  %v3227_v14 = vadd.f32 1.0, %v6624_v10  ;;  %4365 = vmatpush1.bf16.msra.mxu1 %v5937_v50  ;;  %4478 = vmatpush1.bf16.msra.mxu0 %v8409_v52  ;;  %v5962_v50 = vcombine.high %v3402_v21, %v3406_v28  ;;  %v3414_v6 = vld [vmem:[#allocation2 + $0x330] sm:$0xff]  ;;  %v3411_v10 = vld [vmem:[#allocation2 + $0x318] sm:$0xff] }
 0x658   : > { %v6628_v18 = vpop.eup %6627  ;;  %6645 = vrcp.f32 %v3226_v11  ;;  %4366 = vmatprep.subr.bf16.mxu1 %v5946_v53  ;;  %4479 = vmatprep.subr.bf16.mxu0 %v8412_v59  ;;  %v5961_v11 = vcombine.low %v3402_v21, %v3406_v28 }
 0x659   : > { %v6630_v20 = vpop.eup %6629  ;;  %6647 = vrcp.f32 %v3227_v14 }
 0x65a   : > { %v6632_v36 = vpop.eup %6631  ;;  %v8424_v38 = vpack.c.bf16 %v6630_v20, %v6626_v13  ;;  %v8439_v13 = vcombine.low %v3403_v24, %v3407_v33  ;;  %v3418_v20 = vld [vmem:[#allocation2 + $0x350] sm:$0xff]  ;;  %v5969_v24 = vcombine.low %v3410_v58, %v3414_v6  ;;  %v8449_v33 = vcombine.low %v3411_v10, %v3415_v62 }
 0x65b   : > { %v6634_v37 = vpop.eup %6633  ;;  %4367 = vmatpush1.bf16.msra.mxu1 %v5945_v16  ;;  %4480 = vmatpush1.bf16.msra.mxu0 %v8419_v17  ;;  %v8427_v39 = vpack.c.bf16 %v6632_v36, %v6628_v18  ;;  %v5970_v16 = vcombine.high %v3410_v58, %v3414_v6  ;;  %v8442_v18 = vcombine.high %v3411_v10, %v3415_v62 }
 0x65c   : > { %v6636_v42 = vpop.eup %6635  ;;  %v3228_v47 = vadd.f32 1.0, %v6634_v37  ;;  %4368 = vmatprep.subr.bf16.mxu1 %v5954_v19  ;;  %4481 = vmatprep.subr.bf16.mxu0 %v8422_v56  ;;  %v3422_v37 = vld [vmem:[#allocation2 + $0x370] sm:$0xff] }
 0x65d   : > { %v6638_v53 = vpop.eup %6637  ;;  %v3229_v5 = vadd.f32 1.0, %v6636_v42  ;;  %4204 = vmatprep.mubr.bf16.mxu1 %v8427_v39  ;;  %4317 = vmatprep.mubr.bf16.mxu0 %v8427_v39  ;;  %v3419_v42 = vld [vmem:[#allocation2 + $0x358] sm:$0xff]  ;;  %v5977_v6 = vcombine.low %v3418_v20, %v3422_v37 }
 0x65e   : > { %v6640_v60 = vpop.eup %6639  ;;  %6649 = vrcp.f32 %v3228_v47  ;;  %v3230_v4 = vadd.f32 1.0, %v6638_v53  ;;  %4205 = vmatmul.mubr.bf16.gmra.mrb[132].mxu1 %v8424_v38  ;;  %4318 = vmatmul.mubr.bf16.gmra.mrb[52].mxu0 %v8424_v38 }
 0x65f   : > { %6651 = vrcp.f32 %v3229_v5  ;;  %v3231_v7 = vadd.f32 1.0, %v6640_v60  ;;  %4369 = vmatpush1.bf16.msra.mxu1 %v5953_v44  ;;  %4482 = vmatpush1.bf16.msra.mxu0 %v8429_v41  ;;  %v3423_v44 = vld [vmem:[#allocation2 + $0x378] sm:$0xff]  ;;  %v3426_v5 = vld [vmem:[#allocation2 + $0x390] sm:$0xff] }
 0x660   : > { %v6642_v14 = vpop.eup %6641  ;;  %6653 = vrcp.f32 %v3230_v4  ;;  %4370 = vmatprep.subr.bf16.mxu1 %v5962_v50  ;;  %4483 = vmatprep.subr.bf16.mxu0 %v8432_v12  ;;  %v5978_v50 = vcombine.high %v3418_v20, %v3422_v37  ;;  %v8452_v53 = vcombine.high %v3419_v42, %v3423_v44  ;;  %v3430_v60 = vld [vmem:[#allocation2 + $0x3b0] sm:$0xff]  ;;  %v3427_v4 = vld [vmem:[#allocation2 + $0x398] sm:$0xff]  ;;  %v8459_v10 = vcombine.low %v3419_v42, %v3423_v44 }
 0x661   : > { %v6644_v19 = vpop.eup %6643  ;;  %6655 = vrcp.f32 %v3231_v7  ;;  %v3431_v7 = vld [vmem:[#allocation2 + $0x3b8] sm:$0xff]  ;;  %v5985_v37 = vcombine.low %v3426_v5, %v3430_v60 }
 0x662   : > { %v6646_v36 = vpop.eup %6645  ;;  %v8469_v42 = vcombine.low %v3427_v4, %v3431_v7 }
 0x663   : > { %v6648_v47 = vpop.eup %6647  ;;  %4371 = vmatpush1.bf16.msra.mxu1 %v5961_v11  ;;  %4484 = vmatpush1.bf16.msra.mxu0 %v8439_v13  ;;  %v8445_v21 = vpack.c.bf16 %v6646_v36, %v6642_v14  ;;  %v5986_v11 = vcombine.high %v3426_v5, %v3430_v60  ;;  %v8462_v14 = vcombine.high %v3427_v4, %v3431_v7 }
 0x664   : > { %v8447_v28 = vpack.c.bf16 %v6648_v47, %v6644_v19  ;;  %4372 = vmatprep.subr.bf16.mxu1 %v5970_v16  ;;  %4485 = vmatprep.subr.bf16.mxu0 %v8442_v18  ;;  %v3434_v19 = vld [vmem:[#allocation2 + $0x3d0] sm:$0xff] }
 0x665   : > { %v5994_v44 = vcombine.high %v3434_v19, %v3438_v29  ;;  %v5993_v5 = vcombine.low %v3434_v19, %v3438_v29  ;;  %v3452_v29 = vsub.s32 2, %v7806_v26 }
 0x666   : > { %4214 = vmatprep.mubr.bf16.mxu1 %v8447_v28  ;;  %4327 = vmatprep.mubr.bf16.mxu0 %v8447_v28 }
 0x667   : > { %4215 = vmatmul.mubr.bf16.gmra.mrb[136].mxu1 %v8445_v21  ;;  %4328 = vmatmul.mubr.bf16.gmra.mrb[56].mxu0 %v8445_v21 }
 0x668   : > { %v6650_v58 = vpop.eup %6649  ;;  %4373 = vmatpush1.bf16.msra.mxu1 %v5969_v24  ;;  %4486 = vmatpush1.bf16.msra.mxu0 %v8449_v33  ;;  %v3439_v24 = vld [vmem:[#allocation2 + $0x3f8] sm:$0xff] }
 0x669   : > { %v6652_v62 = vpop.eup %6651  ;;  %4374 = vmatprep.subr.bf16.mxu1 %v5978_v50  ;;  %4487 = vmatprep.subr.bf16.mxu0 %v8452_v53  ;;  %v8474_v50 = vcombine.high %v3435_v27, %v3439_v24  ;;  %v5995_v60 = vcombine.low %v3435_v27, %v3439_v24  ;;  %v8546_v27 = vld [vmem:[%s10001_s13] sm:$0xff] }
 0x66a   : > { %v6654_v16 = vpop.eup %6653 }
 0x66b   : > { %v6656_v36 = vpop.eup %6655  ;;  %v8464_v47 = vpack.c.bf16 %v6654_v16, %v6650_v58 }
 0x66c   : > { %4375 = vmatpush1.bf16.msra.mxu1 %v5977_v6  ;;  %4488 = vmatpush1.bf16.msra.mxu0 %v8459_v10  ;;  %v8467_v20 = vpack.c.bf16 %v6656_v36, %v6652_v62 }
 0x66d   : > { %4376 = vmatprep.subr.bf16.mxu1 %v5986_v11  ;;  %4489 = vmatprep.subr.bf16.mxu0 %v8462_v14 }
 0x66e   : > { %4224 = vmatprep.mubr.bf16.mxu1 %v8467_v20  ;;  %4337 = vmatprep.mubr.bf16.mxu0 %v8467_v20 }
 0x66f   : > { %4225 = vmatmul.mubr.bf16.gmra.mrb[140].mxu1 %v8464_v47  ;;  %4338 = vmatmul.mubr.bf16.gmra.mrb[60].mxu0 %v8464_v47 }
 0x670   : > { %4377 = vmatpush1.bf16.msra.mxu1 %v5985_v37  ;;  %4380 = vmatprep.mubr.bf16.mxu1 %v8251_v40 }
 0x671   : > { %4490 = vmatpush1.bf16.msra.mxu0 %v8469_v42  ;;  %4493 = vmatprep.mubr.bf16.mxu0 %v8251_v40 }
 0x672   : > { %4378 = vmatprep.subr.bf16.mxu1 %v5994_v44  ;;  %4491 = vmatprep.subr.bf16.mxu0 %v8474_v50 }
 0x674   : > { %4379 = vmatpush1.bf16.msra.mxu1 %v5993_v5 }
 0x675   : > { %4492 = vmatpush1.bf16.msra.mxu0 %v5995_v60  ;;  %6036 = vmatprep.subr.bf16.mxu1 %v8217_v55 }
 0x677   : > { %4381 = vmatmul.mubr.bf16.vlgmr.msra.gmra.mrb[144].mxu1 %v8249_v15 }
 0x678   : > { %4494 = vmatmul.mubr.bf16.vlgmr.msra.gmra.mrb[64].mxu0 %v8249_v15  ;;  %4390 = vmatprep.mubr.bf16.mxu1 %v8293_v1  ;;  %v10171_v15 = vld [vmem:[#allocation14_spill] sm:$0xff] }
 0x679   : > { %6052 = vmatpush1.bf16.msra.mxu1 %v8215_v30  ;;  %4503 = vmatprep.mubr.bf16.mxu0 %v8293_v1  ;;  %v10170_v30 = vld [vmem:[#allocation13_spill] sm:$0xff]  ;;  %v8555_v40 = vrot.slane %v8546_v27, %v10171_v15 }
 0x67a   : > { %6037 = vmatprep.subr.bf16.mxu1 %v8256_v23  ;;  %v8551_v55 = vrot.slane %v8546_v27, %v10170_v30  ;;  %v3456_v23 = vsub.s32 3, %v7806_v26 }
 0x67d   : > { %6053 = vmatpush1.bf16.msra.mxu1 %v8265_v35 }
 0x67e   : > { %6038 = vmatprep.subr.bf16.mxu1 %v8280_v51  ;;  %v8559_v51 = vrot.slane %v8546_v27, %v3452_v29 }
 0x67f   : > { %4391 = vmatmul.mubr.bf16.gmra.mrb[148].mxu1 %v8286_v57 }
 0x680   : > { %4504 = vmatmul.mubr.bf16.gmra.mrb[68].mxu0 %v8286_v57  ;;  %4400 = vmatprep.mubr.bf16.mxu1 %v8334_v9 }
 0x681   : > { %6054 = vmatpush1.bf16.msra.mxu1 %v8290_v61  ;;  %4513 = vmatprep.mubr.bf16.mxu0 %v8334_v9 }
 0x682   : > { %6039 = vmatprep.subr.bf16.mxu1 %v8301_v0 }
 0x685   : > { %6055 = vmatpush1.bf16.msra.mxu1 %v8308_v8 }
 0x686   : > { %6040 = vmatprep.subr.bf16.mxu1 %v8320_v31  ;;  %v8568_v31 = vrot.slane %v8546_v27, %v3456_v23 }
 0x687   : > { %4401 = vmatmul.mubr.bf16.gmra.mrb[152].mxu1 %v8327_v3 }
 0x688   : > { %4514 = vmatmul.mubr.bf16.gmra.mrb[72].mxu0 %v8327_v3  ;;  %4410 = vmatprep.mubr.bf16.mxu1 %v8374_v49 }
 0x689   : > { %6056 = vmatpush1.bf16.msra.mxu1 %v8331_v54  ;;  %4523 = vmatprep.mubr.bf16.mxu0 %v8374_v49 }
 0x68a   : > { %6041 = vmatprep.subr.bf16.mxu1 %v8340_v2 }
 0x68d   : > { %6057 = vmatpush1.bf16.msra.mxu1 %v8355_v25 }
 0x68e   : > { %6042 = vmatprep.subr.bf16.mxu1 %v8360_v34 }
 0x68f   : > { %4411 = vmatmul.mubr.bf16.gmra.mrb[156].mxu1 %v8366_v46 }
 0x690   : > { %4524 = vmatmul.mubr.bf16.gmra.mrb[76].mxu0 %v8366_v46  ;;  %4420 = vmatprep.mubr.bf16.mxu1 %v8405_v43 }
 0x691   : > { %6058 = vmatpush1.bf16.msra.mxu1 %v8370_v48  ;;  %4533 = vmatprep.mubr.bf16.mxu0 %v8405_v43 }
 0x692   : > { %6043 = vmatprep.subr.bf16.mxu1 %v8380_v63 }
 0x695   : > { %6059 = vmatpush1.bf16.msra.mxu1 %v8395_v22 }
 0x696   : > { %6044 = vmatprep.subr.bf16.mxu1 %v8400_v32 }
 0x697   : > { %4421 = vmatmul.mubr.bf16.gmra.mrb[160].mxu1 %v8403_v45 }
 0x698   : > { %4534 = vmatmul.mubr.bf16.gmra.mrb[80].mxu0 %v8403_v45  ;;  %4430 = vmatprep.mubr.bf16.mxu1 %v8427_v39 }
 0x699   : > { %6060 = vmatpush1.bf16.msra.mxu1 %v8409_v52 }
 0x69a   : > { %6045 = vmatprep.subr.bf16.mxu1 %v8412_v59 }
 0x69d   : > { %6061 = vmatpush1.bf16.msra.mxu1 %v8419_v17 }
 0x69e   : > { %6046 = vmatprep.subr.bf16.mxu1 %v8422_v56 }
 0x69f   : > { %4431 = vmatmul.mubr.bf16.gmra.mrb[164].mxu1 %v8424_v38 }
 0x6a0   : > { %4440 = vmatprep.mubr.bf16.mxu1 %v8447_v28 }
 0x6a1   : > { %6062 = vmatpush1.bf16.msra.mxu1 %v8429_v41 }
 0x6a2   : > { %6047 = vmatprep.subr.bf16.mxu1 %v8432_v12 }
 0x6a5   : > { %6063 = vmatpush1.bf16.msra.mxu1 %v8439_v13 }
 0x6a6   : > { %6048 = vmatprep.subr.bf16.mxu1 %v8442_v18 }
 0x6a7   : > { %4441 = vmatmul.mubr.bf16.gmra.mrb[168].mxu1 %v8445_v21 }
 0x6a8   : > { %4450 = vmatprep.mubr.bf16.mxu1 %v8467_v20 }
 0x6a9   : > { %6064 = vmatpush1.bf16.msra.mxu1 %v8449_v33 }
 0x6aa   : > { %6049 = vmatprep.subr.bf16.mxu1 %v8452_v53 }
 0x6ad   : > { %6065 = vmatpush1.bf16.msra.mxu1 %v8459_v10 }
 0x6ae   : > { %6050 = vmatprep.subr.bf16.mxu1 %v8462_v14 }
 0x6af   : > { %4451 = vmatmul.mubr.bf16.gmra.mrb[172].mxu1 %v8464_v47 }
 0x6b0   : > { %4543 = vmatprep.mubr.bf16.mxu1 %v8427_v39 }
 0x6b1   : > { %6066 = vmatpush1.bf16.msra.mxu1 %v8469_v42 }
 0x6b2   : > { %6051 = vmatprep.subr.bf16.mxu1 %v8474_v50 }
 0x6b5   : > { %6067 = vmatpush1.bf16.msra.mxu1 %v5995_v60 }
 0x6b8   : > { %4544 = vmatmul.mubr.bf16.vlgmr.msra.gmra.mrb[176].mxu1 %v8424_v38 }
 0x6b9   : > { %4553 = vmatprep.mubr.bf16.mxu1 %v8447_v28 }
 0x6c0   : > { %4554 = vmatmul.mubr.bf16.gmra.mrb[180].mxu1 %v8445_v21 }
 0x6c1   : > { %4563 = vmatprep.mubr.bf16.mxu1 %v8467_v20 }
 0x6c8   : > { %4564 = vmatmul.mubr.bf16.gmra.mrb[184].mxu1 %v8464_v47 }
 0x707   : > { %v4156_v35 = vpop.f32.mrb[112].mxu1  ;;  %v4269_v57 = vpop.f32.mrb[32].mxu0 }
 0x708   : > { %v8562_v61 = vadd.f32 %v4156_v35, %v8551_v55  ;;  %v4158_v1 = vpop.f32.mrb[113].mxu1  ;;  %v4271_v0 = vpop.f32.mrb[33].mxu0  ;;  %v8574_v34 = vadd.f32 %v4269_v57, %v8559_v51 }
 0x709   : > { %v8565_v8 = vadd.f32 %v4158_v1, %v8555_v40  ;;  %v4160_v3 = vpop.f32.mrb[114].mxu1  ;;  %v4273_v54 = vpop.f32.mrb[34].mxu0  ;;  %v8582_v49 = vadd.f32 %v4271_v0, %v8568_v31 }
 0x70a   : > { %v8571_v9 = vadd.f32 %v4160_v3, %v8551_v55  ;;  %v4162_v2 = vpop.f32.mrb[115].mxu1  ;;  %v4275_v25 = vpop.f32.mrb[35].mxu0  ;;  %v8588_v22 = vadd.f32 %v4273_v54, %v8559_v51 }
 0x70b   : > { %v4574_v46 = vmax.f32 %v8562_v61, %v8565_v8  ;;  %v8579_v48 = vadd.f32 %v4162_v2, %v8555_v40  ;;  %v8595_v43 = vadd.f32 %v4275_v25, %v8568_v31 }
 0x70c   : > { %10172 = vst [vmem:[#allocation13_spill] sm:$0xff] %v8571_v9  ;;  %10174 = vst [vmem:[#allocation15_spill] sm:$0xff] %v8588_v22 }
 0x70d   : > { %10173 = vst [vmem:[#allocation14_spill] sm:$0xff] %v8579_v48  ;;  %v8585_v63 = vmax.f32 %v4574_v46, %v8574_v34  ;;  %v4575_v32 = vmax.f32 %v8571_v9, %v8579_v48  ;;  %10175 = vst [vmem:[#allocation16_spill] sm:$0xff] %v8595_v43 }
 0x70f   : > { %v8598_v52 = vmax.f32 %v4575_v32, %v8588_v22  ;;  %v4166_v59 = vpop.f32.mrb[116].mxu1  ;;  %v4279_v17 = vpop.f32.mrb[36].mxu0 }
 0x710   : > { %v8601_v56 = vadd.f32 %v4166_v59, %v8551_v55  ;;  %v4168_v38 = vpop.f32.mrb[117].mxu1  ;;  %v4281_v39 = vpop.f32.mrb[37].mxu0  ;;  %v8612_v53 = vadd.f32 %v4279_v17, %v8559_v51 }
 0x711   : > { %v8606_v12 = vadd.f32 %v4168_v38, %v8555_v40  ;;  %v4170_v13 = vpop.f32.mrb[118].mxu1  ;;  %v4283_v18 = vpop.f32.mrb[38].mxu0  ;;  %v8620_v58 = vadd.f32 %v4281_v39, %v8568_v31 }
 0x712   : > { %10176 = vst [vmem:[#allocation17_spill] sm:$0xff] %v8601_v56  ;;  %v8609_v21 = vadd.f32 %v4170_v13, %v8551_v55  ;;  %v4172_v28 = vpop.f32.mrb[119].mxu1  ;;  %v4285_v33 = vpop.f32.mrb[39].mxu0  ;;  %10179 = vst [vmem:[#allocation20_spill] sm:$0xff] %v8612_v53  ;;  %v8626_v10 = vadd.f32 %v4283_v18, %v8559_v51 }
 0x713   : > { %10177 = vst [vmem:[#allocation18_spill] sm:$0xff] %v8606_v12  ;;  %v4576_v4 = vmax.f32 %v8601_v56, %v8606_v12  ;;  %v8617_v7 = vadd.f32 %v4172_v28, %v8555_v40  ;;  %10181 = vst [vmem:[#allocation22_spill] sm:$0xff] %v8620_v58  ;;  %v8633_v14 = vadd.f32 %v4285_v33, %v8568_v31 }
 0x714   : > { %10178 = vst [vmem:[#allocation19_spill] sm:$0xff] %v8609_v21  ;;  %10182 = vst [vmem:[#allocation23_spill] sm:$0xff] %v8626_v10 }
 0x715   : > { %10180 = vst [vmem:[#allocation21_spill] sm:$0xff] %v8617_v7  ;;  %v8623_v6 = vmax.f32 %v4576_v4, %v8612_v53  ;;  %v4577_v62 = vmax.f32 %v8609_v21, %v8617_v7  ;;  %10183 = vst [vmem:[#allocation24_spill] sm:$0xff] %v8633_v14 }
 0x717   : > { %v8636_v16 = vmax.f32 %v4577_v62, %v8626_v10 }
 0x718   : > { %v4176_v19 = vpop.f32.mrb[120].mxu1  ;;  %v4289_v36 = vpop.f32.mrb[40].mxu0 }
 0x719   : > { %v8641_v24 = vadd.f32 %v4176_v19, %v8551_v55  ;;  %v4178_v20 = vpop.f32.mrb[121].mxu1  ;;  %v4291_v37 = vpop.f32.mrb[41].mxu0  ;;  %v8650_v30 = vadd.f32 %v4289_v36, %v8559_v51 }
 0x71a   : > { %v8644_v42 = vadd.f32 %v4178_v20, %v8555_v40  ;;  %v4180_v44 = vpop.f32.mrb[122].mxu1  ;;  %v4293_v50 = vpop.f32.mrb[42].mxu0  ;;  %v8658_v35 = vadd.f32 %v4291_v37, %v8568_v31 }
 0x71b   : > { %v8647_v5 = vadd.f32 %v4180_v44, %v8551_v55  ;;  %v4182_v60 = vpop.f32.mrb[123].mxu1  ;;  %v4295_v29 = vpop.f32.mrb[43].mxu0  ;;  %v8664_v1 = vadd.f32 %v4293_v50, %v8559_v51 }
 0x71c   : > { %v4578_v15 = vmax.f32 %v8641_v24, %v8644_v42  ;;  %v8655_v23 = vadd.f32 %v4182_v60, %v8555_v40  ;;  %10186 = vst [vmem:[#allocation27_spill] sm:$0xff] %v8658_v35  ;;  %v8671_v54 = vadd.f32 %v4295_v29, %v8568_v31 }
 0x71d   : > { %10184 = vst [vmem:[#allocation25_spill] sm:$0xff] %v8647_v5  ;;  %10187 = vst [vmem:[#allocation28_spill] sm:$0xff] %v8664_v1 }
 0x71e   : > { %10185 = vst [vmem:[#allocation26_spill] sm:$0xff] %v8655_v23  ;;  %v8661_v57 = vmax.f32 %v4578_v15, %v8650_v30  ;;  %v4579_v0 = vmax.f32 %v8647_v5, %v8655_v23  ;;  %v10249_v5 = vmax.f32 %v8623_v6, %v8620_v58 }
 0x720   : > { %v8674_v2 = vmax.f32 %v4579_v0, %v8664_v1  ;;  %v4186_v25 = vpop.f32.mrb[124].mxu1  ;;  %v4299_v46 = vpop.f32.mrb[44].mxu0 }
 0x721   : > { %v8677_v32 = vadd.f32 %v4186_v25, %v8551_v55  ;;  %v8680_v59 = vadd.f32 %v4299_v46, %v8559_v51  ;;  %v4188_v17 = vpop.f32.mrb[125].mxu1  ;;  %v4301_v38 = vpop.f32.mrb[45].mxu0 }
 0x722   : > { %v8685_v13 = vadd.f32 %v4188_v17, %v8555_v40  ;;  %v8688_v18 = vadd.f32 %v4301_v38, %v8568_v31  ;;  %v4190_v28 = vpop.f32.mrb[126].mxu1  ;;  %v4303_v33 = vpop.f32.mrb[46].mxu0 }
 0x723   : > { %10188 = vst [vmem:[#allocation29_spill] sm:$0xff] %v8677_v32  ;;  %10189 = vst [vmem:[#allocation30_spill] sm:$0xff] %v8680_v59  ;;  %v8691_v4 = vadd.f32 %v4190_v28, %v8551_v55  ;;  %v8694_v62 = vadd.f32 %v4303_v33, %v8559_v51  ;;  %v4192_v19 = vpop.f32.mrb[127].mxu1  ;;  %v4305_v36 = vpop.f32.mrb[47].mxu0 }
 0x724   : > { %10190 = vst [vmem:[#allocation31_spill] sm:$0xff] %v8685_v13  ;;  %10191 = vst [vmem:[#allocation32_spill] sm:$0xff] %v8688_v18  ;;  %v4580_v20 = vmax.f32 %v8677_v32, %v8685_v13  ;;  %v8699_v37 = vadd.f32 %v4192_v19, %v8555_v40  ;;  %v8702_v44 = vadd.f32 %v4305_v36, %v8568_v31 }
 0x725   : > { %10192 = vst [vmem:[#allocation33_spill] sm:$0xff] %v8691_v4  ;;  %10193 = vst [vmem:[#allocation34_spill] sm:$0xff] %v8694_v62 }
 0x726   : > { %10194 = vst [vmem:[#allocation35_spill] sm:$0xff] %v8699_v37  ;;  %10195 = vst [vmem:[#allocation36_spill] sm:$0xff] %v8702_v44  ;;  %v8705_v50 = vmax.f32 %v4580_v20, %v8680_v59  ;;  %v4581_v60 = vmax.f32 %v8691_v4, %v8699_v37 }
 0x728   : > { %v8712_v15 = vmax.f32 %v4581_v60, %v8694_v62 }
 0x729   : > { %v4196_v0 = vpop.f32.mrb[128].mxu1  ;;  %v4309_v25 = vpop.f32.mrb[48].mxu0 }
 0x72a   : > { %10196 = vst [vmem:[#allocation37_spill] sm:$0xff] %v8712_v15  ;;  %v8717_v17 = vadd.f32 %v4196_v0, %v8551_v55  ;;  %v8720_v38 = vadd.f32 %v4309_v25, %v8559_v51  ;;  %v4198_v28 = vpop.f32.mrb[129].mxu1  ;;  %v4311_v33 = vpop.f32.mrb[49].mxu0 }
 0x72b   : > { %v8723_v19 = vadd.f32 %v4198_v28, %v8555_v40  ;;  %v8726_v36 = vadd.f32 %v4311_v33, %v8568_v31  ;;  %v4200_v20 = vpop.f32.mrb[130].mxu1  ;;  %v4313_v60 = vpop.f32.mrb[50].mxu0 }
 0x72c   : > { %10197 = vst [vmem:[#allocation38_spill] sm:$0xff] %v8717_v17  ;;  %10198 = vst [vmem:[#allocation39_spill] sm:$0xff] %v8720_v38  ;;  %v8729_v29 = vadd.f32 %v4200_v20, %v8551_v55  ;;  %v8732_v46 = vadd.f32 %v4313_v60, %v8559_v51  ;;  %v4202_v0 = vpop.f32.mrb[131].mxu1  ;;  %v4315_v39 = vpop.f32.mrb[51].mxu0 }
 0x72d   : > { %10199 = vst [vmem:[#allocation40_spill] sm:$0xff] %v8723_v19  ;;  %10200 = vst [vmem:[#allocation41_spill] sm:$0xff] %v8726_v36  ;;  %v4582_v25 = vmax.f32 %v8717_v17, %v8723_v19  ;;  %v8737_v3 = vadd.f32 %v4202_v0, %v8555_v40  ;;  %v8740_v28 = vadd.f32 %v4315_v39, %v8568_v31 }
 0x72e   : > { %10201 = vst [vmem:[#allocation42_spill] sm:$0xff] %v8729_v29  ;;  %10202 = vst [vmem:[#allocation43_spill] sm:$0xff] %v8732_v46 }
 0x72f   : > { %10203 = vst [vmem:[#allocation44_spill] sm:$0xff] %v8737_v3  ;;  %10204 = vst [vmem:[#allocation45_spill] sm:$0xff] %v8740_v28  ;;  %v8743_v33 = vmax.f32 %v4582_v25, %v8720_v38  ;;  %v4583_v20 = vmax.f32 %v8729_v29, %v8737_v3 }
 0x731   : > { %10205 = vst [vmem:[#allocation46_spill] sm:$0xff] %v8743_v33  ;;  %v8750_v47 = vmax.f32 %v4583_v20, %v8732_v46  ;;  %v4206_v11 = vpop.f32.mrb[132].mxu1  ;;  %v4319_v41 = vpop.f32.mrb[52].mxu0 }
 0x732   : > { %v8753_v0 = vadd.f32 %v4206_v11, %v8551_v55  ;;  %v8756_v39 = vadd.f32 %v4319_v41, %v8559_v51  ;;  %v4208_v45 = vpop.f32.mrb[133].mxu1  ;;  %v4321_v25 = vpop.f32.mrb[53].mxu0 }
 0x733   : > { %10206 = vst [vmem:[#allocation47_spill] sm:$0xff] %v8750_v47  ;;  %v8761_v3 = vadd.f32 %v4208_v45, %v8555_v40  ;;  %v8764_v60 = vadd.f32 %v4321_v25, %v8568_v31  ;;  %v4210_v20 = vpop.f32.mrb[134].mxu1  ;;  %v4323_v46 = vpop.f32.mrb[54].mxu0 }
 0x734   : > { %10207 = vst [vmem:[#allocation48_spill] sm:$0xff] %v8753_v0  ;;  %10208 = vst [vmem:[#allocation49_spill] sm:$0xff] %v8756_v39  ;;  %v8767_v29 = vadd.f32 %v4210_v20, %v8551_v55  ;;  %v8770_v11 = vadd.f32 %v4323_v46, %v8559_v51  ;;  %v4212_v41 = vpop.f32.mrb[135].mxu1  ;;  %v4325_v19 = vpop.f32.mrb[55].mxu0 }
 0x735   : > { %10209 = vst [vmem:[#allocation50_spill] sm:$0xff] %v8761_v3  ;;  %10210 = vst [vmem:[#allocation51_spill] sm:$0xff] %v8764_v60  ;;  %v4584_v17 = vmax.f32 %v8753_v0, %v8761_v3  ;;  %v8775_v38 = vadd.f32 %v4212_v41, %v8555_v40  ;;  %v8778_v45 = vadd.f32 %v4325_v19, %v8568_v31 }
 0x736   : > { %10211 = vst [vmem:[#allocation52_spill] sm:$0xff] %v8767_v29  ;;  %10212 = vst [vmem:[#allocation53_spill] sm:$0xff] %v8770_v11 }
 0x737   : > { %10213 = vst [vmem:[#allocation54_spill] sm:$0xff] %v8775_v38  ;;  %10214 = vst [vmem:[#allocation55_spill] sm:$0xff] %v8778_v45  ;;  %v8781_v25 = vmax.f32 %v4584_v17, %v8756_v39  ;;  %v4585_v20 = vmax.f32 %v8767_v29, %v8775_v38 }
 0x739   : > { %10215 = vst [vmem:[#allocation56_spill] sm:$0xff] %v8781_v25  ;;  %v8788_v28 = vmax.f32 %v4585_v20, %v8770_v11 }
 0x73a   : > { %v4216_v47 = vpop.f32.mrb[136].mxu1  ;;  %v4329_v3 = vpop.f32.mrb[56].mxu0 }
 0x73b   : > { %10216 = vst [vmem:[#allocation57_spill] sm:$0xff] %v8788_v28  ;;  %v8793_v19 = vadd.f32 %v4216_v47, %v8551_v55  ;;  %v8796_v17 = vadd.f32 %v4329_v3, %v8559_v51  ;;  %v4218_v39 = vpop.f32.mrb[137].mxu1  ;;  %v4331_v0 = vpop.f32.mrb[57].mxu0 }
 0x73c   : > { %v8799_v38 = vadd.f32 %v4218_v39, %v8555_v40  ;;  %v8802_v46 = vadd.f32 %v4331_v0, %v8568_v31  ;;  %v4220_v20 = vpop.f32.mrb[138].mxu1  ;;  %v4333_v11 = vpop.f32.mrb[58].mxu0 }
 0x73d   : > { %10217 = vst [vmem:[#allocation58_spill] sm:$0xff] %v8793_v19  ;;  %10218 = vst [vmem:[#allocation59_spill] sm:$0xff] %v8796_v17  ;;  %v8805_v29 = vadd.f32 %v4220_v20, %v8551_v55  ;;  %v8808_v41 = vadd.f32 %v4333_v11, %v8559_v51  ;;  %v4222_v47 = vpop.f32.mrb[139].mxu1  ;;  %v4335_v45 = vpop.f32.mrb[59].mxu0 }
 0x73e   : > { %10219 = vst [vmem:[#allocation60_spill] sm:$0xff] %v8799_v38  ;;  %10220 = vst [vmem:[#allocation61_spill] sm:$0xff] %v8802_v46  ;;  %v4586_v3 = vmax.f32 %v8793_v19, %v8799_v38  ;;  %v8813_v28 = vadd.f32 %v4222_v47, %v8555_v40  ;;  %v8816_v39 = vadd.f32 %v4335_v45, %v8568_v31 }
 0x73f   : > { %10221 = vst [vmem:[#allocation62_spill] sm:$0xff] %v8805_v29  ;;  %10222 = vst [vmem:[#allocation63_spill] sm:$0xff] %v8808_v41 }
 0x740   : > { %10223 = vst [vmem:[#allocation64_spill] sm:$0xff] %v8813_v28  ;;  %10224 = vst [vmem:[#allocation65_spill] sm:$0xff] %v8816_v39  ;;  %v8819_v0 = vmax.f32 %v4586_v3, %v8796_v17  ;;  %v4587_v20 = vmax.f32 %v8805_v29, %v8813_v28  ;;  %v3460_v17 = vsub.s32 4, %v7806_v26 }
 0x742   : > { %10225 = vst [vmem:[#allocation66_spill] sm:$0xff] %v8819_v0  ;;  %v8826_v60 = vmax.f32 %v4587_v20, %v8808_v41  ;;  %v4226_v25 = vpop.f32.mrb[140].mxu1  ;;  %v4339_v38 = vpop.f32.mrb[60].mxu0  ;;  %v8859_v39 = vrot.slane %v8546_v27, %v3460_v17 }
 0x743   : > { %v8829_v47 = vadd.f32 %v4226_v25, %v8551_v55  ;;  %v8832_v45 = vadd.f32 %v4339_v38, %v8559_v51  ;;  %v4228_v19 = vpop.f32.mrb[141].mxu1  ;;  %v4341_v3 = vpop.f32.mrb[61].mxu0  ;;  %v3464_v25 = vsub.s32 5, %v7806_v26 }
 0x744   : > { %10226 = vst [vmem:[#allocation67_spill] sm:$0xff] %v8826_v60  ;;  %v8838_v11 = vadd.f32 %v4228_v19, %v8555_v40  ;;  %v8841_v20 = vadd.f32 %v4341_v3, %v8568_v31  ;;  %v4230_v41 = vpop.f32.mrb[142].mxu1  ;;  %v4343_v29 = vpop.f32.mrb[62].mxu0 }
 0x745   : > { %10227 = vst [vmem:[#allocation68_spill] sm:$0xff] %v8829_v47  ;;  %10228 = vst [vmem:[#allocation69_spill] sm:$0xff] %v8832_v45  ;;  %v8845_v38 = vadd.f32 %v4230_v41, %v8551_v55  ;;  %v8848_v46 = vadd.f32 %v4343_v29, %v8559_v51  ;;  %v4232_v0 = vpop.f32.mrb[143].mxu1  ;;  %v4345_v62 = vpop.f32.mrb[63].mxu0  ;;  %v3468_v55 = vsub.s32 6, %v7806_v26  ;;  %v8868_v29 = vrot.slane %v8546_v27, %v3464_v25 }
 0x746   : > { %10229 = vst [vmem:[#allocation70_spill] sm:$0xff] %v8838_v11  ;;  %10230 = vst [vmem:[#allocation71_spill] sm:$0xff] %v8841_v20  ;;  %v4588_v28 = vmax.f32 %v8829_v47, %v8838_v11  ;;  %v8853_v19 = vadd.f32 %v4232_v0, %v8555_v40  ;;  %v8856_v3 = vadd.f32 %v4345_v62, %v8568_v31  ;;  %v3472_v40 = vsub.s32 7, %v7806_v26 }
 0x747   : > { %10231 = vst [vmem:[#allocation72_spill] sm:$0xff] %v8845_v38  ;;  %10232 = vst [vmem:[#allocation73_spill] sm:$0xff] %v8848_v46 }
 0x748   : > { %10233 = vst [vmem:[#allocation74_spill] sm:$0xff] %v8853_v19  ;;  %10234 = vst [vmem:[#allocation75_spill] sm:$0xff] %v8856_v3  ;;  %v8863_v41 = vmax.f32 %v4588_v28, %v8832_v45  ;;  %v4589_v51 = vmax.f32 %v8845_v38, %v8853_v19  ;;  %v8880_v28 = vrot.slane %v8546_v27, %v3468_v55 }
 0x74a   : > { %10235 = vst [vmem:[#allocation76_spill] sm:$0xff] %v8863_v41  ;;  %v8874_v62 = vmax.f32 %v4589_v51, %v8848_v46  ;;  %v4382_v17 = vpop.f32.mrb[144].mxu1  ;;  %v10239_v51 = vmax.f32 %v8585_v63, %v8582_v49  ;;  %v10243_v63 = vmax.f32 %v8598_v52, %v8595_v43 }
 0x74b   : > { %v8877_v0 = vadd.f32 %v4382_v17, %v8859_v39  ;;  %v4495_v45 = vpop.f32.mrb[64].mxu0  ;;  %v4384_v19 = vpop.f32.mrb[145].mxu1  ;;  %v8892_v17 = vrot.slane %v8546_v27, %v3472_v40 }
 0x74c   : > { %10236 = vst [vmem:[#allocation77_spill] sm:$0xff] %v8874_v62  ;;  %v8885_v26 = vadd.f32 %v4384_v19, %v8868_v29  ;;  %v4497_v38 = vpop.f32.mrb[65].mxu0  ;;  %v4386_v31 = vpop.f32.mrb[146].mxu1  ;;  %v8901_v3 = vadd.f32 %v4495_v45, %v8880_v28 }
 0x74d   : > { %10237 = vst [vmem:[#allocation78_spill] sm:$0xff] %v8877_v0  ;;  %v4622_v46 = vmax.f32 %v10239_v51, %v8877_v0  ;;  %v8895_v55 = vadd.f32 %v4386_v31, %v8859_v39  ;;  %v4499_v11 = vpop.f32.mrb[66].mxu0  ;;  %v4388_v47 = vpop.f32.mrb[147].mxu1  ;;  %v8909_v40 = vadd.f32 %v4497_v38, %v8892_v17 }
 0x74e   : > { %10238 = vst [vmem:[#allocation79_spill] sm:$0xff] %v8885_v26  ;;  %v8898_v25 = vadd.f32 %v4388_v47, %v8868_v29  ;;  %v4501_v19 = vpop.f32.mrb[67].mxu0  ;;  %10242 = vst [vmem:[#allocation82_spill] sm:$0xff] %v8901_v3  ;;  %v8913_v51 = vadd.f32 %v4499_v11, %v8880_v28 }
 0x74f   : > { %10240 = vst [vmem:[#allocation80_spill] sm:$0xff] %v8895_v55  ;;  %v4638_v62 = vmax.f32 %v4622_v46, %v8885_v26  ;;  %v4623_v27 = vmax.f32 %v10243_v63, %v8895_v55  ;;  %10244 = vst [vmem:[#allocation83_spill] sm:$0xff] %v8909_v40  ;;  %v8921_v52 = vadd.f32 %v4501_v19, %v8892_v17 }
 0x750   : > { %10241 = vst [vmem:[#allocation81_spill] sm:$0xff] %v8898_v25  ;;  %10245 = vst [vmem:[#allocation84_spill] sm:$0xff] %v8913_v51 }
 0x751   : > { %v4654_v31 = vmax.f32 %v4638_v62, %v8901_v3  ;;  %v4639_v47 = vmax.f32 %v4623_v27, %v8898_v25  ;;  %10246 = vst [vmem:[#allocation85_spill] sm:$0xff] %v8921_v52 }
 0x752   : > { %v4392_v20 = vpop.f32.mrb[148].mxu1 }
 0x753   : > { %v8917_v45 = vmax.f32 %v4654_v31, %v8909_v40  ;;  %v4655_v46 = vmax.f32 %v4639_v47, %v8913_v51  ;;  %v4505_v41 = vpop.f32.mrb[68].mxu0  ;;  %v4394_v60 = vpop.f32.mrb[149].mxu1  ;;  %v8924_v38 = vadd.f32 %v4392_v20, %v8859_v39 }
 0x754   : > { %v8927_v62 = vadd.f32 %v4505_v41, %v8880_v28  ;;  %v4507_v11 = vpop.f32.mrb[69].mxu0  ;;  %v4396_v63 = vpop.f32.mrb[150].mxu1 }
 0x755   : > { %10247 = vst [vmem:[#allocation86_spill] sm:$0xff] %v8924_v38  ;;  %v4686_v27 = vsub.f32 %v8562_v61, %v8917_v45  ;;  %v4734_v31 = vsub.f32 %v8565_v8, %v8917_v45  ;;  %v4798_v47 = vsub.f32 %v8574_v34, %v8917_v45  ;;  %v4862_v19 = vsub.f32 %v8582_v49, %v8917_v45  ;;  %v4509_v37 = vpop.f32.mrb[70].mxu0  ;;  %v4398_v20 = vpop.f32.mrb[151].mxu1 }
 0x756   : > { %10248 = vst [vmem:[#allocation87_spill] sm:$0xff] %v8927_v62  ;;  %v4926_v41 = vsub.f32 %v8877_v0, %v8917_v45  ;;  %v4990_v4 = vsub.f32 %v8885_v26, %v8917_v45  ;;  %v5054_v59 = vsub.f32 %v8901_v3, %v8917_v45  ;;  %v5118_v13 = vsub.f32 %v8909_v40, %v8917_v45  ;;  %v4511_v32 = vpop.f32.mrb[71].mxu0 }
 0x757   : > { %v4702_v36 = vmul.f32 1.442695, %v4686_v27  ;;  %v4750_v33 = vmul.f32 1.442695, %v4734_v31  ;;  %v4814_v44 = vmul.f32 1.442695, %v4798_v47  ;;  %v8946_v15 = vmax.f32 %v4655_v46, %v8921_v52 }
 0x758   : > { %v4878_v1 = vmul.f32 1.442695, %v4862_v19  ;;  %v4942_v23 = vmul.f32 1.442695, %v4926_v41  ;;  %v4624_v26 = vmax.f32 %v10249_v5, %v8924_v38  ;;  %v8953_v0 = vadd.f32 %v4394_v60, %v8868_v29 }
 0x759   : > { %6657 = vpow2.f32 %v4702_v36  ;;  %v5006_v3 = vmul.f32 1.442695, %v4990_v4  ;;  %v5070_v40 = vmul.f32 1.442695, %v5054_v59  ;;  %v4687_v27 = vsub.f32 %v8571_v9, %v8946_v15 }
 0x75a   : > { %6659 = vpow2.f32 %v4750_v33  ;;  %v4735_v46 = vsub.f32 %v8579_v48, %v8946_v15  ;;  %v4799_v31 = vsub.f32 %v8588_v22, %v8946_v15  ;;  %v4863_v6 = vsub.f32 %v8595_v43, %v8946_v15  ;;  %v4402_v5 = vpop.f32.mrb[152].mxu1 }
 0x75b   : > { %6661 = vpow2.f32 %v4814_v44  ;;  %v5134_v60 = vmul.f32 1.442695, %v5118_v13  ;;  %v4927_v4 = vsub.f32 %v8895_v55, %v8946_v15  ;;  %v4991_v59 = vsub.f32 %v8898_v25, %v8946_v15  ;;  %v4515_v36 = vpop.f32.mrb[72].mxu0  ;;  %v4404_v33 = vpop.f32.mrb[153].mxu1 }
 0x75c   : > { %6663 = vpow2.f32 %v4878_v1  ;;  %v4704_v47 = vmul.f32 1.442695, %v4687_v27  ;;  %v4752_v19 = vmul.f32 1.442695, %v4735_v46  ;;  %v4816_v41 = vmul.f32 1.442695, %v4799_v31 }
 0x75d   : > { %6665 = vpow2.f32 %v4942_v23  ;;  %v4880_v22 = vmul.f32 1.442695, %v4863_v6  ;;  %v4944_v48 = vmul.f32 1.442695, %v4927_v4  ;;  %v5055_v43 = vsub.f32 %v8913_v51, %v8946_v15  ;;  %v8969_v44 = vpop.f32.mrb[73].mxu0  ;;  %v8971_v13 = vpop.f32.mrb[154].mxu1 }
 0x75e   : > { %6667 = vpow2.f32 %v5006_v3  ;;  %v5008_v55 = vmul.f32 1.442695, %v4991_v59  ;;  %v5119_v25 = vsub.f32 %v8921_v52, %v8946_v15  ;;  %v4640_v1 = vmax.f32 %v4624_v26, %v8953_v0  ;;  %v8976_v27 = vpop.f32.mrb[74].mxu0  ;;  %v8978_v46 = vpop.f32.mrb[155].mxu1 }
 0x75f   : > { %6669 = vpow2.f32 %v5070_v40  ;;  %v5072_v23 = vmul.f32 1.442695, %v5055_v43  ;;  %v8981_v31 = vadd.f32 %v4507_v11, %v8892_v17  ;;  %v8984_v6 = vadd.f32 %v4396_v63, %v8859_v39  ;;  %v8986_v4 = vpop.f32.mrb[75].mxu0 }
 0x760   : > { %6671 = vpow2.f32 %v5134_v60  ;;  %v4656_v3 = vmax.f32 %v4640_v1, %v8927_v62  ;;  %v8990_v59 = vadd.f32 %v4509_v37, %v8880_v28  ;;  %v8993_v26 = vadd.f32 %v4398_v20, %v8868_v29 }
 0x761   : > { %10250 = vst [vmem:[#allocation88_spill] sm:$0xff] %v8981_v31  ;;  %6673 = vpow2.f32 %v4704_v47  ;;  %v5136_v40 = vmul.f32 1.442695, %v5119_v25  ;;  %v10251_v43 = vmax.f32 %v8636_v16, %v8633_v14  ;;  %v9000_v63 = vadd.f32 %v4402_v5, %v8859_v39 }
 0x762   : > { %6675 = vpow2.f32 %v4752_v19  ;;  %v9003_v60 = vmax.f32 %v4656_v3, %v8981_v31  ;;  %v9006_v37 = vadd.f32 %v4511_v32, %v8892_v17  ;;  %v9009_v20 = vadd.f32 %v4515_v36, %v8880_v28  ;;  %v9011_v47 = vpop.f32.mrb[156].mxu1 }
 0x763   : > { %v4625_v11 = vmax.f32 %v10251_v43, %v8984_v6  ;;  %v6658_v25 = vpop.eup %6657  ;;  %6677 = vpow2.f32 %v4816_v41  ;;  %v10252_v5 = vmax.f32 %v8661_v57, %v8658_v35  ;;  %v9019_v1 = vadd.f32 %v4404_v33, %v8868_v29  ;;  %v9021_v3 = vpop.f32.mrb[76].mxu0 }
 0x764   : > { %10253 = vst [vmem:[#allocation89_spill] sm:$0xff] %v9021_v3  ;;  %v9023_v32 = vpop.f32.mrb[157].mxu1  ;;  %v6660_v36 = vpop.eup %6659  ;;  %6679 = vpow2.f32 %v4880_v22  ;;  %v4688_v43 = vsub.f32 %v8601_v56, %v9003_v60  ;;  %v4736_v41 = vsub.f32 %v8606_v12, %v9003_v60  ;;  %v4928_v22 = vsub.f32 %v8924_v38, %v9003_v60 }
 0x765   : > { %v4641_v16 = vmax.f32 %v4625_v11, %v8993_v26  ;;  %v4626_v19 = vmax.f32 %v10252_v5, %v9000_v63  ;;  %10254 = vst [vmem:[#allocation90_spill] sm:$0xff] %v9023_v32  ;;  %v4800_v11 = vsub.f32 %v8612_v53, %v9003_v60  ;;  %v9031_v57 = vpop.f32.mrb[77].mxu0  ;;  %v9033_v5 = vpop.f32.mrb[158].mxu1  ;;  %v4782_v52 = vadd.f32 %v6660_v36, %v6658_v25 }
 0x766   : > { %10255 = vst [vmem:[#allocation91_spill] sm:$0xff] %v9031_v57  ;;  %10256 = vst [vmem:[#allocation92_spill] sm:$0xff] %v9033_v5  ;;  %v6662_v33 = vpop.eup %6661  ;;  %6681 = vpow2.f32 %v4944_v48  ;;  %v4864_v32 = vsub.f32 %v8620_v58, %v9003_v60  ;;  %v9039_v56 = vpop.f32.mrb[78].mxu0  ;;  %v4706_v53 = vmul.f32 1.442695, %v4688_v43  ;;  %v4992_v38 = vsub.f32 %v8953_v0, %v9003_v60 }
 0x767   : > { %10257 = vst [vmem:[#allocation93_spill] sm:$0xff] %v9039_v56  ;;  %v9041_v3 = vpop.f32.mrb[159].mxu1  ;;  %v6664_v12 = vpop.eup %6663  ;;  %6683 = vpow2.f32 %v5008_v55  ;;  %v4754_v51 = vmul.f32 1.442695, %v4736_v41  ;;  %v4818_v57 = vmul.f32 1.442695, %v4800_v11  ;;  %v4846_v5 = vadd.f32 %v6662_v33, %v4782_v52 }
 0x768   : > { %v6666_v9 = vpop.eup %6665  ;;  %6685 = vpow2.f32 %v5072_v23  ;;  %v4882_v25 = vmul.f32 1.442695, %v4864_v32  ;;  %v4946_v48 = vmul.f32 1.442695, %v4928_v22  ;;  %v9043_v36 = vpop.f32.mrb[79].mxu0  ;;  %v5056_v56 = vsub.f32 %v8927_v62, %v9003_v60 }
 0x769   : > { %v6668_v58 = vpop.eup %6667  ;;  %6687 = vpow2.f32 %v5136_v40  ;;  %v5120_v55 = vsub.f32 %v8981_v31, %v9003_v60  ;;  %v4910_v41 = vadd.f32 %v6664_v12, %v4846_v5  ;;  %v4657_v52 = vmax.f32 %v4641_v16, %v8990_v59 }
 0x76a   : > { %v6670_v43 = vpop.eup %6669  ;;  %6689 = vpow2.f32 %v4706_v53  ;;  %v4642_v23 = vmax.f32 %v4626_v19, %v9019_v1  ;;  %v5010_v11 = vmul.f32 1.442695, %v4992_v38  ;;  %v5074_v40 = vmul.f32 1.442695, %v5056_v56  ;;  %v9061_v53 = vpop.f32.mrb[160].mxu1 }
 0x76b   : > { %v6672_v32 = vpop.eup %6671  ;;  %6691 = vpow2.f32 %v4754_v51  ;;  %v9055_v33 = vadd.f32 %v8969_v44, %v8892_v17  ;;  %v4974_v62 = vadd.f32 %v6666_v9, %v4910_v41  ;;  %v9058_v31 = vmax.f32 %v4657_v52, %v9006_v37  ;;  %v9063_v16 = vpop.f32.mrb[80].mxu0 }
 0x76c   : > { %v6674_v22 = vpop.eup %6673  ;;  %6693 = vpow2.f32 %v4818_v57  ;;  %v4658_v12 = vmax.f32 %v4642_v23, %v9009_v20  ;;  %10258 = vst [vmem:[#allocation94_spill] sm:$0xff] %v9063_v16  ;;  %v5138_v51 = vmul.f32 1.442695, %v5120_v55  ;;  %v9067_v56 = vadd.f32 %v8971_v13, %v8859_v39  ;;  %v9073_v38 = vpop.f32.mrb[161].mxu1 }
 0x76d   : > { %v6676_v19 = vpop.eup %6675  ;;  %6695 = vpow2.f32 %v4882_v25  ;;  %v9071_v9 = vadd.f32 %v8978_v46, %v8868_v29  ;;  %10259 = vst [vmem:[#allocation95_spill] sm:$0xff] %v9073_v38  ;;  %v9075_v44 = vpop.f32.mrb[81].mxu0  ;;  %v5038_v5 = vadd.f32 %v6668_v58, %v4974_v62  ;;  %v4689_v25 = vsub.f32 %v8609_v21, %v9058_v31 }
 0x76e   : > { %10260 = vst [vmem:[#allocation96_spill] sm:$0xff] %v9075_v44  ;;  %v6678_v57 = vpop.eup %6677  ;;  %v4783_v41 = vadd.f32 %v6676_v19, %v6674_v22  ;;  %6697 = vpow2.f32 %v4946_v48  ;;  %v9079_v55 = vpop.f32.mrb[162].mxu1  ;;  %v4737_v46 = vsub.f32 %v8617_v7, %v9058_v31  ;;  %v4801_v23 = vsub.f32 %v8626_v10, %v9058_v31 }
 0x76f   : > { %10261 = vst [vmem:[#allocation97_spill] sm:$0xff] %v9079_v55  ;;  %v9081_v52 = vpop.f32.mrb[82].mxu0  ;;  %v6680_v13 = vpop.eup %6679  ;;  %6699 = vpow2.f32 %v5010_v11  ;;  %v4865_v58 = vsub.f32 %v8633_v14, %v9058_v31  ;;  %v5102_v19 = vadd.f32 %v6670_v43, %v5038_v5  ;;  %v4929_v14 = vsub.f32 %v8984_v6, %v9058_v31 }
 0x770   : > { %10262 = vst [vmem:[#allocation98_spill] sm:$0xff] %v9081_v52  ;;  %v9089_v62 = vpop.f32.mrb[163].mxu1  ;;  %v9091_v48 = vpop.f32.mrb[83].mxu0  ;;  %v4847_v55 = vadd.f32 %v6678_v57, %v4783_v41  ;;  %6701 = vpow2.f32 %v5074_v40  ;;  %v4708_v52 = vmul.f32 1.442695, %v4689_v25  ;;  %v4993_v43 = vsub.f32 %v8993_v26, %v9058_v31 }
 0x771   : > { %10263 = vst [vmem:[#allocation99_spill] sm:$0xff] %v9089_v62  ;;  %10264 = vst [vmem:[#allocation100_spill] sm:$0xff] %v9091_v48  ;;  %v6682_v22 = vpop.eup %6681  ;;  %6703 = vpow2.f32 %v5138_v51  ;;  %v4756_v11 = vmul.f32 1.442695, %v4737_v46  ;;  %v4820_v21 = vmul.f32 1.442695, %v4801_v23  ;;  %v5166_v16 = vadd.f32 %v6672_v32, %v5102_v19 }
 0x772   : > { %v6684_v44 = vpop.eup %6683  ;;  %v4884_v7 = vmul.f32 1.442695, %v4865_v58  ;;  %v4911_v10 = vadd.f32 %v6680_v13, %v4847_v55  ;;  %6705 = vpow2.f32 %v4708_v52  ;;  %v5057_v40 = vsub.f32 %v8990_v59, %v9058_v31  ;;  %v9101_v57 = vpop.f32.mrb[164].mxu1 }
 0x773   : > { %v6686_v38 = vpop.eup %6685  ;;  %6707 = vpow2.f32 %v4756_v11  ;;  %v5121_v51 = vsub.f32 %v9006_v37, %v9058_v31  ;;  %10265 = vst [vmem:[#allocation101_spill] sm:$0xff] %v9101_v57  ;;  %v4948_v41 = vmul.f32 1.442695, %v4929_v14  ;;  %v9104_v25 = vmax.f32 %v4658_v12, %v9055_v33  ;;  %v9106_v55 = vpop.f32.mrb[165].mxu1 }
 0x774   : > { %v6688_v62 = vpop.eup %6687  ;;  %6709 = vlog2.f32 %v5166_v16  ;;  %v4975_v32 = vadd.f32 %v6682_v22, %v4911_v10  ;;  %10266 = vst [vmem:[#allocation102_spill] sm:$0xff] %v9106_v55  ;;  %v5012_v13 = vmul.f32 1.442695, %v4993_v43  ;;  %v5076_v46 = vmul.f32 1.442695, %v5057_v40  ;;  %v9110_v16 = vpop.f32.mrb[166].mxu1 }
 0x775   : > { %v6690_v5 = vpop.eup %6689  ;;  %6711 = vpow2.f32 %v4820_v21  ;;  %v5140_v23 = vmul.f32 1.442695, %v5121_v51  ;;  %v4690_v57 = vsub.f32 %v8641_v24, %v9104_v25  ;;  %10267 = vst [vmem:[#allocation103_spill] sm:$0xff] %v9110_v16  ;;  %v4738_v14 = vsub.f32 %v8644_v42, %v9104_v25  ;;  %v9118_v22 = vpop.f32.mrb[167].mxu1 }
 0x776   : > { %v6692_v52 = vpop.eup %6691  ;;  %v5039_v19 = vadd.f32 %v6684_v44, %v4975_v32  ;;  %6713 = vpow2.f32 %v4884_v7  ;;  %v4802_v21 = vsub.f32 %v8650_v30, %v9104_v25  ;;  %v4866_v12 = vsub.f32 %v8658_v35, %v9104_v25  ;;  %10268 = vst [vmem:[#allocation104_spill] sm:$0xff] %v9118_v22 }
 0x777   : > { %v6694_v58 = vpop.eup %6693  ;;  %v4784_v11 = vadd.f32 %v6692_v52, %v6690_v5  ;;  %6715 = vpow2.f32 %v4948_v41  ;;  %v4710_v40 = vmul.f32 1.442695, %v4690_v57  ;;  %v4758_v5 = vmul.f32 1.442695, %v4738_v14 }
 0x778   : > { %v6696_v10 = vpop.eup %6695  ;;  %v5103_v7 = vadd.f32 %v6686_v38, %v5039_v19  ;;  %6717 = vpow2.f32 %v5012_v13  ;;  %v4822_v32 = vmul.f32 1.442695, %v4802_v21  ;;  %v4886_v41 = vmul.f32 1.442695, %v4866_v12 }
 0x779   : > { %v6698_v44 = vpop.eup %6697  ;;  %v4848_v43 = vadd.f32 %v6694_v58, %v4784_v11  ;;  %6719 = vpow2.f32 %v5076_v46  ;;  %v4930_v48 = vsub.f32 %v9000_v63, %v9104_v25  ;;  %v4994_v38 = vsub.f32 %v9019_v1, %v9104_v25 }
 0x77a   : > { %v6700_v51 = vpop.eup %6699  ;;  %v5167_v16 = vadd.f32 %v6688_v62, %v5103_v7  ;;  %6721 = vpow2.f32 %v5140_v23  ;;  %v5058_v57 = vsub.f32 %v9009_v20, %v9104_v25  ;;  %v5122_v13 = vsub.f32 %v9055_v33, %v9104_v25  ;;  %v9128_v46 = vpop.f32.mrb[168].mxu1 }
 0x77b   : > { %v6702_v52 = vpop.eup %6701  ;;  %v4912_v55 = vadd.f32 %v6696_v10, %v4848_v43  ;;  %6723 = vpow2.f32 %v4710_v40  ;;  %10269 = vst [vmem:[#allocation105_spill] sm:$0xff] %v9128_v46  ;;  %v4950_v23 = vmul.f32 1.442695, %v4930_v48  ;;  %v10270_v19 = vmax.f32 %v8674_v2, %v8671_v54  ;;  %v9135_v10 = vpop.f32.mrb[169].mxu1  ;;  %v10295_v46 = vld [vmem:[#allocation85_spill] sm:$0xff] }
 0x77c   : > { %v6704_v35 = vpop.eup %6703  ;;  %6725 = vlog2.f32 %v5167_v16  ;;  %10271 = vst [vmem:[#allocation106_spill] sm:$0xff] %v9135_v10  ;;  %v5014_v21 = vmul.f32 1.442695, %v4994_v38  ;;  %v5078_v12 = vmul.f32 1.442695, %v5058_v57  ;;  %v9139_v7 = vadd.f32 %v8976_v27, %v8880_v28 }
 0x77d   : > { %v6706_v58 = vpop.eup %6705  ;;  %v4976_v62 = vadd.f32 %v6698_v44, %v4912_v55  ;;  %v4627_v11 = vmax.f32 %v10270_v19, %v9067_v56  ;;  %6727 = vpow2.f32 %v4758_v5  ;;  %v9142_v44 = vpop.f32.mrb[170].mxu1  ;;  %v9150_v5 = vadd.f32 %v8986_v4, %v8892_v17 }
 0x77e   : > { %v6708_v14 = vpop.eup %6707  ;;  %6729 = vpow2.f32 %v4822_v32  ;;  %10272 = vst [vmem:[#allocation107_spill] sm:$0xff] %v9142_v44  ;;  %v9154_v27 = vadd.f32 %v9011_v47, %v8859_v39  ;;  %v10276_v4 = vmax.f32 %v8705_v50, %v8688_v18 }
 0x77f   : > { %v6710_v43 = vpop.eup %6709  ;;  %v5040_v16 = vadd.f32 %v6700_v51, %v4976_v62  ;;  %v4785_v55 = vadd.f32 %v6708_v14, %v6706_v58  ;;  %v4643_v48 = vmax.f32 %v4627_v11, %v9071_v9  ;;  %6731 = vpow2.f32 %v4886_v41  ;;  %10273 = vst [vmem:[#allocation108_spill] sm:$0xff] %v9150_v5  ;;  %v9156_v51 = vpop.f32.mrb[171].mxu1 }
 0x780   : > { %v6712_v2 = vpop.eup %6711  ;;  %v5183_v40 = vmul.f32 0.6931472, %v6710_v43  ;;  %10274 = vst [vmem:[#allocation109_spill] sm:$0xff] %v9154_v27  ;;  %10275 = vst [vmem:[#allocation110_spill] sm:$0xff] %v9156_v51  ;;  %6733 = vpow2.f32 %v4950_v23  ;;  %v5142_v41 = vmul.f32 1.442695, %v5122_v13  ;;  %v9164_v11 = vmax.f32 %v10276_v4, %v9154_v27 }
 0x781   : > { %v6714_v32 = vpop.eup %6713  ;;  %v5104_v38 = vadd.f32 %v6702_v52, %v5040_v16  ;;  %v4849_v57 = vadd.f32 %v6712_v2, %v4785_v55  ;;  %v4659_v58 = vmax.f32 %v4643_v48, %v9139_v7  ;;  %6735 = vpow2.f32 %v5014_v21  ;;  %v10278_v48 = vld [vmem:[#allocation78_spill] sm:$0xff]  ;;  %v10279_v2 = vld [vmem:[#allocation79_spill] sm:$0xff] }
 0x782   : > { %v6716_v62 = vpop.eup %6715  ;;  %v5214_v19 = vadd.f32 %v5183_v40, %v8917_v45  ;;  %6737 = vpow2.f32 %v5078_v12  ;;  %v9173_v50 = vpop.f32.mrb[172].mxu1  ;;  %v10280_v12 = vld [vmem:[#allocation82_spill] sm:$0xff] }
 0x783   : > { %v6718_v47 = vpop.eup %6717  ;;  %v5168_v14 = vadd.f32 %v6704_v35, %v5104_v38  ;;  %v4913_v43 = vadd.f32 %v6714_v32, %v4849_v57  ;;  %v9167_v52 = vmax.f32 %v4659_v58, %v9150_v5  ;;  %10277 = vst [vmem:[#allocation111_spill] sm:$0xff] %v9173_v50  ;;  %v10281_v38 = vld [vmem:[#allocation83_spill] sm:$0xff]  ;;  %v9179_v58 = vpop.f32.mrb[173].mxu1 }
 0x784   : > { %v6720_v23 = vpop.eup %6719  ;;  %v5230_v16 = vsub.f32 %v8562_v61, %v5214_v19  ;;  %v5231_v45 = vsub.f32 %v8565_v8, %v5214_v19  ;;  %v5232_v13 = vsub.f32 %v8574_v34, %v5214_v19  ;;  %v5233_v21 = vsub.f32 %v8582_v49, %v5214_v19  ;;  %10282 = vst [vmem:[#allocation78_spill] sm:$0xff] %v9179_v58  ;;  %v10283_v34 = vld [vmem:[#allocation25_spill] sm:$0xff] }
 0x785   : > { %v6722_v55 = vpop.eup %6721  ;;  %v5234_v35 = vsub.f32 %v10278_v48, %v5214_v19  ;;  %v5235_v40 = vsub.f32 %v10279_v2, %v5214_v19  ;;  %v5236_v32 = vsub.f32 %v10280_v12, %v5214_v19  ;;  %v5237_v57 = vsub.f32 %v10281_v38, %v5214_v19  ;;  %v10284_v19 = vld [vmem:[#allocation26_spill] sm:$0xff]  ;;  %v9192_v48 = vpop.f32.mrb[174].mxu1 }
 0x786   : > { %v6724_v61 = vpop.eup %6723  ;;  %5358 = vst [vmem:[%s9182_s16] sm:$0xff] %v5230_v16  ;;  %5359 = vst [vmem:[%s9182_s16 + $0x8] sm:$0xff] %v5231_v45  ;;  %6739 = vlog2.f32 %v5168_v14  ;;  %v4977_v8 = vadd.f32 %v6716_v62, %v4913_v43  ;;  %v4691_v49 = vsub.f32 %v10283_v34, %v9167_v52  ;;  %v4739_v4 = vsub.f32 %v10284_v19, %v9167_v52  ;;  %v10286_v16 = vld [vmem:[#allocation28_spill] sm:$0xff]  ;;  %v9204_v43 = vpop.f32.mrb[175].mxu1 }
 0x787   : > { %5360 = vst [vmem:[%s9182_s16 + $0x10] sm:$0xff] %v5232_v13  ;;  %5361 = vst [vmem:[%s9182_s16 + $0x18] sm:$0xff] %v5233_v21  ;;  %v6726_v2 = vpop.eup %6725  ;;  %6741 = vpow2.f32 %v5142_v41  ;;  %v4803_v45 = vsub.f32 %v10286_v16, %v9167_v52  ;;  %v4867_v62 = vsub.f32 %v8671_v54, %v9167_v52  ;;  %v4931_v14 = vsub.f32 %v9067_v56, %v9167_v52 }
 0x788   : > { %10285 = vst [vmem:[#allocation79_spill] sm:$0xff] %v9192_v48  ;;  %5362 = vst [vmem:[%s9182_s16 + $0x20] sm:$0xff] %v5234_v35  ;;  %v6728_v13 = vpop.eup %6727  ;;  %v5185_v21 = vmul.f32 0.6931472, %v6726_v2  ;;  %v5041_v12 = vadd.f32 %v6718_v47, %v4977_v8  ;;  %v4712_v38 = vmul.f32 1.442695, %v4691_v49  ;;  %v4995_v44 = vsub.f32 %v9071_v9, %v9167_v52 }
 0x789   : > { %5363 = vst [vmem:[%s9182_s16 + $0x28] sm:$0xff] %v5235_v40  ;;  %5364 = vst [vmem:[%s9182_s16 + $0x30] sm:$0xff] %v5236_v32  ;;  %v4760_v35 = vmul.f32 1.442695, %v4739_v4  ;;  %v6730_v40 = vpop.eup %6729  ;;  %v4786_v32 = vadd.f32 %v6728_v13, %v6724_v61  ;;  %v4888_v41 = vmul.f32 1.442695, %v4867_v62  ;;  %v5059_v47 = vsub.f32 %v9139_v7, %v9167_v52 }
 0x78a   : > { %5365 = vst [vmem:[%s9182_s16 + $0x38] sm:$0xff] %v5237_v57  ;;  %10287 = vst [vmem:[#allocation82_spill] sm:$0xff] %v9204_v43  ;;  %v4824_v57 = vmul.f32 1.442695, %v4803_v45  ;;  %v4952_v48 = vmul.f32 1.442695, %v4931_v14  ;;  %v6732_v58 = vpop.eup %6731  ;;  %v5215_v50 = vadd.f32 %v5185_v21, %v8946_v15  ;;  %v5105_v51 = vadd.f32 %v6720_v23, %v5041_v12 }
 0x78b   : > { %6743 = vpow2.f32 %v4712_v38  ;;  %v6734_v10 = vpop.eup %6733  ;;  %v4850_v43 = vadd.f32 %v6730_v40, %v4786_v32  ;;  %v5123_v61 = vsub.f32 %v9150_v5, %v9167_v52  ;;  %v10288_v15 = vld [vmem:[#allocation13_spill] sm:$0xff]  ;;  %v10289_v49 = vld [vmem:[#allocation14_spill] sm:$0xff]  ;;  %v10290_v2 = vld [vmem:[#allocation15_spill] sm:$0xff] }
 0x78c   : > { %6745 = vpow2.f32 %v4760_v35  ;;  %v6736_v8 = vpop.eup %6735  ;;  %v5238_v23 = vsub.f32 %v10288_v15, %v5215_v50  ;;  %v5239_v4 = vsub.f32 %v10289_v49, %v5215_v50  ;;  %v5240_v45 = vsub.f32 %v10290_v2, %v5215_v50  ;;  %v10291_v62 = vld [vmem:[#allocation16_spill] sm:$0xff]  ;;  %v10293_v38 = vld [vmem:[#allocation81_spill] sm:$0xff]  ;;  %v9221_v15 = vpop.f32.mrb[176].mxu1 }
 0x78d   : > { %v5241_v14 = vsub.f32 %v10291_v62, %v5215_v50  ;;  %v6738_v13 = vpop.eup %6737  ;;  %v10292_v21 = vld [vmem:[#allocation80_spill] sm:$0xff]  ;;  %v5243_v35 = vsub.f32 %v10293_v38, %v5215_v50  ;;  %v5245_v22 = vsub.f32 %v10295_v46, %v5215_v50  ;;  %10296 = vst [vmem:[#allocation83_spill] sm:$0xff] %v9221_v15  ;;  %v5169_v49 = vadd.f32 %v6722_v55, %v5105_v51  ;;  %v9227_v5 = vpop.f32.mrb[177].mxu1  ;;  %v10298_v46 = vld [vmem:[#allocation89_spill] sm:$0xff] }
 0x78e   : > { %v5242_v12 = vsub.f32 %v10292_v21, %v5215_v50  ;;  %v10294_v40 = vld [vmem:[#allocation84_spill] sm:$0xff]  ;;  %5366 = vst [vmem:[%s9182_s16 + $0x40] sm:$0xff] %v5238_v23  ;;  %5367 = vst [vmem:[%s9182_s16 + $0x48] sm:$0xff] %v5239_v4  ;;  %v4914_v2 = vadd.f32 %v6732_v58, %v4850_v43  ;;  %6747 = vpow2.f32 %v4824_v57  ;;  %v5016_v62 = vmul.f32 1.442695, %v4995_v44  ;;  %v10299_v23 = vld [vmem:[#allocation90_spill] sm:$0xff] }
 0x78f   : > { %v5244_v32 = vsub.f32 %v10294_v40, %v5215_v50  ;;  %5368 = vst [vmem:[%s9182_s16 + $0x50] sm:$0xff] %v5240_v45  ;;  %5369 = vst [vmem:[%s9182_s16 + $0x58] sm:$0xff] %v5241_v14  ;;  %6749 = vpow2.f32 %v4888_v41  ;;  %v5080_v21 = vmul.f32 1.442695, %v5059_v47  ;;  %v9235_v50 = vadd.f32 %v10298_v46, %v8880_v28  ;;  %v9241_v51 = vpop.f32.mrb[178].mxu1  ;;  %v10301_v43 = vld [vmem:[#allocation92_spill] sm:$0xff] }
 0x790   : > { %10297 = vst [vmem:[#allocation25_spill] sm:$0xff] %v9227_v5  ;;  %5370 = vst [vmem:[%s9182_s16 + $0x60] sm:$0xff] %v5242_v12  ;;  %v9239_v4 = vadd.f32 %v10299_v23, %v8868_v29  ;;  %v6740_v55 = vpop.eup %6739  ;;  %6751 = vlog2.f32 %v5169_v49  ;;  %v4978_v44 = vadd.f32 %v6734_v10, %v4914_v2  ;;  %v5144_v58 = vmul.f32 1.442695, %v5123_v61  ;;  %v10303_v14 = vld [vmem:[#allocation91_spill] sm:$0xff]  ;;  %v10304_v10 = vld [vmem:[#allocation37_spill] sm:$0xff] }
 0x791   : > { %5371 = vst [vmem:[%s9182_s16 + $0x68] sm:$0xff] %v5243_v35  ;;  %5372 = vst [vmem:[%s9182_s16 + $0x70] sm:$0xff] %v5244_v32  ;;  %v9245_v57 = vadd.f32 %v10301_v43, %v8859_v39  ;;  %v6742_v41 = vpop.eup %6741  ;;  %v5187_v47 = vmul.f32 0.6931472, %v6740_v55  ;;  %6753 = vpow2.f32 %v4952_v48  ;;  %v9253_v12 = vadd.f32 %v10303_v14, %v8892_v17  ;;  %v10305_v61 = vld [vmem:[#allocation36_spill] sm:$0xff]  ;;  %v10307_v49 = vld [vmem:[#allocation93_spill] sm:$0xff] }
 0x792   : > { %5373 = vst [vmem:[%s9182_s16 + $0x78] sm:$0xff] %v5245_v22  ;;  %10300 = vst [vmem:[#allocation26_spill] sm:$0xff] %v9241_v51  ;;  %v9247_v22 = vpop.f32.mrb[179].mxu1  ;;  %v4644_v45 = vmax.f32 %v9164_v11, %v9239_v4  ;;  %v5042_v38 = vadd.f32 %v6736_v8, %v4978_v44  ;;  %6755 = vpow2.f32 %v5016_v62  ;;  %v10306_v35 = vmax.f32 %v10304_v10, %v10305_v61  ;;  %v10308_v23 = vld [vmem:[#allocation17_spill] sm:$0xff]  ;;  %v10309_v44 = vld [vmem:[#allocation18_spill] sm:$0xff] }
 0x793   : > { %10302 = vst [vmem:[#allocation28_spill] sm:$0xff] %v9247_v22  ;;  %v9261_v32 = vadd.f32 %v9041_v3, %v8868_v29  ;;  %v5216_v48 = vadd.f32 %v5187_v47, %v9003_v60  ;;  %6757 = vpow2.f32 %v5080_v21  ;;  %v9267_v2 = vadd.f32 %v10307_v49, %v8880_v28  ;;  %v10310_v47 = vld [vmem:[#allocation20_spill] sm:$0xff]  ;;  %v10313_v10 = vld [vmem:[#allocation86_spill] sm:$0xff] }
 0x794   : > { %v4629_v40 = vmax.f32 %v10306_v35, %v9245_v57  ;;  %v4660_v11 = vmax.f32 %v4644_v45, %v9235_v50  ;;  %v5106_v62 = vadd.f32 %v6738_v13, %v5042_v38  ;;  %v9272_v3 = vadd.f32 %v9043_v36, %v8892_v17  ;;  %v10311_v45 = vld [vmem:[#allocation22_spill] sm:$0xff]  ;;  %v9282_v38 = vpop.f32.mrb[180].mxu1  ;;  %v10315_v49 = vld [vmem:[#allocation88_spill] sm:$0xff] }
 0x795   : > { %v6744_v8 = vpop.eup %6743  ;;  %v9276_v60 = vadd.f32 %v9061_v53, %v8859_v39  ;;  %v5246_v55 = vsub.f32 %v10308_v23, %v5216_v48  ;;  %v5247_v43 = vsub.f32 %v10309_v44, %v5216_v48  ;;  %v5248_v13 = vsub.f32 %v10310_v47, %v5216_v48  ;;  %10312 = vst [vmem:[#allocation13_spill] sm:$0xff] %v9282_v38  ;;  %v9288_v22 = vpop.f32.mrb[181].mxu1 }
 0x796   : > { %v4645_v46 = vmax.f32 %v4629_v40, %v9261_v32  ;;  %v6746_v21 = vpop.eup %6745  ;;  %v5249_v14 = vsub.f32 %v10311_v45, %v5216_v48  ;;  %v5250_v36 = vsub.f32 %v10313_v10, %v5216_v48  ;;  %v5251_v35 = vsub.f32 %v8953_v0, %v5216_v48  ;;  %v10314_v40 = vld [vmem:[#allocation87_spill] sm:$0xff]  ;;  %10316 = vst [vmem:[#allocation14_spill] sm:$0xff] %v9288_v22  ;;  %v9298_v0 = vpop.f32.mrb[182].mxu1 }
 0x797   : > { %v5252_v53 = vsub.f32 %v10314_v40, %v5216_v48  ;;  %v5253_v23 = vsub.f32 %v10315_v49, %v5216_v48  ;;  %5374 = vst [vmem:[%s9182_s16 + $0x80] sm:$0xff] %v5246_v55  ;;  %5375 = vst [vmem:[%s9182_s16 + $0x88] sm:$0xff] %v5247_v43  ;;  %v5170_v44 = vadd.f32 %v6742_v41, %v5106_v62  ;;  %6759 = vpow2.f32 %v5144_v58  ;;  %v10318_v48 = vld [vmem:[#allocation46_spill] sm:$0xff]  ;;  %v10319_v55 = vld [vmem:[#allocation41_spill] sm:$0xff] }
 0x798   : > { %5376 = vst [vmem:[%s9182_s16 + $0x90] sm:$0xff] %v5248_v13  ;;  %5377 = vst [vmem:[%s9182_s16 + $0x98] sm:$0xff] %v5249_v14  ;;  %v4787_v47 = vadd.f32 %v6746_v21, %v6744_v8  ;;  %v9295_v45 = vmax.f32 %v4660_v11, %v9253_v12  ;;  %v4661_v10 = vmax.f32 %v4645_v46, %v9267_v2  ;;  %v6748_v38 = vpop.eup %6747  ;;  %v10321_v41 = vld [vmem:[#allocation94_spill] sm:$0xff]  ;;  %v10322_v8 = vld [vmem:[#allocation95_spill] sm:$0xff]  ;;  %v9318_v46 = vpop.f32.mrb[183].mxu1 }
 0x799   : > { %10317 = vst [vmem:[#allocation15_spill] sm:$0xff] %v9298_v0  ;;  %5378 = vst [vmem:[%s9182_s16 + $0xa0] sm:$0xff] %v5250_v36  ;;  %v10320_v43 = vmax.f32 %v10318_v48, %v10319_v55  ;;  %v9312_v11 = vadd.f32 %v10321_v41, %v8880_v28  ;;  %v9316_v62 = vadd.f32 %v10322_v8, %v8868_v29  ;;  %v6750_v21 = vpop.eup %6749  ;;  %6761 = vlog2.f32 %v5170_v44  ;;  %v10324_v58 = vld [vmem:[#allocation29_spill] sm:$0xff]  ;;  %v10326_v49 = vld [vmem:[#allocation30_spill] sm:$0xff] }
 0x79a   : > { %5379 = vst [vmem:[%s9182_s16 + $0xa8] sm:$0xff] %v5251_v35  ;;  %5380 = vst [vmem:[%s9182_s16 + $0xb0] sm:$0xff] %v5252_v53  ;;  %v4851_v14 = vadd.f32 %v6748_v38, %v4787_v47  ;;  %v4692_v36 = vsub.f32 %v10324_v58, %v9295_v45  ;;  %v10325_v35 = vld [vmem:[#allocation31_spill] sm:$0xff]  ;;  %v6752_v53 = vpop.eup %6751  ;;  %v4868_v48 = vsub.f32 %v8688_v18, %v9295_v45 }
 0x79b   : > { %5381 = vst [vmem:[%s9182_s16 + $0xb8] sm:$0xff] %v5253_v23  ;;  %v9308_v13 = vmax.f32 %v10320_v43, %v9276_v60  ;;  %10323 = vst [vmem:[#allocation16_spill] sm:$0xff] %v9318_v46  ;;  %v4740_v40 = vsub.f32 %v10325_v35, %v9295_v45  ;;  %v4804_v23 = vsub.f32 %v10326_v49, %v9295_v45  ;;  %v6754_v38 = vpop.eup %6753  ;;  %v5189_v47 = vmul.f32 0.6931472, %v6752_v53  ;;  %v9335_v15 = vpop.f32.mrb[184].mxu1 }
 0x79c   : > { %v4932_v43 = vsub.f32 %v9154_v27, %v9295_v45  ;;  %v4996_v44 = vsub.f32 %v9239_v4, %v9295_v45  ;;  %v4915_v41 = vadd.f32 %v6750_v21, %v4851_v14  ;;  %v4714_v8 = vmul.f32 1.442695, %v4692_v36  ;;  %v6756_v0 = vpop.eup %6755 }
 0x79d   : > { %v4762_v46 = vmul.f32 1.442695, %v4740_v40  ;;  %v4826_v22 = vmul.f32 1.442695, %v4804_v23  ;;  %v4890_v51 = vmul.f32 1.442695, %v4868_v48  ;;  %v5060_v49 = vsub.f32 %v9235_v50, %v9295_v45  ;;  %v6758_v58 = vpop.eup %6757 }
 0x79e   : > { %v4954_v35 = vmul.f32 1.442695, %v4932_v43  ;;  %v5217_v18 = vadd.f32 %v5189_v47, %v9058_v31  ;;  %v4979_v5 = vadd.f32 %v6754_v38, %v4915_v41  ;;  %6763 = vpow2.f32 %v4714_v8  ;;  %v9342_v40 = vpop.f32.mrb[185].mxu1  ;;  %v10328_v31 = vld [vmem:[#allocation19_spill] sm:$0xff]  ;;  %v10329_v23 = vld [vmem:[#allocation21_spill] sm:$0xff]  ;;  %v10331_v38 = vld [vmem:[#allocation24_spill] sm:$0xff] }
 0x79f   : > { %v5018_v27 = vmul.f32 1.442695, %v4996_v44  ;;  %6765 = vpow2.f32 %v4762_v46  ;;  %v5082_v21 = vmul.f32 1.442695, %v5060_v49  ;;  %v5124_v14 = vsub.f32 %v9253_v12, %v9295_v45  ;;  %10327 = vst [vmem:[#allocation80_spill] sm:$0xff] %v9342_v40  ;;  %v10330_v43 = vld [vmem:[#allocation23_spill] sm:$0xff] }
 0x7a0   : > { %v9340_v36 = vmax.f32 %v4661_v10, %v9272_v3  ;;  %v5254_v53 = vsub.f32 %v10328_v31, %v5217_v18  ;;  %v5255_v48 = vsub.f32 %v10329_v23, %v5217_v18  ;;  %v5256_v44 = vsub.f32 %v10330_v43, %v5217_v18  ;;  %v9348_v49 = vpop.f32.mrb[186].mxu1 }
 0x7a1   : > { %v5257_v46 = vsub.f32 %v10331_v38, %v5217_v18  ;;  %10332 = vst [vmem:[#allocation81_spill] sm:$0xff] %v9348_v49  ;;  %v5258_v47 = vsub.f32 %v8984_v6, %v5217_v18  ;;  %v5259_v10 = vsub.f32 %v8993_v26, %v5217_v18  ;;  %v5260_v41 = vsub.f32 %v8990_v59, %v5217_v18  ;;  %v9354_v31 = vpop.f32.mrb[187].mxu1  ;;  %v10334_v38 = vld [vmem:[#allocation33_spill] sm:$0xff]  ;;  %v6760_v49 = vpop.eup %6759  ;;  %v10336_v26 = vld [vmem:[#allocation34_spill] sm:$0xff] }
 0x7a2   : > { %v5261_v8 = vsub.f32 %v9006_v37, %v5217_v18  ;;  %10333 = vst [vmem:[#allocation84_spill] sm:$0xff] %v9354_v31  ;;  %5382 = vst [vmem:[%s9182_s16 + $0xc0] sm:$0xff] %v5254_v53  ;;  %v5043_v23 = vadd.f32 %v6756_v0, %v4979_v5  ;;  %6767 = vpow2.f32 %v4826_v22  ;;  %v5146_v43 = vmul.f32 1.442695, %v5124_v14  ;;  %v10335_v18 = vld [vmem:[#allocation35_spill] sm:$0xff]  ;;  %v10337_v53 = vld [vmem:[#allocation96_spill] sm:$0xff] }
 0x7a3   : > { %5383 = vst [vmem:[%s9182_s16 + $0xc8] sm:$0xff] %v5255_v48  ;;  %5384 = vst [vmem:[%s9182_s16 + $0xd0] sm:$0xff] %v5256_v44  ;;  %v4693_v6 = vsub.f32 %v10334_v38, %v9340_v36  ;;  %6769 = vpow2.f32 %v4890_v51  ;;  %v4741_v59 = vsub.f32 %v10335_v18, %v9340_v36  ;;  %v4805_v37 = vsub.f32 %v10336_v26, %v9340_v36  ;;  %v6762_v22 = vpop.eup %6761 }
 0x7a4   : > { %5385 = vst [vmem:[%s9182_s16 + $0xd8] sm:$0xff] %v5257_v46  ;;  %5386 = vst [vmem:[%s9182_s16 + $0xe0] sm:$0xff] %v5258_v47  ;;  %v4869_v5 = vsub.f32 %v10305_v61, %v9340_v36  ;;  %v5107_v0 = vadd.f32 %v6758_v58, %v5043_v23  ;;  %6771 = vpow2.f32 %v4954_v35  ;;  %v4933_v14 = vsub.f32 %v9245_v57, %v9340_v36 }
 0x7a5   : > { %5387 = vst [vmem:[%s9182_s16 + $0xe8] sm:$0xff] %v5259_v10  ;;  %5388 = vst [vmem:[%s9182_s16 + $0xf0] sm:$0xff] %v5260_v41  ;;  %v9376_v48 = vadd.f32 %v10337_v53, %v8892_v17  ;;  %v5191_v51 = vmul.f32 0.6931472, %v6762_v22  ;;  %6773 = vpow2.f32 %v5018_v27  ;;  %v4716_v44 = vmul.f32 1.442695, %v4693_v6 }
 0x7a6   : > { %5389 = vst [vmem:[%s9182_s16 + $0xf8] sm:$0xff] %v5261_v8  ;;  %v4764_v46 = vmul.f32 1.442695, %v4741_v59  ;;  %v5171_v47 = vadd.f32 %v6760_v49, %v5107_v0  ;;  %6775 = vpow2.f32 %v5082_v21  ;;  %v4828_v10 = vmul.f32 1.442695, %v4805_v37 }
 0x7a7   : > { %v4892_v41 = vmul.f32 1.442695, %v4869_v5  ;;  %v5218_v8 = vadd.f32 %v5191_v51, %v9104_v25  ;;  %6777 = vpow2.f32 %v5146_v43  ;;  %v4997_v58 = vsub.f32 %v9261_v32, %v9340_v36  ;;  %v10338_v25 = vld [vmem:[#allocation97_spill] sm:$0xff]  ;;  %v10340_v5 = vld [vmem:[#allocation27_spill] sm:$0xff] }
 0x7a8   : > { %v5061_v35 = vsub.f32 %v9267_v2, %v9340_v36  ;;  %v6764_v23 = vpop.eup %6763  ;;  %6779 = vlog2.f32 %v5171_v47  ;;  %v5125_v27 = vsub.f32 %v9272_v3, %v9340_v36  ;;  %v4646_v21 = vmax.f32 %v9308_v13, %v9316_v62 }
 0x7a9   : > { %v9389_v49 = vadd.f32 %v10338_v25, %v8859_v39  ;;  %v6766_v43 = vpop.eup %6765  ;;  %v5262_v6 = vsub.f32 %v8641_v24, %v5218_v8  ;;  %v5263_v59 = vsub.f32 %v8644_v42, %v5218_v8  ;;  %v5264_v37 = vsub.f32 %v8650_v30, %v5218_v8 }
 0x7aa   : > { %v5265_v22 = vsub.f32 %v10340_v5, %v5218_v8  ;;  %v5266_v0 = vsub.f32 %v9000_v63, %v5218_v8  ;;  %v5267_v13 = vsub.f32 %v9019_v1, %v5218_v8  ;;  %v5268_v53 = vsub.f32 %v9009_v20, %v5218_v8  ;;  %v10341_v20 = vld [vmem:[#allocation47_spill] sm:$0xff] }
 0x7ab   : > { %10339 = vst [vmem:[#allocation85_spill] sm:$0xff] %v9389_v49  ;;  %v5269_v51 = vsub.f32 %v9055_v33, %v5218_v8  ;;  %5390 = vst [vmem:[%s9182_s16 + $0x100] sm:$0xff] %v5262_v6  ;;  %v4788_v24 = vadd.f32 %v6766_v43, %v6764_v23  ;;  %6781 = vpow2.f32 %v4716_v44  ;;  %v4956_v42 = vmul.f32 1.442695, %v4933_v14  ;;  %v10342_v33 = vld [vmem:[#allocation45_spill] sm:$0xff]  ;;  %v10344_v14 = vld [vmem:[#allocation99_spill] sm:$0xff] }
 0x7ac   : > { %5391 = vst [vmem:[%s9182_s16 + $0x108] sm:$0xff] %v5263_v59  ;;  %5392 = vst [vmem:[%s9182_s16 + $0x110] sm:$0xff] %v5264_v37  ;;  %v5020_v30 = vmul.f32 1.442695, %v4997_v58  ;;  %v6768_v47 = vpop.eup %6767  ;;  %6783 = vpow2.f32 %v4764_v46  ;;  %v5084_v63 = vmul.f32 1.442695, %v5061_v35  ;;  %v4662_v1 = vmax.f32 %v4646_v21, %v9312_v11 }
 0x7ad   : > { %5393 = vst [vmem:[%s9182_s16 + $0x118] sm:$0xff] %v5265_v22  ;;  %5394 = vst [vmem:[%s9182_s16 + $0x120] sm:$0xff] %v5266_v0  ;;  %v10343_v8 = vmax.f32 %v10341_v20, %v10342_v33  ;;  %v6770_v6 = vpop.eup %6769  ;;  %v4852_v59 = vadd.f32 %v6768_v47, %v4788_v24  ;;  %6785 = vpow2.f32 %v4828_v10  ;;  %v5148_v44 = vmul.f32 1.442695, %v5125_v27  ;;  %v10346_v35 = vld [vmem:[#allocation98_spill] sm:$0xff]  ;;  %v10348_v43 = vld [vmem:[#allocation100_spill] sm:$0xff] }
 0x7ae   : > { %5395 = vst [vmem:[%s9182_s16 + $0x128] sm:$0xff] %v5267_v13  ;;  %5396 = vst [vmem:[%s9182_s16 + $0x130] sm:$0xff] %v5268_v53  ;;  %v9414_v58 = vadd.f32 %v10344_v14, %v8868_v29  ;;  %v6772_v23 = vpop.eup %6771  ;;  %6787 = vpow2.f32 %v4892_v41  ;;  %v9417_v46 = vmax.f32 %v4662_v1, %v9376_v48  ;;  %v9421_v21 = vadd.f32 %v10346_v35, %v8880_v28  ;;  %v10350_v22 = vld [vmem:[#allocation101_spill] sm:$0xff]  ;;  %v10351_v13 = vld [vmem:[#allocation38_spill] sm:$0xff] }
 0x7af   : > { %5397 = vst [vmem:[%s9182_s16 + $0x138] sm:$0xff] %v5269_v51  ;;  %v4631_v25 = vmax.f32 %v10343_v8, %v9389_v49  ;;  %v9425_v37 = vadd.f32 %v10348_v43, %v8892_v17  ;;  %v6774_v5 = vpop.eup %6773  ;;  %v4916_v10 = vadd.f32 %v6770_v6, %v4852_v59  ;;  %6789 = vpow2.f32 %v4956_v42  ;;  %v10352_v51 = vld [vmem:[#allocation40_spill] sm:$0xff]  ;;  %v10353_v47 = vld [vmem:[#allocation39_spill] sm:$0xff]  ;;  %v10354_v20 = vld [vmem:[#allocation102_spill] sm:$0xff] }
 0x7b0   : > { %10345 = vst [vmem:[#allocation89_spill] sm:$0xff] %v9414_v58  ;;  %10347 = vst [vmem:[#allocation90_spill] sm:$0xff] %v9421_v21  ;;  %v9430_v0 = vadd.f32 %v10350_v22, %v8859_v39  ;;  %v6776_v41 = vpop.eup %6775  ;;  %v4694_v53 = vsub.f32 %v10351_v13, %v9417_v46  ;;  %v4742_v24 = vsub.f32 %v10352_v51, %v9417_v46  ;;  %6791 = vpow2.f32 %v5020_v30 }
 0x7b1   : > { %10349 = vst [vmem:[#allocation92_spill] sm:$0xff] %v9425_v37  ;;  %v4647_v27 = vmax.f32 %v4631_v25, %v9414_v58  ;;  %v4806_v1 = vsub.f32 %v10353_v47, %v9417_v46  ;;  %v9440_v8 = vadd.f32 %v10354_v20, %v8868_v29  ;;  %v6778_v42 = vpop.eup %6777  ;;  %v4980_v25 = vadd.f32 %v6772_v23, %v4916_v10 }
 0x7b2   : > { %v4870_v6 = vsub.f32 %v10319_v55, %v9417_v46  ;;  %v4934_v59 = vsub.f32 %v9276_v60, %v9417_v46  ;;  %v6780_v14 = vpop.eup %6779  ;;  %6793 = vpow2.f32 %v5084_v63  ;;  %v4718_v35 = vmul.f32 1.442695, %v4694_v53 }
 0x7b3   : > { %v4766_v43 = vmul.f32 1.442695, %v4742_v24  ;;  %v4830_v22 = vmul.f32 1.442695, %v4806_v1  ;;  %v5193_v31 = vmul.f32 0.6931472, %v6780_v14  ;;  %v5044_v40 = vadd.f32 %v6774_v5, %v4980_v25 }
 0x7b4   : > { %6795 = vpow2.f32 %v5148_v44  ;;  %v4894_v47 = vmul.f32 1.442695, %v4870_v6  ;;  %v4998_v23 = vsub.f32 %v9316_v62, %v9417_v46  ;;  %v5062_v30 = vsub.f32 %v9312_v11, %v9417_v46 }
 0x7b5   : > { %6797 = vpow2.f32 %v4718_v35  ;;  %v5126_v10 = vsub.f32 %v9376_v48, %v9417_v46  ;;  %v6782_v20 = vpop.eup %6781  ;;  %v5219_v63 = vadd.f32 %v5193_v31, %v9167_v52  ;;  %v5108_v53 = vadd.f32 %v6776_v41, %v5044_v40 }
 0x7b6   : > { %6799 = vpow2.f32 %v4766_v43  ;;  %v4663_v24 = vmax.f32 %v4647_v27, %v9421_v21  ;;  %v6784_v5 = vpop.eup %6783  ;;  %v4958_v44 = vmul.f32 1.442695, %v4934_v59  ;;  %v5022_v1 = vmul.f32 1.442695, %v4998_v23  ;;  %v10355_v43 = vld [vmem:[#allocation108_spill] sm:$0xff] }
 0x7b7   : > { %6801 = vpow2.f32 %v4830_v22  ;;  %v5086_v25 = vmul.f32 1.442695, %v5062_v30  ;;  %v6786_v6 = vpop.eup %6785  ;;  %v5270_v14 = vsub.f32 %v10283_v34, %v5219_v63  ;;  %v5271_v35 = vsub.f32 %v10284_v19, %v5219_v63 }
 0x7b8   : > { %v5272_v52 = vsub.f32 %v10286_v16, %v5219_v63  ;;  %v5273_v40 = vsub.f32 %v8671_v54, %v5219_v63  ;;  %v6788_v31 = vpop.eup %6787  ;;  %v5274_v27 = vsub.f32 %v9067_v56, %v5219_v63  ;;  %v5275_v41 = vsub.f32 %v9071_v9, %v5219_v63  ;;  %v10357_v9 = vld [vmem:[#allocation56_spill] sm:$0xff] }
 0x7b9   : > { %v5276_v59 = vsub.f32 %v9139_v7, %v5219_v63  ;;  %v5277_v22 = vsub.f32 %v10355_v43, %v5219_v63  ;;  %v6790_v34 = vpop.eup %6789  ;;  %5398 = vst [vmem:[%s9182_s16 + $0x140] sm:$0xff] %v5270_v14  ;;  %5399 = vst [vmem:[%s9182_s16 + $0x148] sm:$0xff] %v5271_v35  ;;  %v5172_v19 = vadd.f32 %v6778_v42, %v5108_v53  ;;  %6803 = vpow2.f32 %v4894_v47  ;;  %v10358_v7 = vld [vmem:[#allocation51_spill] sm:$0xff]  ;;  %v10361_v53 = vld [vmem:[#allocation42_spill] sm:$0xff] }
 0x7ba   : > { %5400 = vst [vmem:[%s9182_s16 + $0x150] sm:$0xff] %v5272_v52  ;;  %5401 = vst [vmem:[%s9182_s16 + $0x158] sm:$0xff] %v5273_v40  ;;  %v4789_v16 = vadd.f32 %v6784_v5, %v6782_v20  ;;  %v9467_v54 = vmax.f32 %v4663_v24, %v9425_v37  ;;  %6805 = vpow2.f32 %v4958_v44  ;;  %v5150_v56 = vmul.f32 1.442695, %v5126_v10  ;;  %v10360_v63 = vld [vmem:[#allocation103_spill] sm:$0xff]  ;;  %v6792_v47 = vpop.eup %6791  ;;  %v10362_v5 = vld [vmem:[#allocation44_spill] sm:$0xff] }
 0x7bb   : > { %5402 = vst [vmem:[%s9182_s16 + $0x160] sm:$0xff] %v5274_v27  ;;  %5403 = vst [vmem:[%s9182_s16 + $0x168] sm:$0xff] %v5275_v41  ;;  %v10359_v23 = vmax.f32 %v10357_v9, %v10358_v7  ;;  %v9481_v42 = vadd.f32 %v10360_v63, %v8859_v39  ;;  %6807 = vlog2.f32 %v5172_v19  ;;  %v10363_v14 = vld [vmem:[#allocation43_spill] sm:$0xff] }
 0x7bc   : > { %10356 = vst [vmem:[#allocation91_spill] sm:$0xff] %v9467_v54  ;;  %5404 = vst [vmem:[%s9182_s16 + $0x170] sm:$0xff] %v5276_v59  ;;  %v4853_v20 = vadd.f32 %v6786_v6, %v4789_v16  ;;  %v4695_v24 = vsub.f32 %v10361_v53, %v9467_v54  ;;  %v4743_v44 = vsub.f32 %v10362_v5, %v9467_v54  ;;  %v6794_v10 = vpop.eup %6793  ;;  %6809 = vpow2.f32 %v5022_v1  ;;  %v10364_v1 = vld [vmem:[#allocation104_spill] sm:$0xff]  ;;  %v10397_v53 = vld [vmem:[#allocation109_spill] sm:$0xff] }
 0x7bd   : > { %5405 = vst [vmem:[%s9182_s16 + $0x178] sm:$0xff] %v5277_v22  ;;  %v9477_v30 = vmax.f32 %v10359_v23, %v9430_v0  ;;  %v4807_v35 = vsub.f32 %v10363_v14, %v9467_v54  ;;  %v4871_v52 = vsub.f32 %v10342_v33, %v9467_v54  ;;  %v4935_v40 = vsub.f32 %v9389_v49, %v9467_v54  ;;  %v10396_v5 = vld [vmem:[#allocation32_spill] sm:$0xff] }
 0x7be   : > { %v6796_v27 = vpop.eup %6795  ;;  %v4917_v41 = vadd.f32 %v6788_v31, %v4853_v20  ;;  %6811 = vpow2.f32 %v5086_v25  ;;  %v4720_v6 = vmul.f32 1.442695, %v4695_v24  ;;  %v4768_v59 = vmul.f32 1.442695, %v4743_v44 }
 0x7bf   : > { %v6798_v43 = vpop.eup %6797  ;;  %6813 = vpow2.f32 %v5150_v56  ;;  %v4832_v22 = vmul.f32 1.442695, %v4807_v35  ;;  %v4896_v19 = vmul.f32 1.442695, %v4871_v52  ;;  %v9495_v16 = vadd.f32 %v10364_v1, %v8868_v29  ;;  %v10366_v1 = vld [vmem:[#allocation55_spill] sm:$0xff] }
 0x7c0   : > { %v6800_v9 = vpop.eup %6799  ;;  %v4981_v23 = vadd.f32 %v6790_v34, %v4917_v41  ;;  %6815 = vpow2.f32 %v4720_v6  ;;  %v4999_v63 = vsub.f32 %v9414_v58, %v9467_v54  ;;  %v5063_v31 = vsub.f32 %v9421_v21, %v9467_v54  ;;  %v10365_v6 = vld [vmem:[#allocation57_spill] sm:$0xff] }
 0x7c1   : > { %v6802_v25 = vpop.eup %6801  ;;  %v4790_v20 = vadd.f32 %v6800_v9, %v6798_v43  ;;  %6817 = vpow2.f32 %v4768_v59  ;;  %v5127_v56 = vsub.f32 %v9425_v37, %v9467_v54  ;;  %v4960_v35 = vmul.f32 1.442695, %v4935_v40  ;;  %v10368_v9 = vld [vmem:[#allocation105_spill] sm:$0xff] }
 0x7c2   : > { %v5045_v44 = vadd.f32 %v6792_v47, %v4981_v23  ;;  %6819 = vpow2.f32 %v4832_v22  ;;  %v5024_v52 = vmul.f32 1.442695, %v4999_v63  ;;  %v5088_v41 = vmul.f32 1.442695, %v5063_v31  ;;  %v10370_v47 = vld [vmem:[#allocation106_spill] sm:$0xff] }
 0x7c3   : > { %v4854_v34 = vadd.f32 %v6802_v25, %v4790_v20  ;;  %v10367_v58 = vmax.f32 %v10365_v6, %v10366_v1  ;;  %v6804_v43 = vpop.eup %6803  ;;  %6821 = vpow2.f32 %v4896_v19  ;;  %v9513_v37 = vadd.f32 %v10368_v9, %v8859_v39  ;;  %v10374_v20 = vld [vmem:[#allocation66_spill] sm:$0xff] }
 0x7c4   : > { %v5109_v59 = vadd.f32 %v6794_v10, %v5045_v44  ;;  %v9517_v22 = vadd.f32 %v10370_v47, %v8868_v29  ;;  %v6806_v40 = vpop.eup %6805  ;;  %v5152_v63 = vmul.f32 1.442695, %v5127_v56  ;;  %6823 = vpow2.f32 %v4960_v35  ;;  %v10375_v44 = vld [vmem:[#allocation61_spill] sm:$0xff]  ;;  %v10377_v47 = vld [vmem:[#allocation110_spill] sm:$0xff] }
 0x7c5   : > { %v9509_v21 = vmax.f32 %v10367_v58, %v9481_v42  ;;  %10369 = vst [vmem:[#allocation37_spill] sm:$0xff] %v9513_v37  ;;  %v4918_v23 = vadd.f32 %v6804_v43, %v4854_v34  ;;  %v10372_v58 = vld [vmem:[#allocation107_spill] sm:$0xff]  ;;  %v6808_v10 = vpop.eup %6807  ;;  %v10376_v6 = vmax.f32 %v10374_v20, %v10375_v44  ;;  %v9531_v24 = vadd.f32 %v10377_v47, %v8868_v29 }
 0x7c6   : > { %10371 = vst [vmem:[#allocation36_spill] sm:$0xff] %v9517_v22  ;;  %v9523_v25 = vadd.f32 %v10372_v58, %v8859_v39  ;;  %v5173_v19 = vadd.f32 %v6796_v27, %v5109_v59  ;;  %v6810_v56 = vpop.eup %6809  ;;  %v5195_v34 = vmul.f32 0.6931472, %v6808_v10  ;;  %6825 = vpow2.f32 %v5024_v52  ;;  %v10380_v58 = vld [vmem:[#allocation65_spill] sm:$0xff]  ;;  %v10382_v59 = vld [vmem:[#allocation111_spill] sm:$0xff] }
 0x7c7   : > { %v4649_v31 = vmax.f32 %v9509_v21, %v9495_v16  ;;  %v4634_v9 = vmax.f32 %v10376_v6, %v9513_v37  ;;  %10378 = vst [vmem:[#allocation17_spill] sm:$0xff] %v9531_v24  ;;  %v4982_v43 = vadd.f32 %v6806_v40, %v4918_v23  ;;  %v10379_v21 = vld [vmem:[#allocation67_spill] sm:$0xff]  ;;  %v9542_v20 = vadd.f32 %v10382_v59, %v8859_v39  ;;  %v10384_v6 = vld [vmem:[#allocation78_spill] sm:$0xff] }
 0x7c8   : > { %10373 = vst [vmem:[#allocation93_spill] sm:$0xff] %v9523_v25  ;;  %v10381_v49 = vmax.f32 %v10379_v21, %v10380_v58  ;;  %v6812_v27 = vpop.eup %6811  ;;  %6827 = vlog2.f32 %v5173_v19  ;;  %v9546_v47 = vadd.f32 %v10384_v6, %v8868_v29  ;;  %v5220_v52 = vadd.f32 %v5195_v34, %v9295_v45  ;;  %v10385_v10 = vld [vmem:[#allocation79_spill] sm:$0xff]  ;;  %v10387_v21 = vld [vmem:[#allocation76_spill] sm:$0xff]  ;;  %v10390_v58 = vld [vmem:[#allocation82_spill] sm:$0xff] }
 0x7c9   : > { %v4650_v35 = vmax.f32 %v4634_v9, %v9517_v22  ;;  %10383 = vst [vmem:[#allocation18_spill] sm:$0xff] %v9542_v20  ;;  %v6814_v40 = vpop.eup %6813  ;;  %v5046_v23 = vadd.f32 %v6810_v56, %v4982_v43  ;;  %v9553_v19 = vadd.f32 %v10385_v10, %v8859_v39  ;;  %v10388_v59 = vld [vmem:[#allocation71_spill] sm:$0xff]  ;;  %v9563_v45 = vadd.f32 %v10390_v58, %v8868_v29  ;;  %v10392_v39 = vld [vmem:[#allocation25_spill] sm:$0xff] }
 0x7ca   : > { %v9537_v33 = vmax.f32 %v10381_v49, %v9523_v25  ;;  %v6816_v9 = vpop.eup %6815  ;;  %v10389_v25 = vmax.f32 %v10387_v21, %v10388_v59  ;;  %v10391_v56 = vld [vmem:[#allocation83_spill] sm:$0xff]  ;;  %v9571_v43 = vadd.f32 %v10392_v39, %v8892_v17  ;;  %v10393_v49 = vld [vmem:[#allocation29_spill] sm:$0xff]  ;;  %v5281_v29 = vsub.f32 %v10396_v5, %v5220_v52 }
 0x7cb   : > { %10386 = vst [vmem:[#allocation20_spill] sm:$0xff] %v9553_v19  ;;  %v9567_v34 = vadd.f32 %v10391_v56, %v8880_v28  ;;  %v6818_v10 = vpop.eup %6817  ;;  %v5278_v21 = vsub.f32 %v10393_v49, %v5220_v52  ;;  %v10394_v59 = vld [vmem:[#allocation31_spill] sm:$0xff]  ;;  %v5282_v56 = vsub.f32 %v10397_v53, %v5220_v52  ;;  %v5283_v54 = vsub.f32 %v9239_v4, %v5220_v52 }
 0x7cc   : > { %v9559_v6 = vmax.f32 %v10389_v25, %v9542_v20  ;;  %v5279_v25 = vsub.f32 %v10394_v59, %v5220_v52  ;;  %v10395_v20 = vld [vmem:[#allocation30_spill] sm:$0xff]  ;;  %v6820_v58 = vpop.eup %6819  ;;  %v5284_v39 = vsub.f32 %v9235_v50, %v5220_v52  ;;  %v5285_v22 = vsub.f32 %v9253_v12, %v5220_v52  ;;  %5409 = vst [vmem:[%s9182_s16 + $0x198] sm:$0xff] %v5281_v29  ;;  %v10398_v59 = vld [vmem:[#allocation77_spill] sm:$0xff]  ;;  %v10399_v37 = vld [vmem:[#allocation75_spill] sm:$0xff] }
 0x7cd   : > { %v5280_v14 = vsub.f32 %v10395_v20, %v5220_v52  ;;  %5406 = vst [vmem:[%s9182_s16 + $0x180] sm:$0xff] %v5278_v21  ;;  %v5110_v20 = vadd.f32 %v6812_v27, %v5046_v23  ;;  %v4791_v49 = vadd.f32 %v6818_v10, %v6816_v9  ;;  %v10400_v53 = vmax.f32 %v10398_v59, %v10399_v37  ;;  %v6822_v4 = vpop.eup %6821  ;;  %v10403_v52 = vld [vmem:[#allocation13_spill] sm:$0xff] }
 0x7ce   : > { %5407 = vst [vmem:[%s9182_s16 + $0x188] sm:$0xff] %v5279_v25  ;;  %5410 = vst [vmem:[%s9182_s16 + $0x1a0] sm:$0xff] %v5282_v56  ;;  %6829 = vpow2.f32 %v5088_v41  ;;  %v10401_v50 = vmax.f32 %v9477_v30, %v9440_v8  ;;  %v9607_v23 = vadd.f32 %v10403_v52, %v8880_v28  ;;  %v10405_v56 = vld [vmem:[#allocation28_spill] sm:$0xff]  ;;  %v10408_v59 = vld [vmem:[#allocation49_spill] sm:$0xff] }
 0x7cf   : > { %5408 = vst [vmem:[%s9182_s16 + $0x190] sm:$0xff] %v5280_v14  ;;  %v9591_v44 = vmax.f32 %v10400_v53, %v9553_v19  ;;  %5411 = vst [vmem:[%s9182_s16 + $0x1a8] sm:$0xff] %v5283_v54  ;;  %v10402_v14 = vld [vmem:[#allocation26_spill] sm:$0xff]  ;;  %v5174_v9 = vadd.f32 %v6814_v40, %v5110_v20  ;;  %v4855_v10 = vadd.f32 %v6820_v58, %v4791_v49  ;;  %6831 = vpow2.f32 %v5152_v63  ;;  %v10406_v58 = vld [vmem:[#allocation48_spill] sm:$0xff] }
 0x7d0   : > { %5412 = vst [vmem:[%s9182_s16 + $0x1b0] sm:$0xff] %v5284_v39  ;;  %5413 = vst [vmem:[%s9182_s16 + $0x1b8] sm:$0xff] %v5285_v22  ;;  %v4664_v12 = vmax.f32 %v10401_v50, %v9567_v34  ;;  %v9603_v27 = vadd.f32 %v10402_v14, %v8880_v28  ;;  %v6824_v22 = vpop.eup %6823  ;;  %v4666_v21 = vmax.f32 %v4650_v35, %v9607_v23  ;;  %v10407_v63 = vld [vmem:[#allocation50_spill] sm:$0xff] }
 0x7d1   : > { %10404 = vst [vmem:[#allocation22_spill] sm:$0xff] %v9607_v23  ;;  %v6826_v25 = vpop.eup %6825  ;;  %6833 = vlog2.f32 %v5174_v9  ;;  %v4919_v29 = vadd.f32 %v6822_v4, %v4855_v10  ;;  %v9618_v39 = vadd.f32 %v10405_v56, %v8892_v17  ;;  %v10409_v9 = vld [vmem:[#allocation14_spill] sm:$0xff]  ;;  %v10410_v56 = vld [vmem:[#allocation15_spill] sm:$0xff] }
 0x7d2   : > { %v9612_v41 = vmax.f32 %v4664_v12, %v9571_v43  ;;  %v4665_v30 = vmax.f32 %v4649_v31, %v9603_v27  ;;  %v6828_v40 = vpop.eup %6827  ;;  %v9636_v10 = vadd.f32 %v10409_v9, %v8892_v17  ;;  %v9640_v54 = vadd.f32 %v10410_v56, %v8880_v28 }
 0x7d3   : > { %v5197_v35 = vmul.f32 0.6931472, %v6828_v40  ;;  %v4983_v50 = vadd.f32 %v6824_v22, %v4919_v29 }
 0x7d4   : > { %v4696_v20 = vsub.f32 %v10406_v58, %v9612_v41  ;;  %v4744_v49 = vsub.f32 %v10407_v63, %v9612_v41  ;;  %v4808_v53 = vsub.f32 %v10408_v59, %v9612_v41  ;;  %v4872_v31 = vsub.f32 %v10358_v7, %v9612_v41  ;;  %10411 = vst [vmem:[#allocation86_spill] sm:$0xff] %v9640_v54 }
 0x7d5   : > { %v4936_v4 = vsub.f32 %v9430_v0, %v9612_v41  ;;  %v5000_v12 = vsub.f32 %v9440_v8, %v9612_v41  ;;  %v5064_v52 = vsub.f32 %v9567_v34, %v9612_v41  ;;  %v5221_v22 = vadd.f32 %v5197_v35, %v9340_v36 }
 0x7d6   : > { %v4722_v14 = vmul.f32 1.442695, %v4696_v20  ;;  %v5047_v29 = vadd.f32 %v6826_v25, %v4983_v50  ;;  %v4770_v40 = vmul.f32 1.442695, %v4744_v49  ;;  %v9645_v20 = vadd.f32 %v9335_v15, %v8880_v28 }
 0x7d7   : > { %v4834_v5 = vmul.f32 1.442695, %v4808_v53  ;;  %v4898_v9 = vmul.f32 1.442695, %v4872_v31  ;;  %v5128_v19 = vsub.f32 %v9571_v43, %v9612_v41  ;;  %v5286_v56 = vsub.f32 %v10334_v38, %v5221_v22 }
 0x7d8   : > { %6835 = vpow2.f32 %v4722_v14  ;;  %v5287_v36 = vsub.f32 %v10335_v18, %v5221_v22  ;;  %v5288_v25 = vsub.f32 %v10336_v26, %v5221_v22  ;;  %v5289_v49 = vsub.f32 %v10305_v61, %v5221_v22  ;;  %v6830_v15 = vpop.eup %6829 }
 0x7d9   : > { %v5290_v35 = vsub.f32 %v9245_v57, %v5221_v22  ;;  %v5291_v53 = vsub.f32 %v9261_v32, %v5221_v22  ;;  %v5292_v31 = vsub.f32 %v9267_v2, %v5221_v22  ;;  %v5293_v50 = vsub.f32 %v9272_v3, %v5221_v22  ;;  %5414 = vst [vmem:[%s9182_s16 + $0x1c0] sm:$0xff] %v5286_v56  ;;  %v6832_v26 = vpop.eup %6831 }
 0x7da   : > { %5415 = vst [vmem:[%s9182_s16 + $0x1c8] sm:$0xff] %v5287_v36  ;;  %5416 = vst [vmem:[%s9182_s16 + $0x1d0] sm:$0xff] %v5288_v25  ;;  %v5111_v38 = vadd.f32 %v6830_v15, %v5047_v29  ;;  %6837 = vpow2.f32 %v4770_v40  ;;  %v4962_v18 = vmul.f32 1.442695, %v4936_v4  ;;  %v9662_v61 = vmax.f32 %v4665_v30, %v9618_v39 }
 0x7db   : > { %5417 = vst [vmem:[%s9182_s16 + $0x1d8] sm:$0xff] %v5289_v49  ;;  %5418 = vst [vmem:[%s9182_s16 + $0x1e0] sm:$0xff] %v5290_v35  ;;  %v5026_v57 = vmul.f32 1.442695, %v5000_v12  ;;  %v9669_v32 = vmax.f32 %v4666_v21, %v9636_v10  ;;  %v10412_v2 = vmax.f32 %v9537_v33, %v9531_v24  ;;  %v10413_v30 = vmax.f32 %v9559_v6, %v9546_v47  ;;  %v6834_v14 = vpop.eup %6833  ;;  %v10414_v12 = vld [vmem:[#allocation52_spill] sm:$0xff]  ;;  %v10415_v21 = vld [vmem:[#allocation54_spill] sm:$0xff] }
 0x7dc   : > { %5419 = vst [vmem:[%s9182_s16 + $0x1e8] sm:$0xff] %v5291_v53  ;;  %5420 = vst [vmem:[%s9182_s16 + $0x1f0] sm:$0xff] %v5292_v31  ;;  %v5175_v22 = vadd.f32 %v6832_v26, %v5111_v38  ;;  %6839 = vpow2.f32 %v4834_v5  ;;  %v4697_v29 = vsub.f32 %v10414_v12, %v9662_v61  ;;  %v4745_v40 = vsub.f32 %v10415_v21, %v9662_v61  ;;  %v10416_v33 = vld [vmem:[#allocation53_spill] sm:$0xff]  ;;  %v10417_v38 = vld [vmem:[#allocation39_spill] sm:$0xff] }
 0x7dd   : > { %5421 = vst [vmem:[%s9182_s16 + $0x1f8] sm:$0xff] %v5293_v50  ;;  %v9675_v3 = vmax.f32 %v10412_v2, %v9640_v54  ;;  %v9681_v4 = vmax.f32 %v10413_v30, %v9645_v20  ;;  %v5199_v56 = vmul.f32 0.6931472, %v6834_v14  ;;  %6841 = vpow2.f32 %v4898_v9 }
 0x7de   : > { %v4809_v36 = vsub.f32 %v10416_v33, %v9662_v61  ;;  %v4873_v25 = vsub.f32 %v10366_v1, %v9662_v61  ;;  %6843 = vlog2.f32 %v5175_v22  ;;  %v5090_v6 = vmul.f32 1.442695, %v5064_v52  ;;  %v10420_v22 = vld [vmem:[#allocation59_spill] sm:$0xff] }
 0x7df   : > { %v4937_v49 = vsub.f32 %v9481_v42, %v9662_v61  ;;  %v5222_v5 = vadd.f32 %v5199_v56, %v9417_v46  ;;  %6845 = vpow2.f32 %v4962_v18  ;;  %v5154_v15 = vmul.f32 1.442695, %v5128_v19 }
 0x7e0   : > { %v4724_v35 = vmul.f32 1.442695, %v4697_v29  ;;  %6847 = vpow2.f32 %v5026_v57  ;;  %v4772_v9 = vmul.f32 1.442695, %v4745_v40  ;;  %v5001_v53 = vsub.f32 %v9495_v16, %v9662_v61 }
 0x7e1   : > { %v5065_v52 = vsub.f32 %v9603_v27, %v9662_v61  ;;  %v5294_v50 = vsub.f32 %v10351_v13, %v5222_v5  ;;  %v5295_v46 = vsub.f32 %v10352_v51, %v5222_v5  ;;  %v5296_v19 = vsub.f32 %v10417_v38, %v5222_v5 }
 0x7e2   : > { %v6836_v31 = vpop.eup %6835  ;;  %v5297_v18 = vsub.f32 %v10319_v55, %v5222_v5  ;;  %v5298_v26 = vsub.f32 %v9276_v60, %v5222_v5  ;;  %v5299_v57 = vsub.f32 %v9316_v62, %v5222_v5  ;;  %v5300_v2 = vsub.f32 %v9312_v11, %v5222_v5  ;;  %v10418_v60 = vld [vmem:[#allocation58_spill] sm:$0xff]  ;;  %v10419_v62 = vld [vmem:[#allocation60_spill] sm:$0xff] }
 0x7e3   : > { %v5301_v30 = vsub.f32 %v9376_v48, %v5222_v5  ;;  %5422 = vst [vmem:[%s9182_s16 + $0x200] sm:$0xff] %v5294_v50  ;;  %5423 = vst [vmem:[%s9182_s16 + $0x208] sm:$0xff] %v5295_v46  ;;  %6849 = vpow2.f32 %v5090_v6  ;;  %v4836_v13 = vmul.f32 1.442695, %v4809_v36  ;;  %v4900_v51 = vmul.f32 1.442695, %v4873_v25 }
 0x7e4   : > { %5424 = vst [vmem:[%s9182_s16 + $0x210] sm:$0xff] %v5296_v19  ;;  %5425 = vst [vmem:[%s9182_s16 + $0x218] sm:$0xff] %v5297_v18  ;;  %v5129_v55 = vsub.f32 %v9618_v39, %v9662_v61  ;;  %v6838_v14 = vpop.eup %6837  ;;  %6851 = vpow2.f32 %v4724_v35  ;;  %v4698_v11 = vsub.f32 %v10418_v60, %v9669_v32  ;;  %v4746_v48 = vsub.f32 %v10419_v62, %v9669_v32  ;;  %v10421_v36 = vld [vmem:[#allocation61_spill] sm:$0xff]  ;;  %v10422_v35 = vld [vmem:[#allocation16_spill] sm:$0xff] }
 0x7e5   : > { %5426 = vst [vmem:[%s9182_s16 + $0x220] sm:$0xff] %v5298_v26  ;;  %5427 = vst [vmem:[%s9182_s16 + $0x228] sm:$0xff] %v5299_v57  ;;  %v4810_v29 = vsub.f32 %v10420_v22, %v9669_v32  ;;  %v4792_v40 = vadd.f32 %v6838_v14, %v6836_v31  ;;  %6853 = vpow2.f32 %v4772_v9  ;;  %v4964_v56 = vmul.f32 1.442695, %v4937_v49  ;;  %v10424_v26 = vld [vmem:[#allocation37_spill] sm:$0xff]  ;;  %v10425_v49 = vld [vmem:[#allocation36_spill] sm:$0xff] }
 0x7e6   : > { %5428 = vst [vmem:[%s9182_s16 + $0x230] sm:$0xff] %v5300_v2  ;;  %5429 = vst [vmem:[%s9182_s16 + $0x238] sm:$0xff] %v5301_v30  ;;  %v4874_v25 = vsub.f32 %v10421_v36, %v9669_v32  ;;  %v6840_v6 = vpop.eup %6839  ;;  %6855 = vpow2.f32 %v5154_v15  ;;  %v5028_v5 = vmul.f32 1.442695, %v5001_v53  ;;  %v5092_v50 = vmul.f32 1.442695, %v5065_v52 }
 0x7e7   : > { %v9726_v46 = vadd.f32 %v10422_v35, %v8892_v17  ;;  %v6842_v38 = vpop.eup %6841  ;;  %v4856_v19 = vadd.f32 %v6840_v6, %v4792_v40  ;;  %6857 = vpow2.f32 %v4836_v13  ;;  %v4726_v18 = vmul.f32 1.442695, %v4698_v11  ;;  %v10426_v6 = vld [vmem:[#allocation91_spill] sm:$0xff] }
 0x7e8   : > { %v4938_v31 = vsub.f32 %v10424_v26, %v9669_v32  ;;  %v6844_v9 = vpop.eup %6843  ;;  %6859 = vpow2.f32 %v4900_v51  ;;  %v5002_v57 = vsub.f32 %v10425_v49, %v9669_v32  ;;  %v5066_v15 = vsub.f32 %v9607_v23, %v9669_v32  ;;  %v10434_v23 = vld [vmem:[#allocation92_spill] sm:$0xff] }
 0x7e9   : > { %10423 = vst [vmem:[#allocation87_spill] sm:$0xff] %v9726_v46  ;;  %v6846_v52 = vpop.eup %6845  ;;  %v5201_v2 = vmul.f32 0.6931472, %v6844_v9  ;;  %v4920_v30 = vadd.f32 %v6842_v38, %v4856_v19  ;;  %6861 = vpow2.f32 %v4964_v56  ;;  %v5156_v14 = vmul.f32 1.442695, %v5129_v55  ;;  %v10427_v55 = vld [vmem:[#allocation42_spill] sm:$0xff] }
 0x7ea   : > { %v6848_v13 = vpop.eup %6847  ;;  %6863 = vpow2.f32 %v5028_v5  ;;  %v4774_v11 = vmul.f32 1.442695, %v4746_v48  ;;  %v4838_v40 = vmul.f32 1.442695, %v4810_v29  ;;  %v9739_v49 = vmax.f32 %v9675_v3, %v9726_v46  ;;  %v10428_v29 = vld [vmem:[#allocation44_spill] sm:$0xff]  ;;  %v10429_v9 = vld [vmem:[#allocation43_spill] sm:$0xff] }
 0x7eb   : > { %v5223_v51 = vadd.f32 %v5201_v2, %v10426_v6  ;;  %v4984_v35 = vadd.f32 %v6846_v52, %v4920_v30  ;;  %6865 = vpow2.f32 %v5092_v50  ;;  %v4902_v53 = vmul.f32 1.442695, %v4874_v25  ;;  %v10430_v50 = vld [vmem:[#allocation45_spill] sm:$0xff] }
 0x7ec   : > { %6867 = vpow2.f32 %v4726_v18  ;;  %v4966_v38 = vmul.f32 1.442695, %v4938_v31  ;;  %v5030_v56 = vmul.f32 1.442695, %v5002_v57  ;;  %v10431_v30 = vld [vmem:[#allocation85_spill] sm:$0xff]  ;;  %v10433_v31 = vld [vmem:[#allocation90_spill] sm:$0xff] }
 0x7ed   : > { %v6850_v5 = vpop.eup %6849  ;;  %v5302_v48 = vsub.f32 %v10427_v55, %v5223_v51  ;;  %v5303_v19 = vsub.f32 %v10428_v29, %v5223_v51  ;;  %v5304_v52 = vsub.f32 %v10429_v9, %v5223_v51  ;;  %v5305_v2 = vsub.f32 %v10430_v50, %v5223_v51  ;;  %v10432_v6 = vld [vmem:[#allocation89_spill] sm:$0xff]  ;;  %v10435_v9 = vld [vmem:[#allocation62_spill] sm:$0xff] }
 0x7ee   : > { %v6852_v3 = vpop.eup %6851  ;;  %v5306_v18 = vsub.f32 %v10431_v30, %v5223_v51  ;;  %v5307_v25 = vsub.f32 %v10432_v6, %v5223_v51  ;;  %v5308_v57 = vsub.f32 %v10433_v31, %v5223_v51  ;;  %v5309_v26 = vsub.f32 %v10434_v23, %v5223_v51  ;;  %v10436_v30 = vld [vmem:[#allocation64_spill] sm:$0xff]  ;;  %v10437_v23 = vld [vmem:[#allocation63_spill] sm:$0xff] }
 0x7ef   : > { %v6854_v55 = vpop.eup %6853  ;;  %5430 = vst [vmem:[%s9182_s16 + $0x240] sm:$0xff] %v5302_v48  ;;  %5431 = vst [vmem:[%s9182_s16 + $0x248] sm:$0xff] %v5303_v19  ;;  %v5048_v29 = vadd.f32 %v6848_v13, %v4984_v35  ;;  %6869 = vpow2.f32 %v4774_v11  ;;  %v4699_v50 = vsub.f32 %v10435_v9, %v9739_v49  ;;  %v4747_v36 = vsub.f32 %v10436_v30, %v9739_v49  ;;  %v10438_v48 = vld [vmem:[#allocation65_spill] sm:$0xff] }
 0x7f0   : > { %5432 = vst [vmem:[%s9182_s16 + $0x250] sm:$0xff] %v5304_v52  ;;  %5433 = vst [vmem:[%s9182_s16 + $0x258] sm:$0xff] %v5305_v2  ;;  %v6856_v22 = vpop.eup %6855  ;;  %v4793_v6 = vadd.f32 %v6854_v55, %v6852_v3  ;;  %6871 = vpow2.f32 %v5156_v14  ;;  %v4811_v51 = vsub.f32 %v10437_v23, %v9739_v49  ;;  %v4875_v13 = vsub.f32 %v10438_v48, %v9739_v49  ;;  %v10439_v52 = vld [vmem:[#allocation80_spill] sm:$0xff] }
 0x7f1   : > { %5434 = vst [vmem:[%s9182_s16 + $0x260] sm:$0xff] %v5306_v18  ;;  %5435 = vst [vmem:[%s9182_s16 + $0x268] sm:$0xff] %v5307_v25  ;;  %v6858_v11 = vpop.eup %6857  ;;  %v5112_v35 = vadd.f32 %v6850_v5, %v5048_v29  ;;  %6873 = vpow2.f32 %v4838_v40  ;;  %v5094_v19 = vmul.f32 1.442695, %v5066_v15  ;;  %v9767_v2 = vadd.f32 %v10439_v52, %v8892_v17 }
 0x7f2   : > { %5436 = vst [vmem:[%s9182_s16 + $0x270] sm:$0xff] %v5308_v57  ;;  %5437 = vst [vmem:[%s9182_s16 + $0x278] sm:$0xff] %v5309_v26  ;;  %v6860_v18 = vpop.eup %6859  ;;  %v4857_v25 = vadd.f32 %v6858_v11, %v4793_v6  ;;  %6875 = vpow2.f32 %v4902_v53  ;;  %v4728_v26 = vmul.f32 1.442695, %v4699_v50  ;;  %v4776_v3 = vmul.f32 1.442695, %v4747_v36 }
 0x7f3   : > { %v6862_v14 = vpop.eup %6861  ;;  %v5176_v31 = vadd.f32 %v6856_v22, %v5112_v35  ;;  %6877 = vpow2.f32 %v4966_v38  ;;  %v10440_v57 = vld [vmem:[#allocation93_spill] sm:$0xff]  ;;  %v5003_v5 = vsub.f32 %v9531_v24, %v9739_v49  ;;  %v5067_v29 = vsub.f32 %v9640_v54, %v9739_v49 }
 0x7f4   : > { %v4939_v55 = vsub.f32 %v10440_v57, %v9739_v49  ;;  %v6864_v40 = vpop.eup %6863  ;;  %v4921_v15 = vadd.f32 %v6860_v18, %v4857_v25  ;;  %6879 = vpow2.f32 %v5030_v56  ;;  %v5131_v53 = vsub.f32 %v9726_v46, %v9739_v49  ;;  %v10442_v18 = vld [vmem:[#allocation68_spill] sm:$0xff]  ;;  %v10444_v54 = vld [vmem:[#allocation69_spill] sm:$0xff] }
 0x7f5   : > { %v6866_v50 = vpop.eup %6865  ;;  %6881 = vlog2.f32 %v5176_v31  ;;  %v10441_v22 = vsub.f32 %v9636_v10, %v9669_v32  ;;  %v4840_v38 = vmul.f32 1.442695, %v4811_v51  ;;  %v9782_v6 = vmax.f32 %v9681_v4, %v9767_v2  ;;  %v10443_v31 = vld [vmem:[#allocation70_spill] sm:$0xff]  ;;  %v10445_v4 = vld [vmem:[#allocation71_spill] sm:$0xff] }
 0x7f6   : > { %v6868_v11 = vpop.eup %6867  ;;  %v4985_v35 = vadd.f32 %v6862_v14, %v4921_v15  ;;  %6883 = vpow2.f32 %v5094_v19  ;;  %v4904_v56 = vmul.f32 1.442695, %v4875_v13  ;;  %v4968_v52 = vmul.f32 1.442695, %v4939_v55  ;;  %v10446_v14 = vld [vmem:[#allocation18_spill] sm:$0xff]  ;;  %v10447_v55 = vld [vmem:[#allocation81_spill] sm:$0xff] }
 0x7f7   : > { %v5158_v36 = vmul.f32 1.442695, %v10441_v22  ;;  %6885 = vpow2.f32 %v4728_v26  ;;  %v4700_v25 = vsub.f32 %v10442_v18, %v9782_v6  ;;  %v4748_v46 = vsub.f32 %v10443_v31, %v9782_v6  ;;  %v10448_v31 = vld [vmem:[#allocation84_spill] sm:$0xff] }
 0x7f8   : > { %v4812_v22 = vsub.f32 %v10444_v54, %v9782_v6  ;;  %v5049_v51 = vadd.f32 %v6864_v40, %v4985_v35  ;;  %6887 = vpow2.f32 %v4776_v3  ;;  %v4876_v24 = vsub.f32 %v10445_v4, %v9782_v6 }
 0x7f9   : > { %v4940_v19 = vsub.f32 %v10446_v14, %v9782_v6  ;;  %v6870_v13 = vpop.eup %6869  ;;  %6889 = vpow2.f32 %v5158_v36  ;;  %v5032_v26 = vmul.f32 1.442695, %v5003_v5  ;;  %v9796_v15 = vadd.f32 %v10447_v55, %v8880_v28 }
 0x7fa   : > { %v9800_v18 = vadd.f32 %v10448_v31, %v8892_v17  ;;  %v6872_v54 = vpop.eup %6871  ;;  %v5113_v40 = vadd.f32 %v6866_v50, %v5049_v51  ;;  %v4794_v3 = vadd.f32 %v6870_v13, %v6868_v11  ;;  %6891 = vpow2.f32 %v4840_v38 }
 0x7fb   : > { %v5096_v35 = vmul.f32 1.442695, %v5067_v29  ;;  %v6874_v4 = vpop.eup %6873  ;;  %6893 = vpow2.f32 %v4904_v56  ;;  %v4730_v57 = vmul.f32 1.442695, %v4700_v25  ;;  %v5004_v36 = vsub.f32 %v9546_v47, %v9782_v6 }
 0x7fc   : > { %v5068_v5 = vsub.f32 %v9645_v20, %v9782_v6  ;;  %v6876_v28 = vpop.eup %6875  ;;  %v5177_v55 = vadd.f32 %v6872_v54, %v5113_v40  ;;  %v4858_v14 = vadd.f32 %v6874_v4, %v4794_v3  ;;  %6895 = vpow2.f32 %v4968_v52 }
 0x7fd   : > { %v6878_v50 = vpop.eup %6877  ;;  %6897 = vpow2.f32 %v5032_v26  ;;  %v4778_v38 = vmul.f32 1.442695, %v4748_v46  ;;  %v10449_v29 = vmax.f32 %v9591_v44, %v9563_v45  ;;  %v5160_v31 = vmul.f32 1.442695, %v5131_v53  ;;  %v10450_v44 = vld [vmem:[#allocation72_spill] sm:$0xff] }
 0x7fe   : > { %v6880_v56 = vpop.eup %6879  ;;  %6899 = vlog2.f32 %v5177_v55  ;;  %v4922_v25 = vadd.f32 %v6876_v28, %v4858_v14  ;;  %v4842_v54 = vmul.f32 1.442695, %v4812_v22  ;;  %v4906_v4 = vmul.f32 1.442695, %v4876_v24  ;;  %v10451_v14 = vld [vmem:[#allocation74_spill] sm:$0xff] }
 0x7ff   : > { %v4669_v11 = vmax.f32 %v10449_v29, %v9796_v15  ;;  %v6882_v51 = vpop.eup %6881  ;;  %6901 = vpow2.f32 %v5096_v35  ;;  %v4970_v46 = vmul.f32 1.442695, %v4940_v19  ;;  %v10452_v35 = vld [vmem:[#allocation73_spill] sm:$0xff] }
 0x800   : > { %v6884_v13 = vpop.eup %6883  ;;  %v5203_v40 = vmul.f32 0.6931472, %v6882_v51  ;;  %v4986_v26 = vadd.f32 %v6878_v50, %v4922_v25  ;;  %6903 = vpow2.f32 %v4730_v57 }
 0x801   : > { %v9813_v52 = vmax.f32 %v4669_v11, %v9800_v18  ;;  %v6886_v3 = vpop.eup %6885  ;;  %6905 = vpow2.f32 %v4778_v38  ;;  %v5034_v38 = vmul.f32 1.442695, %v5004_v36  ;;  %v5098_v11 = vmul.f32 1.442695, %v5068_v5 }
 0x802   : > { %v6888_v24 = vpop.eup %6887  ;;  %v5224_v28 = vadd.f32 %v5203_v40, %v9612_v41  ;;  %v5050_v55 = vadd.f32 %v6880_v56, %v4986_v26  ;;  %6907 = vpow2.f32 %v5160_v31 }
 0x803   : > { %v4701_v29 = vsub.f32 %v10450_v44, %v9813_v52  ;;  %v4749_v53 = vsub.f32 %v10451_v14, %v9813_v52  ;;  %v4813_v22 = vsub.f32 %v10452_v35, %v9813_v52  ;;  %v4877_v57 = vsub.f32 %v10399_v37, %v9813_v52  ;;  %v6890_v19 = vpop.eup %6889 }
 0x804   : > { %v4795_v50 = vadd.f32 %v6888_v24, %v6886_v3  ;;  %6909 = vpow2.f32 %v4842_v54  ;;  %v6892_v25 = vpop.eup %6891  ;;  %v5310_v51 = vsub.f32 %v10406_v58, %v5224_v28  ;;  %v5311_v17 = vsub.f32 %v10407_v63, %v5224_v28 }
 0x805   : > { %v5312_v41 = vsub.f32 %v10408_v59, %v5224_v28  ;;  %v5313_v56 = vsub.f32 %v10358_v7, %v5224_v28  ;;  %v6894_v31 = vpop.eup %6893  ;;  %v5314_v40 = vsub.f32 %v9430_v0, %v5224_v28  ;;  %v5315_v54 = vsub.f32 %v9440_v8, %v5224_v28  ;;  %v10453_v8 = vld [vmem:[#allocation20_spill] sm:$0xff] }
 0x806   : > { %v5316_v36 = vsub.f32 %v9567_v34, %v5224_v28  ;;  %v5317_v5 = vsub.f32 %v9571_v43, %v5224_v28  ;;  %v6896_v58 = vpop.eup %6895  ;;  %5438 = vst [vmem:[%s9182_s16 + $0x280] sm:$0xff] %v5310_v51  ;;  %5439 = vst [vmem:[%s9182_s16 + $0x288] sm:$0xff] %v5311_v17  ;;  %v5114_v63 = vadd.f32 %v6884_v13, %v5050_v55  ;;  %6911 = vpow2.f32 %v4906_v4 }
 0x807   : > { %5440 = vst [vmem:[%s9182_s16 + $0x290] sm:$0xff] %v5312_v41  ;;  %5441 = vst [vmem:[%s9182_s16 + $0x298] sm:$0xff] %v5313_v56  ;;  %v4859_v7 = vadd.f32 %v6892_v25, %v4795_v50  ;;  %v4732_v59 = vmul.f32 1.442695, %v4701_v29  ;;  %v6898_v26 = vpop.eup %6897  ;;  %6913 = vpow2.f32 %v4970_v46  ;;  %v4780_v0 = vmul.f32 1.442695, %v4749_v53 }
 0x808   : > { %5442 = vst [vmem:[%s9182_s16 + $0x2a0] sm:$0xff] %v5314_v40  ;;  %5443 = vst [vmem:[%s9182_s16 + $0x2a8] sm:$0xff] %v5315_v54  ;;  %v4941_v34 = vsub.f32 %v10453_v8, %v9813_v52  ;;  %v5005_v43 = vsub.f32 %v9563_v45, %v9813_v52  ;;  %v6900_v17 = vpop.eup %6899  ;;  %v5178_v3 = vadd.f32 %v6890_v19, %v5114_v63  ;;  %6915 = vpow2.f32 %v5034_v38 }
 0x809   : > { %5444 = vst [vmem:[%s9182_s16 + $0x2b0] sm:$0xff] %v5316_v36  ;;  %5445 = vst [vmem:[%s9182_s16 + $0x2b8] sm:$0xff] %v5317_v5  ;;  %v4923_v24 = vadd.f32 %v6894_v31, %v4859_v7  ;;  %v5069_v4 = vsub.f32 %v9796_v15, %v9813_v52  ;;  %v6902_v13 = vpop.eup %6901  ;;  %v5205_v29 = vmul.f32 0.6931472, %v6900_v17  ;;  %6917 = vpow2.f32 %v5098_v11 }
 0x80a   : > { %v6904_v28 = vpop.eup %6903  ;;  %6919 = vlog2.f32 %v5178_v3  ;;  %v5133_v53 = vsub.f32 %v9800_v18, %v9813_v52  ;;  %v10454_v19 = vsub.f32 %v9767_v2, %v9782_v6  ;;  %v4844_v38 = vmul.f32 1.442695, %v4813_v22 }
 0x80b   : > { %v4987_v46 = vadd.f32 %v6896_v58, %v4923_v24  ;;  %v6906_v55 = vpop.eup %6905  ;;  %v5225_v50 = vadd.f32 %v5205_v29, %v9662_v61  ;;  %6921 = vpow2.f32 %v4732_v59  ;;  %v4908_v56 = vmul.f32 1.442695, %v4877_v57 }
 0x80c   : > { %v5162_v25 = vmul.f32 1.442695, %v10454_v19  ;;  %v6908_v51 = vpop.eup %6907  ;;  %v4796_v41 = vadd.f32 %v6906_v55, %v6904_v28  ;;  %6923 = vpow2.f32 %v4780_v0  ;;  %v5100_v0 = vmul.f32 1.442695, %v5069_v4 }
 0x80d   : > { %v5051_v11 = vadd.f32 %v6898_v26, %v4987_v46  ;;  %v5318_v40 = vsub.f32 %v10414_v12, %v5225_v50  ;;  %v5319_v61 = vsub.f32 %v10415_v21, %v5225_v50  ;;  %v5320_v54 = vsub.f32 %v10416_v33, %v5225_v50 }
 0x80e   : > { %v6910_v31 = vpop.eup %6909  ;;  %v5321_v22 = vsub.f32 %v10366_v1, %v5225_v50  ;;  %v5322_v36 = vsub.f32 %v9481_v42, %v5225_v50  ;;  %v5323_v5 = vsub.f32 %v9495_v16, %v5225_v50  ;;  %v5324_v58 = vsub.f32 %v9603_v27, %v5225_v50 }
 0x80f   : > { %v5325_v57 = vsub.f32 %v9618_v39, %v5225_v50  ;;  %5446 = vst [vmem:[%s9182_s16 + $0x2c0] sm:$0xff] %v5318_v40  ;;  %5447 = vst [vmem:[%s9182_s16 + $0x2c8] sm:$0xff] %v5319_v61  ;;  %v5115_v12 = vadd.f32 %v6902_v13, %v5051_v11  ;;  %v4860_v21 = vadd.f32 %v6910_v31, %v4796_v41  ;;  %6925 = vpow2.f32 %v5162_v25  ;;  %v10455_v50 = vld [vmem:[#allocation59_spill] sm:$0xff]  ;;  %v10456_v25 = vld [vmem:[#allocation61_spill] sm:$0xff] }
 0x810   : > { %5448 = vst [vmem:[%s9182_s16 + $0x2d0] sm:$0xff] %v5320_v54  ;;  %5449 = vst [vmem:[%s9182_s16 + $0x2d8] sm:$0xff] %v5321_v22  ;;  %v6912_v33 = vpop.eup %6911  ;;  %6927 = vpow2.f32 %v4844_v38  ;;  %v4972_v42 = vmul.f32 1.442695, %v4941_v34  ;;  %v5036_v39 = vmul.f32 1.442695, %v5005_v43 }
 0x811   : > { %5450 = vst [vmem:[%s9182_s16 + $0x2e0] sm:$0xff] %v5322_v36  ;;  %5451 = vst [vmem:[%s9182_s16 + $0x2e8] sm:$0xff] %v5323_v5  ;;  %v6914_v1 = vpop.eup %6913  ;;  %v5179_v16 = vadd.f32 %v6908_v51, %v5115_v12  ;;  %v4924_v63 = vadd.f32 %v6912_v33, %v4860_v21  ;;  %6929 = vpow2.f32 %v4908_v56  ;;  %v5164_v43 = vmul.f32 1.442695, %v5133_v53  ;;  %v10457_v51 = vld [vmem:[#allocation37_spill] sm:$0xff]  ;;  %v10458_v41 = vld [vmem:[#allocation36_spill] sm:$0xff] }
 0x812   : > { %5452 = vst [vmem:[%s9182_s16 + $0x2f0] sm:$0xff] %v5324_v58  ;;  %5453 = vst [vmem:[%s9182_s16 + $0x2f8] sm:$0xff] %v5325_v57  ;;  %v6916_v27 = vpop.eup %6915  ;;  %v10459_v53 = vld [vmem:[#allocation22_spill] sm:$0xff] }
 0x813   : > { %v6918_v7 = vpop.eup %6917  ;;  %6931 = vlog2.f32 %v5179_v16  ;;  %v4988_v59 = vadd.f32 %v6914_v1, %v4924_v63  ;;  %v10460_v63 = vld [vmem:[#allocation93_spill] sm:$0xff] }
 0x814   : > { %v6920_v26 = vpop.eup %6919  ;;  %6933 = vpow2.f32 %v4972_v42 }
 0x815   : > { %v6922_v17 = vpop.eup %6921  ;;  %v5207_v3 = vmul.f32 0.6931472, %v6920_v26  ;;  %v5052_v24 = vadd.f32 %v6916_v27, %v4988_v59  ;;  %6935 = vpow2.f32 %v5036_v39  ;;  %v10461_v39 = vld [vmem:[#allocation17_spill] sm:$0xff]  ;;  %v10462_v59 = vld [vmem:[#allocation86_spill] sm:$0xff]  ;;  %v10463_v26 = vld [vmem:[#allocation87_spill] sm:$0xff] }
 0x816   : > { %v6924_v13 = vpop.eup %6923  ;;  %6937 = vpow2.f32 %v5100_v0 }
 0x817   : > { %v5226_v34 = vadd.f32 %v5207_v3, %v9669_v32  ;;  %v5116_v29 = vadd.f32 %v6918_v7, %v5052_v24  ;;  %v4797_v28 = vadd.f32 %v6924_v13, %v6922_v17  ;;  %6939 = vpow2.f32 %v5164_v43  ;;  %v10464_v24 = vld [vmem:[#allocation68_spill] sm:$0xff] }
 0x819   : > { %v6926_v46 = vpop.eup %6925  ;;  %v5326_v55 = vsub.f32 %v10418_v60, %v5226_v34  ;;  %v5327_v4 = vsub.f32 %v10419_v62, %v5226_v34  ;;  %v5328_v19 = vsub.f32 %v10455_v50, %v5226_v34  ;;  %v5329_v38 = vsub.f32 %v10456_v25, %v5226_v34 }
 0x81a   : > { %v6928_v32 = vpop.eup %6927  ;;  %v5330_v11 = vsub.f32 %v10457_v51, %v5226_v34  ;;  %v5331_v56 = vsub.f32 %v10458_v41, %v5226_v34  ;;  %v5332_v31 = vsub.f32 %v10459_v53, %v5226_v34  ;;  %v5333_v40 = vsub.f32 %v9636_v10, %v5226_v34  ;;  %v10465_v34 = vld [vmem:[#allocation70_spill] sm:$0xff] }
 0x81b   : > { %5454 = vst [vmem:[%s9182_s16 + $0x300] sm:$0xff] %v5326_v55  ;;  %5455 = vst [vmem:[%s9182_s16 + $0x308] sm:$0xff] %v5327_v4  ;;  %v5180_v60 = vadd.f32 %v6926_v46, %v5116_v29  ;;  %v4861_v62 = vadd.f32 %v6928_v32, %v4797_v28  ;;  %v6930_v61 = vpop.eup %6929  ;;  %v10466_v28 = vld [vmem:[#allocation69_spill] sm:$0xff]  ;;  %v10467_v46 = vld [vmem:[#allocation71_spill] sm:$0xff] }
 0x81c   : > { %5456 = vst [vmem:[%s9182_s16 + $0x310] sm:$0xff] %v5328_v19  ;;  %5457 = vst [vmem:[%s9182_s16 + $0x318] sm:$0xff] %v5329_v38  ;;  %v10468_v4 = vld [vmem:[#allocation18_spill] sm:$0xff] }
 0x81d   : > { %5458 = vst [vmem:[%s9182_s16 + $0x320] sm:$0xff] %v5330_v11  ;;  %5459 = vst [vmem:[%s9182_s16 + $0x328] sm:$0xff] %v5331_v56  ;;  %v6932_v54 = vpop.eup %6931  ;;  %6941 = vlog2.f32 %v5180_v60  ;;  %v4925_v22 = vadd.f32 %v6930_v61, %v4861_v62 }
 0x81e   : > { %5460 = vst [vmem:[%s9182_s16 + $0x330] sm:$0xff] %v5332_v31  ;;  %5461 = vst [vmem:[%s9182_s16 + $0x338] sm:$0xff] %v5333_v40  ;;  %v6934_v36 = vpop.eup %6933  ;;  %v5209_v5 = vmul.f32 0.6931472, %v6932_v54 }
 0x81f   : > { %v4989_v10 = vadd.f32 %v6934_v36, %v4925_v22  ;;  %v6936_v58 = vpop.eup %6935 }
 0x820   : > { %v5227_v57 = vadd.f32 %v5209_v5, %v9739_v49  ;;  %v6938_v21 = vpop.eup %6937 }
 0x821   : > { %v5053_v12 = vadd.f32 %v6936_v58, %v4989_v10  ;;  %v6940_v17 = vpop.eup %6939 }
 0x822   : > { %v5334_v33 = vsub.f32 %v10435_v9, %v5227_v57  ;;  %v5335_v42 = vsub.f32 %v10436_v30, %v5227_v57  ;;  %v5336_v1 = vsub.f32 %v10437_v23, %v5227_v57  ;;  %v5337_v16 = vsub.f32 %v10438_v48, %v5227_v57 }
 0x823   : > { %v5338_v27 = vsub.f32 %v10460_v63, %v5227_v57  ;;  %v5339_v7 = vsub.f32 %v10461_v39, %v5227_v57  ;;  %v5340_v49 = vsub.f32 %v10462_v59, %v5227_v57  ;;  %v5341_v0 = vsub.f32 %v10463_v26, %v5227_v57 }
 0x824   : > { %5462 = vst [vmem:[%s9182_s16 + $0x340] sm:$0xff] %v5334_v33  ;;  %5463 = vst [vmem:[%s9182_s16 + $0x348] sm:$0xff] %v5335_v42  ;;  %v5117_v9 = vadd.f32 %v6938_v21, %v5053_v12 }
 0x825   : > { %5464 = vst [vmem:[%s9182_s16 + $0x350] sm:$0xff] %v5336_v1  ;;  %5465 = vst [vmem:[%s9182_s16 + $0x358] sm:$0xff] %v5337_v16 }
 0x826   : > { %5466 = vst [vmem:[%s9182_s16 + $0x360] sm:$0xff] %v5338_v27  ;;  %5467 = vst [vmem:[%s9182_s16 + $0x368] sm:$0xff] %v5339_v7  ;;  %v5181_v30 = vadd.f32 %v6940_v17, %v5117_v9 }
 0x827   : > { %5468 = vst [vmem:[%s9182_s16 + $0x370] sm:$0xff] %v5340_v49  ;;  %5469 = vst [vmem:[%s9182_s16 + $0x378] sm:$0xff] %v5341_v0  ;;  %v6942_v23 = vpop.eup %6941 }
 0x828   : > { %v5211_v48 = vmul.f32 0.6931472, %v6942_v23  ;;  %6943 = vlog2.f32 %v5181_v30 }
 0x82a   : > { %v5228_v3 = vadd.f32 %v5211_v48, %v9782_v6 }
 0x82c   : > { %v5342_v13 = vsub.f32 %v10464_v24, %v5228_v3  ;;  %v5343_v29 = vsub.f32 %v10465_v34, %v5228_v3  ;;  %v5344_v43 = vsub.f32 %v10466_v28, %v5228_v3  ;;  %v5345_v55 = vsub.f32 %v10467_v46, %v5228_v3 }
 0x82d   : > { %v5346_v50 = vsub.f32 %v10468_v4, %v5228_v3  ;;  %v5347_v19 = vsub.f32 %v9546_v47, %v5228_v3  ;;  %v5348_v25 = vsub.f32 %v9645_v20, %v5228_v3  ;;  %v5349_v38 = vsub.f32 %v9767_v2, %v5228_v3 }
 0x82e   : > { %5470 = vst [vmem:[%s9182_s16 + $0x380] sm:$0xff] %v5342_v13  ;;  %5471 = vst [vmem:[%s9182_s16 + $0x388] sm:$0xff] %v5343_v29 }
 0x82f   : > { %5472 = vst [vmem:[%s9182_s16 + $0x390] sm:$0xff] %v5344_v43  ;;  %5473 = vst [vmem:[%s9182_s16 + $0x398] sm:$0xff] %v5345_v55 }
 0x830   : > { %5474 = vst [vmem:[%s9182_s16 + $0x3a0] sm:$0xff] %v5346_v50  ;;  %5475 = vst [vmem:[%s9182_s16 + $0x3a8] sm:$0xff] %v5347_v19 }
 0x831   : > { %5476 = vst [vmem:[%s9182_s16 + $0x3b0] sm:$0xff] %v5348_v25  ;;  %5477 = vst [vmem:[%s9182_s16 + $0x3b8] sm:$0xff] %v5349_v38 }
 0x832   : > { %v6944_v6 = vpop.eup %6943 }
 0x833   : > { %v5213_v32 = vmul.f32 0.6931472, %v6944_v6 }
 0x835   : > { %v5229_v47 = vadd.f32 %v5213_v32, %v9813_v52 }
 0x837   : > { %v5350_v20 = vsub.f32 %v10450_v44, %v5229_v47  ;;  %v5351_v2 = vsub.f32 %v10451_v14, %v5229_v47  ;;  %v5352_v51 = vsub.f32 %v10452_v35, %v5229_v47  ;;  %v5353_v11 = vsub.f32 %v10399_v37, %v5229_v47 }
 0x838   : > { %v5354_v52 = vsub.f32 %v10453_v8, %v5229_v47  ;;  %v5355_v44 = vsub.f32 %v9563_v45, %v5229_v47  ;;  %v5356_v14 = vsub.f32 %v9796_v15, %v5229_v47  ;;  %v5357_v35 = vsub.f32 %v9800_v18, %v5229_v47 }
 0x839   : > { %5478 = vst [vmem:[%s9182_s16 + $0x3c0] sm:$0xff] %v5350_v20  ;;  %5479 = vst [vmem:[%s9182_s16 + $0x3c8] sm:$0xff] %v5351_v2 }
 0x83a   : > { %5480 = vst [vmem:[%s9182_s16 + $0x3d0] sm:$0xff] %v5352_v51  ;;  %5481 = vst [vmem:[%s9182_s16 + $0x3d8] sm:$0xff] %v5353_v11 }
 0x83b   : > { %5482 = vst [vmem:[%s9182_s16 + $0x3e0] sm:$0xff] %v5354_v52  ;;  %5483 = vst [vmem:[%s9182_s16 + $0x3e8] sm:$0xff] %v5355_v44 }
 0x83c   : > { %5484 = vst [vmem:[%s9182_s16 + $0x3f0] sm:$0xff] %v5356_v14  ;;  %5485 = vst [vmem:[%s9182_s16 + $0x3f8] sm:$0xff] %v5357_v35 }
 0x83d   : > { %6986 = shalt.err (!%p6983_p7)
}
 0x83e   : > { %s6987_s17 = scalar_lea.hbm %s9929_s22, 16384  ;;  %s6991_s24 = scalar_lea.hbm %s10002_s14, 32768 }
 0x83f   : > { %p6988_p8 = scmp.ne.s32.totalorder %s9929_s22, %s6987_s17  ;;  %p6992_p1 = scmp.lt.u32.totalorder %s9929_s22, %s10002_s14 }
 0x840   : > { %p6993_p0 = scmp.lt.u32.totalorder %s6991_s24, %s6987_s17  ;;  %p6995_p6 = scmp.lt.u32.totalorder %s6987_s17, %s9929_s22 }
 0x841   : > { %p6989_p11 = pnand %p6988_p8, %p10469_p9 }
 0x842   : > { %p6994_p5 = por %p6993_p0, %p6992_p1 }
 0x843   : > { %p6990_p13 = pneg %p6989_p11 }
 0x844   : > { %p6996_p10 = por %p6995_p6, %p6994_p5 }
 0x846   : > { %p6997_p12 = pnand %p6996_p10, %p6990_p13 }
 0x848   : > { %7000 = shalt.err (!%p6997_p12)
}
 0x849   : > { %s7047_s29 = smov 1024   ;;  %s7048_s18 = smov 64  }
 0x84a   : > { %6200 = dma.vmem_to_hbm [thread:$0]  (%p10469_p9), %s9931_s26, 16384, %s9929_s22, %s9947_s27, %s7047_s29, %s7047_s29, %s7048_s18  }
 0x84b PF: > { %s10470_s0 = sld [smem:[#allocation8_spill]]  ;;  %s10471_s23 = sld [smem:[#allocation12_spill]] }
 0x84c   : > { %p6212_p2 = scmp.ge.s32.totalorder %s7039_s21, 2 }
 0x851   : > { %s5525_s30 = sand.u32 1, %s10470_s0   ;;  %p10472_p3 = scmp.ne.s32.totalorder %s10471_s23, 0 }
 0x852   : > { %s5526_s17 = scalar_lea.sflag [#allocation4], %s5525_s30 }
 0x853   : > { %p6207_p4 = pnand %p6212_p2, %p10472_p3 }
 0x855   : > { %7022 = dma.done.wait (!%p6207_p4), %s5526_s17, 16384  }
 0x856   : > { %7024 = vsyncadd (!%p6207_p4), %s5526_s17, 4294950912  ;;  %s10473_s21 = sld [smem:[#allocation10_spill]]  ;;  %s10474_s16 = sld [smem:[#allocation9_spill]] }
 0x857   : > { %s10475_s20 = sld [smem:[#allocation11_spill]]  ;;  %s10476_s18 = smov %s7031_s19 }
 0x85c   : > { %p27_p7 = scmp.ge.s32.totalorder %s10473_s21, 4   ;;  %s10477_s19 = smov %s10474_s16 }
 0x85e   :  { %29 = sbr.rel (!%p27_p7) target bundleno = 6 (0x6), region = 131 }
 0x865   :  { %5539 = vsyncpa [#allocation3], 1 }
 0x866   :  { %5541 = vsyncpa [#allocation3 + $0x1], 1 }
 0x867   :  { %5542 = vsyncpa [#allocation4], 1 }
 0x868   :  { %5544 = vsyncpa [#allocation4 + $0x1], 1 }

</bundles_post_ra>
